<compile_context>
chip_gen: v5e
topology: v5e:2x2
jax: 0.10.0
libtpu: 0.0.40
codegen_flags: <defaults>
</compile_context>

<pallas_src>
import math
from functools import partial

import jax
import jax.numpy as jnp
from jax import lax
from jax.experimental import pallas as pl
from jax.experimental.pallas import tpu as pltpu

LN_EPS = 1e-5


def _round_up(x, m):
    return ((x + m - 1) // m) * m


def _pick_block_m(M, pref=256):
    # 256-multiples feed the 256-wide MXU on v6e/v7x; fall back to smaller
    # divisors (still sublane-aligned) so small problems get >= 2 grid steps.
    for bm in (pref, pref // 2, M // 2):
        if bm >= 8 and bm % 8 == 0 and M % bm == 0:
            return bm
    return M


def _const_spec(shape):
    """BlockSpec for a weight that is identical for every grid step.

    Constant index map -> single buffer (double buffering would only double the
    VMEM footprint).  Falls back to default pipelining on older JAX versions.
    """
    ndim = len(shape)
    index_map = lambda b: (0,) * ndim
    try:
        return pl.BlockSpec(shape, index_map, pipeline_mode=pl.Buffered(1))
    except (AttributeError, TypeError):
        return pl.BlockSpec(shape, index_map)


def _attn_flops(M, S, D):
    # 4 D x D-column projections per row + scores + p@v.
    return 2 * M * D * (4 * D) + 4 * M * S * D


def _ffn_flops(M, D, F):
    return 4 * M * D * F


# ----------------------------- in-kernel building blocks -----------------------------

def _layernorm(y, gamma, beta, eps):
    mean = jnp.mean(y, axis=-1, keepdims=True)
    var = jnp.mean((y - mean) ** 2, axis=-1, keepdims=True)
    return gamma * ((y - mean) * lax.rsqrt(var + eps)) + beta


def _mha(xq_f32, xkv_f32, wq, bq, wk, bk, wv, bv, wo, bo, *, num_heads, head_dim):
    """Multi-head attention with head-major weight refs.

    wq/wk/wv : (H, D, Dh) bf16 refs     bq/bk/bv : (H, 1, Dh) f32 refs
    wo       : (H, Dh, D) bf16 ref      bo       : (1, D)     f32 ref

    Only rank-2 MXU matmuls; per-head q/k/v come from their own weight slab
    (static leading-axis ref index -> no lane-offset activation slices) and
    head outputs are accumulated straight into the output projection (no
    lane-dim concatenate / masked stores).
    """
    scale = 1.0 / math.sqrt(head_dim)
    xq = xq_f32.astype(jnp.bfloat16)
    xkv = xkv_f32.astype(jnp.bfloat16)
    out = None
    # TODO(synk): for long sequences add KV tiling + online softmax instead of
    # materializing the full (S, S) score block per head.
    for h in range(num_heads):
        q = jnp.dot(xq, wq[h], preferred_element_type=jnp.float32) + bq[h]
        k = jnp.dot(xkv, wk[h], preferred_element_type=jnp.float32) + bk[h]
        v = jnp.dot(xkv, wv[h], preferred_element_type=jnp.float32) + bv[h]
        # q @ k^T without materializing a transpose: contract the last dims.
        s = lax.dot_general(q.astype(jnp.bfloat16), k.astype(jnp.bfloat16),
                            (((1,), (1,)), ((), ())),
                            preferred_element_type=jnp.float32) * scale
        m = jnp.max(s, axis=-1, keepdims=True)
        p = jnp.exp(s - m)
        denom = jnp.sum(p, axis=-1, keepdims=True)
        o_h = jnp.dot(p.astype(jnp.bfloat16), v.astype(jnp.bfloat16),
                      preferred_element_type=jnp.float32)
        # Deferred softmax normalization on the small (S, Dh) tile (EUP recip).
        o_h = o_h * pl.reciprocal(denom, approx=True)
        contrib = jnp.dot(o_h.astype(jnp.bfloat16), wo[h],
                          preferred_element_type=jnp.float32)
        out = contrib if out is None else out + contrib
    return out + bo[...]


def _ffn(x_f32, w1, b1, w2, b2):
    # TODO(synk): for very large F on v7x, tile the hidden dim (grid axis + f32
    # accumulator) instead of keeping w1/w2 fully resident.
    h = jnp.dot(x_f32.astype(jnp.bfloat16), w1[...],
                preferred_element_type=jnp.float32) + b1[...]
    h = jnp.maximum(h, 0.0)
    return jnp.dot(h.astype(jnp.bfloat16), w2[...],
                   preferred_element_type=jnp.float32) + b2[...]


# ----------------------------- fused layer kernels -----------------------------

def _encoder_layer_kernel(x_ref,
                          wq, bq, wk, bk, wv, bv, wo, bo, g1, be1,
                          w1, b1, w2, b2, g2, be2,
                          o_ref, *, num_heads, head_dim, eps):
    # Fused: QKV proj -> attention -> out proj -> +residual -> LN ->
    #        FFN (lin1/ReLU/lin2) -> +residual -> LN.
    x = x_ref[...]                                                    # (S, D) f32
    attn = _mha(x, x, wq, bq, wk, bk, wv, bv, wo, bo,
                num_heads=num_heads, head_dim=head_dim)
    y = _layernorm(attn + x, g1[...], be1[...], eps)
    f = _ffn(y, w1, b1, w2, b2)
    # NOTE: with real d_model >= 128 this store is lane-dense; toy D=32 is not.
    o_ref[...] = _layernorm(f + y, g2[...], be2[...], eps)


def _decoder_layer_kernel(xe_ref, y_ref,
                          swq, sbq, swk, sbk, swv, sbv, swo, sbo, g1, be1,
                          cwq, cbq, cwk, cbk, cwv, cbv, cwo, cbo, g2, be2,
                          w1, b1, w2, b2, g3, be3,
                          o_ref, *, num_heads, head_dim, eps):
    # Fused decoder layer: self-attn -> LN -> cross-attn (Q from decoder,
    # K/V from encoder output) -> LN -> FFN -> LN.
    xe = xe_ref[...]                                                  # encoder out
    y = y_ref[...]
    attn = _mha(y, y, swq, sbq, swk, sbk, swv, sbv, swo, sbo,
                num_heads=num_heads, head_dim=head_dim)
    y = _layernorm(attn + y, g1[...], be1[...], eps)
    cattn = _mha(y, xe, cwq, cbq, cwk, cbk, cwv, cbv, cwo, cbo,
                 num_heads=num_heads, head_dim=head_dim)
    y = _layernorm(cattn + y, g2[...], be2[...], eps)
    f = _ffn(y, w1, b1, w2, b2)
    o_ref[...] = _layernorm(f + y, g3[...], be3[...], eps)


def _linear_bias_kernel(x_ref, w_ref, b_ref, o_ref):
    o_ref[...] = jnp.dot(x_ref[...].astype(jnp.bfloat16), w_ref[...],
                         preferred_element_type=jnp.float32) + b_ref[...]


# ----------------------------- kernel wrappers -----------------------------

def encoder_layer_call(x_flat, B, S, lp, num_heads, eps=LN_EPS):
    M, D = x_flat.shape
    hd = D // num_heads
    F = lp["ffn_w1"].shape[1]
    a = lp["attn"]
    args = (x_flat,
            a["w_q"], a["b_q"], a["w_k"], a["b_k"], a["w_v"], a["b_v"],
            a["w_o"], a["b_o"], lp["ln1_g"], lp["ln1_b"],
            lp["ffn_w1"], lp["ffn_b1"], lp["ffn_w2"], lp["ffn_b2"],
            lp["ln2_g"], lp["ln2_b"])
    row_spec = pl.BlockSpec((S, D), lambda b: (b, 0))
    in_specs = [row_spec] + [_const_spec(v.shape) for v in args[1:]]
    cost = pl.CostEstimate(
        flops=int(_attn_flops(M, S, D) + _ffn_flops(M, D, F)),
        transcendentals=int(M * S * num_heads),
        bytes_accessed=int(8 * M * D + 2 * (4 * D * D + 2 * D * F)))
    return pl.pallas_call(
        partial(_encoder_layer_kernel, num_heads=num_heads, head_dim=hd, eps=eps),
        out_shape=jax.ShapeDtypeStruct((M, D), jnp.float32),
        grid=(B,),
        in_specs=in_specs,
        out_specs=row_spec,
        compiler_params=pltpu.CompilerParams(dimension_semantics=("parallel",)),
        cost_estimate=cost,
    )(*args)


def decoder_layer_call(x_enc_flat, y_flat, B, S, lp, num_heads, eps=LN_EPS):
    # TODO(synk): encoder/decoder sequence lengths are assumed equal (as in the
    # reference forward) and attention masks (None in the reference) are not wired in.
    M, D = y_flat.shape
    hd = D // num_heads
    F = lp["ffn_w1"].shape[1]
    sa, ca = lp["self_attn"], lp["cross_attn"]
    args = (x_enc_flat, y_flat,
            sa["w_q"], sa["b_q"], sa["w_k"], sa["b_k"], sa["w_v"], sa["b_v"],
            sa["w_o"], sa["b_o"], lp["ln1_g"], lp["ln1_b"],
            ca["w_q"], ca["b_q"], ca["w_k"], ca["b_k"], ca["w_v"], ca["b_v"],
            ca["w_o"], ca["b_o"], lp["ln2_g"], lp["ln2_b"],
            lp["ffn_w1"], lp["ffn_b1"], lp["ffn_w2"], lp["ffn_b2"],
            lp["ln3_g"], lp["ln3_b"])
    row_spec = pl.BlockSpec((S, D), lambda b: (b, 0))
    in_specs = [row_spec, row_spec] + [_const_spec(v.shape) for v in args[2:]]
    cost = pl.CostEstimate(
        flops=int(2 * _attn_flops(M, S, D) + _ffn_flops(M, D, F)),
        transcendentals=int(2 * M * S * num_heads),
        bytes_accessed=int(12 * M * D + 2 * (8 * D * D + 2 * D * F)))
    return pl.pallas_call(
        partial(_decoder_layer_kernel, num_heads=num_heads, head_dim=hd, eps=eps),
        out_shape=jax.ShapeDtypeStruct((M, D), jnp.float32),
        grid=(B,),
        in_specs=in_specs,
        out_specs=row_spec,
        compiler_params=pltpu.CompilerParams(dimension_semantics=("parallel",)),
        cost_estimate=cost,
    )(*args)


def linear_proj(x_flat, w_pad, b_pad, n_valid, max_tn=1024):
    """Final vocab projection: lane-padded weight (done once at prepare time),
    tiled over (M row tiles, N vocab tiles) so the weight never has to be
    resident as one block (v7x-friendly) and stores are lane-dense."""
    M, D = x_flat.shape
    n_pad = w_pad.shape[1]
    bm = _pick_block_m(M)
    tn = min(max_tn, n_pad)
    while n_pad % tn:
        tn -= 128
    grid = (M // bm, n_pad // tn)
    cost = pl.CostEstimate(
        flops=int(2 * M * D * n_pad), transcendentals=0,
        bytes_accessed=int(4 * M * D + 2 * D * n_pad + 4 * M * n_pad))
    out = pl.pallas_call(
        _linear_bias_kernel,
        out_shape=jax.ShapeDtypeStruct((M, n_pad), jnp.float32),
        grid=grid,
        in_specs=[pl.BlockSpec((bm, D), lambda i, j: (i, 0)),
                  pl.BlockSpec((D, tn), lambda i, j: (0, j)),
                  pl.BlockSpec((1, tn), lambda i, j: (0, j))],
        out_specs=pl.BlockSpec((bm, tn), lambda i, j: (i, j)),
        compiler_params=pltpu.CompilerParams(
            dimension_semantics=("parallel", "parallel")),
        cost_estimate=cost,
    )(x_flat, w_pad, b_pad)
    return out[:, :n_valid]


# ----------------------------- model glue (plain JAX) -----------------------------

def positional_encoding(d_model, max_len):
    even_i = jnp.arange(0, d_model, 2, dtype=jnp.float32)
    denom = jnp.power(10000.0, even_i / d_model)
    pos = jnp.arange(max_len, dtype=jnp.float32).reshape(max_len, 1)
    even_pe = jnp.sin(pos / denom)
    odd_pe = jnp.cos(pos / denom)
    stacked = jnp.stack([even_pe, odd_pe], axis=2)
    return stacked.reshape(max_len, d_model)


def sentence_embedding(tokens, emb_table, pos_enc):
    # Real row gather (DMA), not a one-hot matmul; dropout is identity (eval).
    B, S = tokens.shape
    emb = jnp.take(emb_table, tokens, axis=0)            # (B, S, D)
    emb = emb + pos_enc[None, :S, :]
    return emb.reshape(B * S, emb.shape[-1])


def transformer_forward(params, x_tokens, y_tokens, num_heads, n_vocab):
    B, S = x_tokens.shape
    # Encoder
    x = sentence_embedding(x_tokens, params["enc_emb"], params["pos_enc"])
    for lp in params["enc_layers"]:
        x = encoder_layer_call(x, B, S, lp, num_heads)
    # Decoder
    y = sentence_embedding(y_tokens, params["dec_emb"], params["pos_enc"])
    for lp in params["dec_layers"]:
        y = decoder_layer_call(x, y, B, S, lp, num_heads)
    out = linear_proj(y, params["w_final"], params["b_final"], n_vocab)
    return out.reshape(B, S, n_vocab)


# ----------------------------- parameters -----------------------------

def _init(key, shape, scale=0.05):
    return scale * jax.random.normal(key, shape, dtype=jnp.float32)


def init_params(key, *, v_eng, v_cn, d_model, ffn_hidden, num_layers, max_len):
    """PyTorch-layout parameters ((in, out) weights; fused qkv / kv columns)."""
    keys = iter(jax.random.split(key, 256))

    def attn_params():
        return {"w_qkv": _init(next(keys), (d_model, 3 * d_model)),
                "b_qkv": _init(next(keys), (3 * d_model,)),
                "w_o": _init(next(keys), (d_model, d_model)),
                "b_o": _init(next(keys), (d_model,))}

    def cross_attn_params():
        return {"w_q": _init(next(keys), (d_model, d_model)),
                "b_q": _init(next(keys), (d_model,)),
                "w_kv": _init(next(keys), (d_model, 2 * d_model)),
                "b_kv": _init(next(keys), (2 * d_model,)),
                "w_o": _init(next(keys), (d_model, d_model)),
                "b_o": _init(next(keys), (d_model,))}

    def ffn_params():
        return {"ffn_w1": _init(next(keys), (d_model, ffn_hidden)),
                "ffn_b1": _init(next(keys), (ffn_hidden,)),
                "ffn_w2": _init(next(keys), (ffn_hidden, d_model)),
                "ffn_b2": _init(next(keys), (d_model,))}

    def ln_params(prefix):
        return {prefix + "_g": jnp.ones((d_model,), jnp.float32),
                prefix + "_b": jnp.zeros((d_model,), jnp.float32)}

    enc_layers = []
    for _ in range(num_layers):
        lp = {"attn": attn_params()}
        lp.update(ln_params("ln1")); lp.update(ffn_params()); lp.update(ln_params("ln2"))
        enc_layers.append(lp)

    dec_layers = []
    for _ in range(num_layers):
        lp = {"self_attn": attn_params()}
        lp.update(ln_params("ln1"))
        lp["cross_attn"] = cross_attn_params()
        lp.update(ln_params("ln2")); lp.update(ffn_params()); lp.update(ln_params("ln3"))
        dec_layers.append(lp)

    return {"enc_emb": _init(next(keys), (v_eng, d_model)),
            "dec_emb": _init(next(keys), (v_cn, d_model)),
            "pos_enc": positional_encoding(d_model, max_len),
            "enc_layers": enc_layers,
            "dec_layers": dec_layers,
            "w_final": _init(next(keys), (d_model, v_cn)),
            "b_final": _init(next(keys), (v_cn,))}


def prepare_params(raw, num_heads):
    """One-time (outside jit) conversion to kernel layout: head-major bf16
    weights, (1, N) f32 biases/LN params, lane-padded vocab projection.
    Mirrors PyTorch's head split: qkv.reshape(..., H, 3*Dh).chunk(3)."""
    D = raw["pos_enc"].shape[-1]
    H = num_heads
    Dh = D // H
    to_hd = lambda w: jnp.transpose(w, (1, 0, 2)).astype(jnp.bfloat16)  # (D,H,Dh)->(H,D,Dh)

    def split_self(a):
        w = a["w_qkv"].reshape(D, H, 3 * Dh)
        b = a["b_qkv"].reshape(H, 3 * Dh)
        return {"w_q": to_hd(w[:, :, 0 * Dh:1 * Dh]),
                "w_k": to_hd(w[:, :, 1 * Dh:2 * Dh]),
                "w_v": to_hd(w[:, :, 2 * Dh:3 * Dh]),
                "b_q": b[:, 0 * Dh:1 * Dh][:, None, :],
                "b_k": b[:, 1 * Dh:2 * Dh][:, None, :],
                "b_v": b[:, 2 * Dh:3 * Dh][:, None, :],
                "w_o": a["w_o"].reshape(H, Dh, D).astype(jnp.bfloat16),
                "b_o": a["b_o"].reshape(1, D)}

    def split_cross(a):
        wq = a["w_q"].reshape(D, H, Dh)
        wkv = a["w_kv"].reshape(D, H, 2 * Dh)
        bq = a["b_q"].reshape(H, Dh)
        bkv = a["b_kv"].reshape(H, 2 * Dh)
        return {"w_q": to_hd(wq),
                "w_k": to_hd(wkv[:, :, :Dh]),
                "w_v": to_hd(wkv[:, :, Dh:]),
                "b_q": bq[:, None, :],
                "b_k": bkv[:, :Dh][:, None, :],
                "b_v": bkv[:, Dh:][:, None, :],
                "w_o": a["w_o"].reshape(H, Dh, D).astype(jnp.bfloat16),
                "b_o": a["b_o"].reshape(1, D)}

    def common(lp, n_ln):
        out = {"ffn_w1": lp["ffn_w1"].astype(jnp.bfloat16),
               "ffn_b1": lp["ffn_b1"].reshape(1, -1),
               "ffn_w2": lp["ffn_w2"].astype(jnp.bfloat16),
               "ffn_b2": lp["ffn_b2"].reshape(1, -1)}
        for i in range(1, n_ln + 1):
            out["ln%d_g" % i] = lp["ln%d_g" % i].reshape(1, D)
            out["ln%d_b" % i] = lp["ln%d_b" % i].reshape(1, D)
        return out

    enc_layers = []
    for lp in raw["enc_layers"]:
        d = {"attn": split_self(lp["attn"])}
        d.update(common(lp, 2))
        enc_layers.append(d)
    dec_layers = []
    for lp in raw["dec_layers"]:
        d = {"self_attn": split_self(lp["self_attn"]),
             "cross_attn": split_cross(lp["cross_attn"])}
        d.update(common(lp, 3))
        dec_layers.append(d)

    V = raw["w_final"].shape[1]
    n_pad = _round_up(V, 128)
    w_final = jnp.pad(raw["w_final"], ((0, 0), (0, n_pad - V))).astype(jnp.bfloat16)
    b_final = jnp.pad(raw["b_final"], (0, n_pad - V)).reshape(1, n_pad)

    return {"enc_emb": raw["enc_emb"], "dec_emb": raw["dec_emb"],
            "pos_enc": raw["pos_enc"],
            "enc_layers": enc_layers, "dec_layers": dec_layers,
            "w_final": w_final, "b_final": b_final}


# ----------------------------- main -----------------------------

if __name__ == "__main__":
    B = 2
    S = 8              # seq == max_sequence_length (PE broadcast requires it)
    D_MODEL = 32
    NUM_HEADS = 4
    FFN_HIDDEN = 64
    NUM_LAYERS = 2
    V_ENG = 11
    V_CN = 13

    key = jax.random.PRNGKey(0)
    k_params, k_x, k_y = jax.random.split(key, 3)

    raw_params = init_params(k_params, v_eng=V_ENG, v_cn=V_CN, d_model=D_MODEL,
                             ffn_hidden=FFN_HIDDEN, num_layers=NUM_LAYERS,
                             max_len=S)
    params = prepare_params(raw_params, NUM_HEADS)   # bf16 / head-major, once

    x_tokens = jax.random.randint(k_x, (B, S), 0, V_ENG, dtype=jnp.int32)
    y_tokens = jax.random.randint(k_y, (B, S), 0, V_CN, dtype=jnp.int32)

    fwd = jax.jit(lambda p, xt, yt: transformer_forward(p, xt, yt, NUM_HEADS, V_CN))
    out = fwd(params, x_tokens, y_tokens)
    out = jax.block_until_ready(out)

    assert out.shape == (B, S, V_CN), out.shape
    assert jnp.all(jnp.isfinite(out))
    print("KERNEL_OK")
</pallas_src>

<mosaic_0001>
module attributes {stable_mosaic.version = 11 : i64} {
  func.func @_linear_bias_kernel(%arg0: i32, %arg1: i32, %arg2: memref<8x32xf32, #tpu.memory_space<vmem>>, %arg3: memref<32x128xbf16, #tpu.memory_space<vmem>>, %arg4: memref<1x128xf32, #tpu.memory_space<vmem>>, %arg5: memref<8x128xf32, #tpu.memory_space<vmem>>) attributes {dimension_semantics = [#tpu.dimension_semantics<parallel>, #tpu.dimension_semantics<parallel>], iteration_bounds = array<i64: 2, 1>, scalar_prefetch = 0 : i64, scratch_operands = 0 : i64, tpu.core_type = #tpu.core_type<tc>, window_params = [{transform_indices = @transform_0, window_bounds = array<i64: 8, 32>}, {transform_indices = @transform_1, window_bounds = array<i64: 32, 128>}, {transform_indices = @transform_2, window_bounds = array<i64: 1, 128>}, {transform_indices = @transform_3, window_bounds = array<i64: 8, 128>}]} {
    %c0 = arith.constant 0 : index
    %c0_0 = arith.constant 0 : index
    %0 = vector.load %arg2[%c0, %c0_0] : memref<8x32xf32, #tpu.memory_space<vmem>>, vector<8x32xf32>
    %1 = arith.truncf %0 : vector<8x32xf32> to vector<8x32xbf16>
    %c0_1 = arith.constant 0 : index
    %c0_2 = arith.constant 0 : index
    %2 = vector.load %arg3[%c0_1, %c0_2] : memref<32x128xbf16, #tpu.memory_space<vmem>>, vector<32x128xbf16>
    %cst = arith.constant dense<0.000000e+00> : vector<8x128xf32>
    %3 = tpu.matmul %1, %2, %cst {dimension_numbers = #tpu.dot_dimension_numbers<[1], [0], [0], [1], [0, 0, 1, 1], [], []>} : vector<8x32xbf16>, vector<32x128xbf16>, vector<8x128xf32> -> vector<8x128xf32>
    %c0_3 = arith.constant 0 : index
    %c0_4 = arith.constant 0 : index
    %4 = vector.load %arg4[%c0_3, %c0_4] : memref<1x128xf32, #tpu.memory_space<vmem>>, vector<1x128xf32>
    %5 = vector.broadcast %4 : vector<1x128xf32> to vector<8x128xf32>
    %6 = arith.addf %3, %5 : vector<8x128xf32>
    %c0_5 = arith.constant 0 : index
    %c0_6 = arith.constant 0 : index
    %7 = vector.load %arg5[%c0_5, %c0_6] : memref<8x128xf32, #tpu.memory_space<vmem>>, vector<8x128xf32>
    tpu.vector_store %arg5[%c0_5, %c0_6], %6 {strides = array<i32>} : memref<8x128xf32, #tpu.memory_space<vmem>>, vector<8x128xf32>,
    return
  }
  func.func @transform_0(%arg0: i32, %arg1: i32) -> (i32, i32) {
    %c0_i32 = arith.constant 0 : i32
    %c0_i32_0 = arith.constant 0 : i32
    return %arg0, %c0_i32 : i32, i32
  }
  func.func @transform_1(%arg0: i32, %arg1: i32) -> (i32, i32) {
    %c0_i32 = arith.constant 0 : i32
    %c0_i32_0 = arith.constant 0 : i32
    return %c0_i32, %arg1 : i32, i32
  }
  func.func @transform_2(%arg0: i32, %arg1: i32) -> (i32, i32) {
    %c0_i32 = arith.constant 0 : i32
    %c0_i32_0 = arith.constant 0 : i32
    return %c0_i32, %arg1 : i32, i32
  }
  func.func @transform_3(%arg0: i32, %arg1: i32) -> (i32, i32) {
    %c0_i32 = arith.constant 0 : i32
    return %arg0, %arg1 : i32, i32
  }
}

module attributes {stable_mosaic.version = 11 : i64} {
  func.func @_encoder_layer_kernel(%arg0: i32, %arg1: memref<8x32xf32, #tpu.memory_space<vmem>>, %arg2: memref<4x32x8xbf16, #tpu.memory_space<vmem>>, %arg3: memref<4x1x8xf32, #tpu.memory_space<vmem>>, %arg4: memref<4x32x8xbf16, #tpu.memory_space<vmem>>, %arg5: memref<4x1x8xf32, #tpu.memory_space<vmem>>, %arg6: memref<4x32x8xbf16, #tpu.memory_space<vmem>>, %arg7: memref<4x1x8xf32, #tpu.memory_space<vmem>>, %arg8: memref<4x8x32xbf16, #tpu.memory_space<vmem>>, %arg9: memref<1x32xf32, #tpu.memory_space<vmem>>, %arg10: memref<1x32xf32, #tpu.memory_space<vmem>>, %arg11: memref<1x32xf32, #tpu.memory_space<vmem>>, %arg12: memref<32x64xbf16, #tpu.memory_space<vmem>>, %arg13: memref<1x64xf32, #tpu.memory_space<vmem>>, %arg14: memref<64x32xbf16, #tpu.memory_space<vmem>>, %arg15: memref<1x32xf32, #tpu.memory_space<vmem>>, %arg16: memref<1x32xf32, #tpu.memory_space<vmem>>, %arg17: memref<1x32xf32, #tpu.memory_space<vmem>>, %arg18: memref<8x32xf32, #tpu.memory_space<vmem>>) attributes {dimension_semantics = [#tpu.dimension_semantics<parallel>], iteration_bounds = array<i64: 2>, scalar_prefetch = 0 : i64, scratch_operands = 0 : i64, tpu.core_type = #tpu.core_type<tc>, window_params = [{transform_indices = @transform_0, window_bounds = array<i64: 8, 32>}, {pipeline_mode = #tpu.pipeline_mode<synchronous>, transform_indices = @transform_1, window_bounds = array<i64: 4, 32, 8>}, {pipeline_mode = #tpu.pipeline_mode<synchronous>, transform_indices = @transform_2, window_bounds = array<i64: 4, 1, 8>}, {pipeline_mode = #tpu.pipeline_mode<synchronous>, transform_indices = @transform_3, window_bounds = array<i64: 4, 32, 8>}, {pipeline_mode = #tpu.pipeline_mode<synchronous>, transform_indices = @transform_4, window_bounds = array<i64: 4, 1, 8>}, {pipeline_mode = #tpu.pipeline_mode<synchronous>, transform_indices = @transform_5, window_bounds = array<i64: 4, 32, 8>}, {pipeline_mode = #tpu.pipeline_mode<synchronous>, transform_indices = @transform_6, window_bounds = array<i64: 4, 1, 8>}, {pipeline_mode = #tpu.pipeline_mode<synchronous>, transform_indices = @transform_7, window_bounds = array<i64: 4, 8, 32>}, {pipeline_mode = #tpu.pipeline_mode<synchronous>, transform_indices = @transform_8, window_bounds = array<i64: 1, 32>}, {pipeline_mode = #tpu.pipeline_mode<synchronous>, transform_indices = @transform_9, window_bounds = array<i64: 1, 32>}, {pipeline_mode = #tpu.pipeline_mode<synchronous>, transform_indices = @transform_10, window_bounds = array<i64: 1, 32>}, {pipeline_mode = #tpu.pipeline_mode<synchronous>, transform_indices = @transform_11, window_bounds = array<i64: 32, 64>}, {pipeline_mode = #tpu.pipeline_mode<synchronous>, transform_indices = @transform_12, window_bounds = array<i64: 1, 64>}, {pipeline_mode = #tpu.pipeline_mode<synchronous>, transform_indices = @transform_13, window_bounds = array<i64: 64, 32>}, {pipeline_mode = #tpu.pipeline_mode<synchronous>, transform_indices = @transform_14, window_bounds = array<i64: 1, 32>}, {pipeline_mode = #tpu.pipeline_mode<synchronous>, transform_indices = @transform_15, window_bounds = array<i64: 1, 32>}, {pipeline_mode = #tpu.pipeline_mode<synchronous>, transform_indices = @transform_16, window_bounds = array<i64: 1, 32>}, {transform_indices = @transform_17, window_bounds = array<i64: 8, 32>}]} {
    %c0 = arith.constant 0 : index
    %c0_0 = arith.constant 0 : index
    %0 = vector.load %arg1[%c0, %c0_0] : memref<8x32xf32, #tpu.memory_space<vmem>>, vector<8x32xf32>
    %1 = arith.truncf %0 : vector<8x32xf32> to vector<8x32xbf16>
    %2 = arith.truncf %0 : vector<8x32xf32> to vector<8x32xbf16>
    %c0_1 = arith.constant 0 : index
    %c0_2 = arith.constant 0 : index
    %c0_3 = arith.constant 0 : index
    %3 = vector.load %arg2[%c0_1, %c0_2, %c0_3] : memref<4x32x8xbf16, #tpu.memory_space<vmem>>, vector<1x32x8xbf16>
    %4 = vector.shape_cast %3 : vector<1x32x8xbf16> to vector<32x8xbf16>
    %cst = arith.constant dense<0.000000e+00> : vector<8x8xf32>
    %5 = tpu.matmul %1, %4, %cst {dimension_numbers = #tpu.dot_dimension_numbers<[1], [0], [0], [1], [0, 0, 1, 1], [], []>} : vector<8x32xbf16>, vector<32x8xbf16>, vector<8x8xf32> -> vector<8x8xf32>
    %c0_4 = arith.constant 0 : index
    %c0_5 = arith.constant 0 : index
    %c0_6 = arith.constant 0 : index
    %6 = vector.load %arg3[%c0_4, %c0_5, %c0_6] : memref<4x1x8xf32, #tpu.memory_space<vmem>>, vector<1x1x8xf32>
    %7 = vector.shape_cast %6 : vector<1x1x8xf32> to vector<1x8xf32>
    %8 = vector.broadcast %7 : vector<1x8xf32> to vector<8x8xf32>
    %9 = arith.addf %5, %8 : vector<8x8xf32>
    %c0_7 = arith.constant 0 : index
    %c0_8 = arith.constant 0 : index
    %c0_9 = arith.constant 0 : index
    %10 = vector.load %arg4[%c0_7, %c0_8, %c0_9] : memref<4x32x8xbf16, #tpu.memory_space<vmem>>, vector<1x32x8xbf16>
    %11 = vector.shape_cast %10 : vector<1x32x8xbf16> to vector<32x8xbf16>
    %cst_10 = arith.constant dense<0.000000e+00> : vector<8x8xf32>
    %12 = tpu.matmul %2, %11, %cst_10 {dimension_numbers = #tpu.dot_dimension_numbers<[1], [0], [0], [1], [0, 0, 1, 1], [], []>} : vector<8x32xbf16>, vector<32x8xbf16>, vector<8x8xf32> -> vector<8x8xf32>
    %c0_11 = arith.constant 0 : index
    %c0_12 = arith.constant 0 : index
    %c0_13 = arith.constant 0 : index
    %13 = vector.load %arg5[%c0_11, %c0_12, %c0_13] : memref<4x1x8xf32, #tpu.memory_space<vmem>>, vector<1x1x8xf32>
    %14 = vector.shape_cast %13 : vector<1x1x8xf32> to vector<1x8xf32>
    %15 = vector.broadcast %14 : vector<1x8xf32> to vector<8x8xf32>
    %16 = arith.addf %12, %15 : vector<8x8xf32>
    %c0_14 = arith.constant 0 : index
    %c0_15 = arith.constant 0 : index
    %c0_16 = arith.constant 0 : index
    %17 = vector.load %arg6[%c0_14, %c0_15, %c0_16] : memref<4x32x8xbf16, #tpu.memory_space<vmem>>, vector<1x32x8xbf16>
    %18 = vector.shape_cast %17 : vector<1x32x8xbf16> to vector<32x8xbf16>
    %cst_17 = arith.constant dense<0.000000e+00> : vector<8x8xf32>
    %19 = tpu.matmul %2, %18, %cst_17 {dimension_numbers = #tpu.dot_dimension_numbers<[1], [0], [0], [1], [0, 0, 1, 1], [], []>} : vector<8x32xbf16>, vector<32x8xbf16>, vector<8x8xf32> -> vector<8x8xf32>
    %c0_18 = arith.constant 0 : index
    %c0_19 = arith.constant 0 : index
    %c0_20 = arith.constant 0 : index
    %20 = vector.load %arg7[%c0_18, %c0_19, %c0_20] : memref<4x1x8xf32, #tpu.memory_space<vmem>>, vector<1x1x8xf32>
    %21 = vector.shape_cast %20 : vector<1x1x8xf32> to vector<1x8xf32>
    %22 = vector.broadcast %21 : vector<1x8xf32> to vector<8x8xf32>
    %23 = arith.addf %19, %22 : vector<8x8xf32>
    %24 = arith.truncf %9 : vector<8x8xf32> to vector<8x8xbf16>
    %25 = arith.truncf %16 : vector<8x8xf32> to vector<8x8xbf16>
    %cst_21 = arith.constant dense<0.000000e+00> : vector<8x8xf32>
    %26 = tpu.matmul %24, %25, %cst_21 {dimension_numbers = #tpu.dot_dimension_numbers<[1], [1], [0], [0], [0, 0, 1, 0], [], []>} : vector<8x8xbf16>, vector<8x8xbf16>, vector<8x8xf32> -> vector<8x8xf32>
    %cst_22 = arith.constant 0.353553385 : f32
    %27 = vector.broadcast %cst_22 : f32 to vector<8x8xf32>
    %28 = arith.mulf %26, %27 : vector<8x8xf32>
    %cst_23 = arith.constant dense<0xFF800000> : vector<8xf32>
    %29 = vector.multi_reduction <maximumf>, %28, %cst_23 [1] : vector<8x8xf32> to vector<8xf32>
    %30 = vector.shape_cast %29 : vector<8xf32> to vector<8x1xf32>
    %31 = vector.broadcast %30 : vector<8x1xf32> to vector<8x8xf32>
    %32 = arith.subf %28, %31 : vector<8x8xf32>
    %33 = math.exp %32 : vector<8x8xf32>
    %cst_24 = arith.constant dense<0.000000e+00> : vector<8xf32>
    %34 = vector.multi_reduction <add>, %33, %cst_24 [1] : vector<8x8xf32> to vector<8xf32>
    %35 = vector.shape_cast %34 : vector<8xf32> to vector<8x1xf32>
    %36 = arith.truncf %33 : vector<8x8xf32> to vector<8x8xbf16>
    %37 = arith.truncf %23 : vector<8x8xf32> to vector<8x8xbf16>
    %cst_25 = arith.constant dense<0.000000e+00> : vector<8x8xf32>
    %38 = tpu.matmul %36, %37, %cst_25 {dimension_numbers = #tpu.dot_dimension_numbers<[1], [0], [0], [1], [0, 0, 1, 1], [], []>} : vector<8x8xbf16>, vector<8x8xbf16>, vector<8x8xf32> -> vector<8x8xf32>
    %39 = tpu.reciprocal %35 {approx = true} : vector<8x1xf32> -> vector<8x1xf32>
    %40 = vector.broadcast %39 : vector<8x1xf32> to vector<8x8xf32>
    %41 = arith.mulf %38, %40 : vector<8x8xf32>
    %42 = arith.truncf %41 : vector<8x8xf32> to vector<8x8xbf16>
    %c0_26 = arith.constant 0 : index
    %c0_27 = arith.constant 0 : index
    %c0_28 = arith.constant 0 : index
    %43 = vector.load %arg8[%c0_26, %c0_27, %c0_28] : memref<4x8x32xbf16, #tpu.memory_space<vmem>>, vector<1x8x32xbf16>
    %44 = vector.shape_cast %43 : vector<1x8x32xbf16> to vector<8x32xbf16>
    %cst_29 = arith.constant dense<0.000000e+00> : vector<8x32xf32>
    %45 = tpu.matmul %42, %44, %cst_29 {dimension_numbers = #tpu.dot_dimension_numbers<[1], [0], [0], [1], [0, 0, 1, 1], [], []>} : vector<8x8xbf16>, vector<8x32xbf16>, vector<8x32xf32> -> vector<8x32xf32>
    %c1 = arith.constant 1 : index
    %c0_30 = arith.constant 0 : index
    %c0_31 = arith.constant 0 : index
    %46 = vector.load %arg2[%c1, %c0_30, %c0_31] : memref<4x32x8xbf16, #tpu.memory_space<vmem>>, vector<1x32x8xbf16>
    %47 = vector.shape_cast %46 : vector<1x32x8xbf16> to vector<32x8xbf16>
    %cst_32 = arith.constant dense<0.000000e+00> : vector<8x8xf32>
    %48 = tpu.matmul %1, %47, %cst_32 {dimension_numbers = #tpu.dot_dimension_numbers<[1], [0], [0], [1], [0, 0, 1, 1], [], []>} : vector<8x32xbf16>, vector<32x8xbf16>, vector<8x8xf32> -> vector<8x8xf32>
    %c1_33 = arith.constant 1 : index
    %c0_34 = arith.constant 0 : index
    %c0_35 = arith.constant 0 : index
    %49 = vector.load %arg3[%c1_33, %c0_34, %c0_35] : memref<4x1x8xf32, #tpu.memory_space<vmem>>, vector<1x1x8xf32>
    %50 = vector.shape_cast %49 : vector<1x1x8xf32> to vector<1x8xf32>
    %51 = vector.broadcast %50 : vector<1x8xf32> to vector<8x8xf32>
    %52 = arith.addf %48, %51 : vector<8x8xf32>
    %c1_36 = arith.constant 1 : index
    %c0_37 = arith.constant 0 : index
    %c0_38 = arith.constant 0 : index
    %53 = vector.load %arg4[%c1_36, %c0_37, %c0_38] : memref<4x32x8xbf16, #tpu.memory_space<vmem>>, vector<1x32x8xbf16>
    %54 = vector.shape_cast %53 : vector<1x32x8xbf16> to vector<32x8xbf16>
    %cst_39 = arith.constant dense<0.000000e+00> : vector<8x8xf32>
    %55 = tpu.matmul %2, %54, %cst_39 {dimension_numbers = #tpu.dot_dimension_numbers<[1], [0], [0], [1], [0, 0, 1, 1], [], []>} : vector<8x32xbf16>, vector<32x8xbf16>, vector<8x8xf32> -> vector<8x8xf32>
    %c1_40 = arith.constant 1 : index
    %c0_41 = arith.constant 0 : index
    %c0_42 = arith.constant 0 : index
    %56 = vector.load %arg5[%c1_40, %c0_41, %c0_42] : memref<4x1x8xf32, #tpu.memory_space<vmem>>, vector<1x1x8xf32>
    %57 = vector.shape_cast %56 : vector<1x1x8xf32> to vector<1x8xf32>
    %58 = vector.broadcast %57 : vector<1x8xf32> to vector<8x8xf32>
    %59 = arith.addf %55, %58 : vector<8x8xf32>
    %c1_43 = arith.constant 1 : index
    %c0_44 = arith.constant 0 : index
    %c0_45 = arith.constant 0 : index
    %60 = vector.load %arg6[%c1_43, %c0_44, %c0_45] : memref<4x32x8xbf16, #tpu.memory_space<vmem>>, vector<1x32x8xbf16>
    %61 = vector.shape_cast %60 : vector<1x32x8xbf16> to vector<32x8xbf16>
    %cst_46 = arith.constant dense<0.000000e+00> : vector<8x8xf32>
    %62 = tpu.matmul %2, %61, %cst_46 {dimension_numbers = #tpu.dot_dimension_numbers<[1], [0], [0], [1], [0, 0, 1, 1], [], []>} : vector<8x32xbf16>, vector<32x8xbf16>, vector<8x8xf32> -> vector<8x8xf32>
    %c1_47 = arith.constant 1 : index
    %c0_48 = arith.constant 0 : index
    %c0_49 = arith.constant 0 : index
    %63 = vector.load %arg7[%c1_47, %c0_48, %c0_49] : memref<4x1x8xf32, #tpu.memory_space<vmem>>, vector<1x1x8xf32>
    %64 = vector.shape_cast %63 : vector<1x1x8xf32> to vector<1x8xf32>
    %65 = vector.broadcast %64 : vector<1x8xf32> to vector<8x8xf32>
    %66 = arith.addf %62, %65 : vector<8x8xf32>
    %67 = arith.truncf %52 : vector<8x8xf32> to vector<8x8xbf16>
    %68 = arith.truncf %59 : vector<8x8xf32> to vector<8x8xbf16>
    %cst_50 = arith.constant dense<0.000000e+00> : vector<8x8xf32>
    %69 = tpu.matmul %67, %68, %cst_50 {dimension_numbers = #tpu.dot_dimension_numbers<[1], [1], [0], [0], [0, 0, 1, 0], [], []>} : vector<8x8xbf16>, vector<8x8xbf16>, vector<8x8xf32> -> vector<8x8xf32>
    %cst_51 = arith.constant 0.353553385 : f32
    %70 = vector.broadcast %cst_51 : f32 to vector<8x8xf32>
    %71 = arith.mulf %69, %70 : vector<8x8xf32>
    %cst_52 = arith.constant dense<0xFF800000> : vector<8xf32>
    %72 = vector.multi_reduction <maximumf>, %71, %cst_52 [1] : vector<8x8xf32> to vector<8xf32>
    %73 = vector.shape_cast %72 : vector<8xf32> to vector<8x1xf32>
    %74 = vector.broadcast %73 : vector<8x1xf32> to vector<8x8xf32>
    %75 = arith.subf %71, %74 : vector<8x8xf32>
    %76 = math.exp %75 : vector<8x8xf32>
    %cst_53 = arith.constant dense<0.000000e+00> : vector<8xf32>
    %77 = vector.multi_reduction <add>, %76, %cst_53 [1] : vector<8x8xf32> to vector<8xf32>
    %78 = vector.shape_cast %77 : vector<8xf32> to vector<8x1xf32>
    %79 = arith.truncf %76 : vector<8x8xf32> to vector<8x8xbf16>
    %80 = arith.truncf %66 : vector<8x8xf32> to vector<8x8xbf16>
    %cst_54 = arith.constant dense<0.000000e+00> : vector<8x8xf32>
    %81 = tpu.matmul %79, %80, %cst_54 {dimension_numbers = #tpu.dot_dimension_numbers<[1], [0], [0], [1], [0, 0, 1, 1], [], []>} : vector<8x8xbf16>, vector<8x8xbf16>, vector<8x8xf32> -> vector<8x8xf32>
    %82 = tpu.reciprocal %78 {approx = true} : vector<8x1xf32> -> vector<8x1xf32>
    %83 = vector.broadcast %82 : vector<8x1xf32> to vector<8x8xf32>
    %84 = arith.mulf %81, %83 : vector<8x8xf32>
    %85 = arith.truncf %84 : vector<8x8xf32> to vector<8x8xbf16>
    %c1_55 = arith.constant 1 : index
    %c0_56 = arith.constant 0 : index
    %c0_57 = arith.constant 0 : index
    %86 = vector.load %arg8[%c1_55, %c0_56, %c0_57] : memref<4x8x32xbf16, #tpu.memory_space<vmem>>, vector<1x8x32xbf16>
    %87 = vector.shape_cast %86 : vector<1x8x32xbf16> to vector<8x32xbf16>
    %cst_58 = arith.constant dense<0.000000e+00> : vector<8x32xf32>
    %88 = tpu.matmul %85, %87, %cst_58 {dimension_numbers = #tpu.dot_dimension_numbers<[1], [0], [0], [1], [0, 0, 1, 1], [], []>} : vector<8x8xbf16>, vector<8x32xbf16>, vector<8x32xf32> -> vector<8x32xf32>
    %89 = arith.addf %45, %88 : vector<8x32xf32>
    %c2 = arith.constant 2 : index
    %c0_59 = arith.constant 0 : index
    %c0_60 = arith.constant 0 : index
    %90 = vector.load %arg2[%c2, %c0_59, %c0_60] : memref<4x32x8xbf16, #tpu.memory_space<vmem>>, vector<1x32x8xbf16>
    %91 = vector.shape_cast %90 : vector<1x32x8xbf16> to vector<32x8xbf16>
    %cst_61 = arith.constant dense<0.000000e+00> : vector<8x8xf32>
    %92 = tpu.matmul %1, %91, %cst_61 {dimension_numbers = #tpu.dot_dimension_numbers<[1], [0], [0], [1], [0, 0, 1, 1], [], []>} : vector<8x32xbf16>, vector<32x8xbf16>, vector<8x8xf32> -> vector<8x8xf32>
    %c2_62 = arith.constant 2 : index
    %c0_63 = arith.constant 0 : index
    %c0_64 = arith.constant 0 : index
    %93 = vector.load %arg3[%c2_62, %c0_63, %c0_64] : memref<4x1x8xf32, #tpu.memory_space<vmem>>, vector<1x1x8xf32>
    %94 = vector.shape_cast %93 : vector<1x1x8xf32> to vector<1x8xf32>
    %95 = vector.broadcast %94 : vector<1x8xf32> to vector<8x8xf32>
    %96 = arith.addf %92, %95 : vector<8x8xf32>
    %c2_65 = arith.constant 2 : index
    %c0_66 = arith.constant 0 : index
    %c0_67 = arith.constant 0 : index
    %97 = vector.load %arg4[%c2_65, %c0_66, %c0_67] : memref<4x32x8xbf16, #tpu.memory_space<vmem>>, vector<1x32x8xbf16>
    %98 = vector.shape_cast %97 : vector<1x32x8xbf16> to vector<32x8xbf16>
    %cst_68 = arith.constant dense<0.000000e+00> : vector<8x8xf32>
    %99 = tpu.matmul %2, %98, %cst_68 {dimension_numbers = #tpu.dot_dimension_numbers<[1], [0], [0], [1], [0, 0, 1, 1], [], []>} : vector<8x32xbf16>, vector<32x8xbf16>, vector<8x8xf32> -> vector<8x8xf32>
    %c2_69 = arith.constant 2 : index
    %c0_70 = arith.constant 0 : index
    %c0_71 = arith.constant 0 : index
    %100 = vector.load %arg5[%c2_69, %c0_70, %c0_71] : memref<4x1x8xf32, #tpu.memory_space<vmem>>, vector<1x1x8xf32>
    %101 = vector.shape_cast %100 : vector<1x1x8xf32> to vector<1x8xf32>
    %102 = vector.broadcast %101 : vector<1x8xf32> to vector<8x8xf32>
    %103 = arith.addf %99, %102 : vector<8x8xf32>
    %c2_72 = arith.constant 2 : index
    %c0_73 = arith.constant 0 : index
    %c0_74 = arith.constant 0 : index
    %104 = vector.load %arg6[%c2_72, %c0_73, %c0_74] : memref<4x32x8xbf16, #tpu.memory_space<vmem>>, vector<1x32x8xbf16>
    %105 = vector.shape_cast %104 : vector<1x32x8xbf16> to vector<32x8xbf16>
    %cst_75 = arith.constant dense<0.000000e+00> : vector<8x8xf32>
    %106 = tpu.matmul %2, %105, %cst_75 {dimension_numbers = #tpu.dot_dimension_numbers<[1], [0], [0], [1], [0, 0, 1, 1], [], []>} : vector<8x32xbf16>, vector<32x8xbf16>, vector<8x8xf32> -> vector<8x8xf32>
    %c2_76 = arith.constant 2 : index
    %c0_77 = arith.constant 0 : index
    %c0_78 = arith.constant 0 : index
    %107 = vector.load %arg7[%c2_76, %c0_77, %c0_78] : memref<4x1x8xf32, #tpu.memory_space<vmem>>, vector<1x1x8xf32>
    %108 = vector.shape_cast %107 : vector<1x1x8xf32> to vector<1x8xf32>
    %109 = vector.broadcast %108 : vector<1x8xf32> to vector<8x8xf32>
    %110 = arith.addf %106, %109 : vector<8x8xf32>
    %111 = arith.truncf %96 : vector<8x8xf32> to vector<8x8xbf16>
    %112 = arith.truncf %103 : vector<8x8xf32> to vector<8x8xbf16>
    %cst_79 = arith.constant dense<0.000000e+00> : vector<8x8xf32>
    %113 = tpu.matmul %111, %112, %cst_79 {dimension_numbers = #tpu.dot_dimension_numbers<[1], [1], [0], [0], [0, 0, 1, 0], [], []>} : vector<8x8xbf16>, vector<8x8xbf16>, vector<8x8xf32> -> vector<8x8xf32>
    %cst_80 = arith.constant 0.353553385 : f32
    %114 = vector.broadcast %cst_80 : f32 to vector<8x8xf32>
    %115 = arith.mulf %113, %114 : vector<8x8xf32>
    %cst_81 = arith.constant dense<0xFF800000> : vector<8xf32>
    %116 = vector.multi_reduction <maximumf>, %115, %cst_81 [1] : vector<8x8xf32> to vector<8xf32>
    %117 = vector.shape_cast %116 : vector<8xf32> to vector<8x1xf32>
    %118 = vector.broadcast %117 : vector<8x1xf32> to vector<8x8xf32>
    %119 = arith.subf %115, %118 : vector<8x8xf32>
    %120 = math.exp %119 : vector<8x8xf32>
    %cst_82 = arith.constant dense<0.000000e+00> : vector<8xf32>
    %121 = vector.multi_reduction <add>, %120, %cst_82 [1] : vector<8x8xf32> to vector<8xf32>
    %122 = vector.shape_cast %121 : vector<8xf32> to vector<8x1xf32>
    %123 = arith.truncf %120 : vector<8x8xf32> to vector<8x8xbf16>
    %124 = arith.truncf %110 : vector<8x8xf32> to vector<8x8xbf16>
    %cst_83 = arith.constant dense<0.000000e+00> : vector<8x8xf32>
    %125 = tpu.matmul %123, %124, %cst_83 {dimension_numbers = #tpu.dot_dimension_numbers<[1], [0], [0], [1], [0, 0, 1, 1], [], []>} : vector<8x8xbf16>, vector<8x8xbf16>, vector<8x8xf32> -> vector<8x8xf32>
    %126 = tpu.reciprocal %122 {approx = true} : vector<8x1xf32> -> vector<8x1xf32>
    %127 = vector.broadcast %126 : vector<8x1xf32> to vector<8x8xf32>
    %128 = arith.mulf %125, %127 : vector<8x8xf32>
    %129 = arith.truncf %128 : vector<8x8xf32> to vector<8x8xbf16>
    %c2_84 = arith.constant 2 : index
    %c0_85 = arith.constant 0 : index
    %c0_86 = arith.constant 0 : index
    %130 = vector.load %arg8[%c2_84, %c0_85, %c0_86] : memref<4x8x32xbf16, #tpu.memory_space<vmem>>, vector<1x8x32xbf16>
    %131 = vector.shape_cast %130 : vector<1x8x32xbf16> to vector<8x32xbf16>
    %cst_87 = arith.constant dense<0.000000e+00> : vector<8x32xf32>
    %132 = tpu.matmul %129, %131, %cst_87 {dimension_numbers = #tpu.dot_dimension_numbers<[1], [0], [0], [1], [0, 0, 1, 1], [], []>} : vector<8x8xbf16>, vector<8x32xbf16>, vector<8x32xf32> -> vector<8x32xf32>
    %133 = arith.addf %89, %132 : vector<8x32xf32>
    %c3 = arith.constant 3 : index
    %c0_88 = arith.constant 0 : index
    %c0_89 = arith.constant 0 : index
    %134 = vector.load %arg2[%c3, %c0_88, %c0_89] : memref<4x32x8xbf16, #tpu.memory_space<vmem>>, vector<1x32x8xbf16>
    %135 = vector.shape_cast %134 : vector<1x32x8xbf16> to vector<32x8xbf16>
    %cst_90 = arith.constant dense<0.000000e+00> : vector<8x8xf32>
    %136 = tpu.matmul %1, %135, %cst_90 {dimension_numbers = #tpu.dot_dimension_numbers<[1], [0], [0], [1], [0, 0, 1, 1], [], []>} : vector<8x32xbf16>, vector<32x8xbf16>, vector<8x8xf32> -> vector<8x8xf32>
    %c3_91 = arith.constant 3 : index
    %c0_92 = arith.constant 0 : index
    %c0_93 = arith.constant 0 : index
    %137 = vector.load %arg3[%c3_91, %c0_92, %c0_93] : memref<4x1x8xf32, #tpu.memory_space<vmem>>, vector<1x1x8xf32>
    %138 = vector.shape_cast %137 : vector<1x1x8xf32> to vector<1x8xf32>
    %139 = vector.broadcast %138 : vector<1x8xf32> to vector<8x8xf32>
    %140 = arith.addf %136, %139 : vector<8x8xf32>
    %c3_94 = arith.constant 3 : index
    %c0_95 = arith.constant 0 : index
    %c0_96 = arith.constant 0 : index
    %141 = vector.load %arg4[%c3_94, %c0_95, %c0_96] : memref<4x32x8xbf16, #tpu.memory_space<vmem>>, vector<1x32x8xbf16>
    %142 = vector.shape_cast %141 : vector<1x32x8xbf16> to vector<32x8xbf16>
    %cst_97 = arith.constant dense<0.000000e+00> : vector<8x8xf32>
    %143 = tpu.matmul %2, %142, %cst_97 {dimension_numbers = #tpu.dot_dimension_numbers<[1], [0], [0], [1], [0, 0, 1, 1], [], []>} : vector<8x32xbf16>, vector<32x8xbf16>, vector<8x8xf32> -> vector<8x8xf32>
    %c3_98 = arith.constant 3 : index
    %c0_99 = arith.constant 0 : index
    %c0_100 = arith.constant 0 : index
    %144 = vector.load %arg5[%c3_98, %c0_99, %c0_100] : memref<4x1x8xf32, #tpu.memory_space<vmem>>, vector<1x1x8xf32>
    %145 = vector.shape_cast %144 : vector<1x1x8xf32> to vector<1x8xf32>
    %146 = vector.broadcast %145 : vector<1x8xf32> to vector<8x8xf32>
    %147 = arith.addf %143, %146 : vector<8x8xf32>
    %c3_101 = arith.constant 3 : index
    %c0_102 = arith.constant 0 : index
    %c0_103 = arith.constant 0 : index
    %148 = vector.load %arg6[%c3_101, %c0_102, %c0_103] : memref<4x32x8xbf16, #tpu.memory_space<vmem>>, vector<1x32x8xbf16>
    %149 = vector.shape_cast %148 : vector<1x32x8xbf16> to vector<32x8xbf16>
    %cst_104 = arith.constant dense<0.000000e+00> : vector<8x8xf32>
    %150 = tpu.matmul %2, %149, %cst_104 {dimension_numbers = #tpu.dot_dimension_numbers<[1], [0], [0], [1], [0, 0, 1, 1], [], []>} : vector<8x32xbf16>, vector<32x8xbf16>, vector<8x8xf32> -> vector<8x8xf32>
    %c3_105 = arith.constant 3 : index
    %c0_106 = arith.constant 0 : index
    %c0_107 = arith.constant 0 : index
    %151 = vector.load %arg7[%c3_105, %c0_106, %c0_107] : memref<4x1x8xf32, #tpu.memory_space<vmem>>, vector<1x1x8xf32>
    %152 = vector.shape_cast %151 : vector<1x1x8xf32> to vector<1x8xf32>
    %153 = vector.broadcast %152 : vector<1x8xf32> to vector<8x8xf32>
    %154 = arith.addf %150, %153 : vector<8x8xf32>
    %155 = arith.truncf %140 : vector<8x8xf32> to vector<8x8xbf16>
    %156 = arith.truncf %147 : vector<8x8xf32> to vector<8x8xbf16>
    %cst_108 = arith.constant dense<0.000000e+00> : vector<8x8xf32>
    %157 = tpu.matmul %155, %156, %cst_108 {dimension_numbers = #tpu.dot_dimension_numbers<[1], [1], [0], [0], [0, 0, 1, 0], [], []>} : vector<8x8xbf16>, vector<8x8xbf16>, vector<8x8xf32> -> vector<8x8xf32>
    %cst_109 = arith.constant 0.353553385 : f32
    %158 = vector.broadcast %cst_109 : f32 to vector<8x8xf32>
    %159 = arith.mulf %157, %158 : vector<8x8xf32>
    %cst_110 = arith.constant dense<0xFF800000> : vector<8xf32>
    %160 = vector.multi_reduction <maximumf>, %159, %cst_110 [1] : vector<8x8xf32> to vector<8xf32>
    %161 = vector.shape_cast %160 : vector<8xf32> to vector<8x1xf32>
    %162 = vector.broadcast %161 : vector<8x1xf32> to vector<8x8xf32>
    %163 = arith.subf %159, %162 : vector<8x8xf32>
    %164 = math.exp %163 : vector<8x8xf32>
    %cst_111 = arith.constant dense<0.000000e+00> : vector<8xf32>
    %165 = vector.multi_reduction <add>, %164, %cst_111 [1] : vector<8x8xf32> to vector<8xf32>
    %166 = vector.shape_cast %165 : vector<8xf32> to vector<8x1xf32>
    %167 = arith.truncf %164 : vector<8x8xf32> to vector<8x8xbf16>
    %168 = arith.truncf %154 : vector<8x8xf32> to vector<8x8xbf16>
    %cst_112 = arith.constant dense<0.000000e+00> : vector<8x8xf32>
    %169 = tpu.matmul %167, %168, %cst_112 {dimension_numbers = #tpu.dot_dimension_numbers<[1], [0], [0], [1], [0, 0, 1, 1], [], []>} : vector<8x8xbf16>, vector<8x8xbf16>, vector<8x8xf32> -> vector<8x8xf32>
    %170 = tpu.reciprocal %166 {approx = true} : vector<8x1xf32> -> vector<8x1xf32>
    %171 = vector.broadcast %170 : vector<8x1xf32> to vector<8x8xf32>
    %172 = arith.mulf %169, %171 : vector<8x8xf32>
    %173 = arith.truncf %172 : vector<8x8xf32> to vector<8x8xbf16>
    %c3_113 = arith.constant 3 : index
    %c0_114 = arith.constant 0 : index
    %c0_115 = arith.constant 0 : index
    %174 = vector.load %arg8[%c3_113, %c0_114, %c0_115] : memref<4x8x32xbf16, #tpu.memory_space<vmem>>, vector<1x8x32xbf16>
    %175 = vector.shape_cast %174 : vector<1x8x32xbf16> to vector<8x32xbf16>
    %cst_116 = arith.constant dense<0.000000e+00> : vector<8x32xf32>
    %176 = tpu.matmul %173, %175, %cst_116 {dimension_numbers = #tpu.dot_dimension_numbers<[1], [0], [0], [1], [0, 0, 1, 1], [], []>} : vector<8x8xbf16>, vector<8x32xbf16>, vector<8x32xf32> -> vector<8x32xf32>
    %177 = arith.addf %133, %176 : vector<8x32xf32>
    %c0_117 = arith.constant 0 : index
    %c0_118 = arith.constant 0 : index
    %178 = vector.load %arg9[%c0_117, %c0_118] : memref<1x32xf32, #tpu.memory_space<vmem>>, vector<1x32xf32>
    %179 = vector.broadcast %178 : vector<1x32xf32> to vector<8x32xf32>
    %180 = arith.addf %177, %179 : vector<8x32xf32>
    %181 = arith.addf %180, %0 : vector<8x32xf32>
    %c0_119 = arith.constant 0 : index
    %c0_120 = arith.constant 0 : index
    %182 = vector.load %arg10[%c0_119, %c0_120] : memref<1x32xf32, #tpu.memory_space<vmem>>, vector<1x32xf32>
    %c0_121 = arith.constant 0 : index
    %c0_122 = arith.constant 0 : index
    %183 = vector.load %arg11[%c0_121, %c0_122] : memref<1x32xf32, #tpu.memory_space<vmem>>, vector<1x32xf32>
    %cst_123 = arith.constant dense<0.000000e+00> : vector<8xf32>
    %184 = vector.multi_reduction <add>, %181, %cst_123 [1] : vector<8x32xf32> to vector<8xf32>
    %185 = vector.shape_cast %184 : vector<8xf32> to vector<8x1xf32>
    %cst_124 = arith.constant 3.200000e+01 : f32
    %186 = vector.broadcast %cst_124 : f32 to vector<8x1xf32>
    %187 = arith.divf %185, %186 : vector<8x1xf32>
    %188 = vector.broadcast %187 : vector<8x1xf32> to vector<8x32xf32>
    %189 = arith.subf %181, %188 : vector<8x32xf32>
    %190 = arith.mulf %189, %189 : vector<8x32xf32>
    %cst_125 = arith.constant dense<0.000000e+00> : vector<8xf32>
    %191 = vector.multi_reduction <add>, %190, %cst_125 [1] : vector<8x32xf32> to vector<8xf32>
    %192 = vector.shape_cast %191 : vector<8xf32> to vector<8x1xf32>
    %cst_126 = arith.constant 3.200000e+01 : f32
    %193 = vector.broadcast %cst_126 : f32 to vector<8x1xf32>
    %194 = arith.divf %192, %193 : vector<8x1xf32>
    %195 = vector.broadcast %187 : vector<8x1xf32> to vector<8x32xf32>
    %196 = arith.subf %181, %195 : vector<8x32xf32>
    %cst_127 = arith.constant 9.99999974E-6 : f32
    %197 = vector.broadcast %cst_127 : f32 to vector<8x1xf32>
    %198 = arith.addf %194, %197 : vector<8x1xf32>
    %199 = math.rsqrt %198 : vector<8x1xf32>
    %200 = vector.broadcast %199 : vector<8x1xf32> to vector<8x32xf32>
    %201 = arith.mulf %196, %200 : vector<8x32xf32>
    %202 = vector.broadcast %182 : vector<1x32xf32> to vector<8x32xf32>
    %203 = arith.mulf %202, %201 : vector<8x32xf32>
    %204 = vector.broadcast %183 : vector<1x32xf32> to vector<8x32xf32>
    %205 = arith.addf %203, %204 : vector<8x32xf32>
    %206 = arith.truncf %205 : vector<8x32xf32> to vector<8x32xbf16>
    %c0_128 = arith.constant 0 : index
    %c0_129 = arith.constant 0 : index
    %207 = vector.load %arg12[%c0_128, %c0_129] : memref<32x64xbf16, #tpu.memory_space<vmem>>, vector<32x64xbf16>
    %cst_130 = arith.constant dense<0.000000e+00> : vector<8x64xf32>
    %208 = tpu.matmul %206, %207, %cst_130 {dimension_numbers = #tpu.dot_dimension_numbers<[1], [0], [0], [1], [0, 0, 1, 1], [], []>} : vector<8x32xbf16>, vector<32x64xbf16>, vector<8x64xf32> -> vector<8x64xf32>
    %c0_131 = arith.constant 0 : index
    %c0_132 = arith.constant 0 : index
    %209 = vector.load %arg13[%c0_131, %c0_132] : memref<1x64xf32, #tpu.memory_space<vmem>>, vector<1x64xf32>
    %210 = vector.broadcast %209 : vector<1x64xf32> to vector<8x64xf32>
    %211 = arith.addf %208, %210 : vector<8x64xf32>
    %cst_133 = arith.constant 0.000000e+00 : f32
    %212 = vector.broadcast %cst_133 : f32 to vector<8x64xf32>
    %213 = arith.maximumf %211, %212 : vector<8x64xf32>
    %214 = arith.truncf %213 : vector<8x64xf32> to vector<8x64xbf16>
    %c0_134 = arith.constant 0 : index
    %c0_135 = arith.constant 0 : index
    %215 = vector.load %arg14[%c0_134, %c0_135] : memref<64x32xbf16, #tpu.memory_space<vmem>>, vector<64x32xbf16>
    %cst_136 = arith.constant dense<0.000000e+00> : vector<8x32xf32>
    %216 = tpu.matmul %214, %215, %cst_136 {dimension_numbers = #tpu.dot_dimension_numbers<[1], [0], [0], [1], [0, 0, 1, 1], [], []>} : vector<8x64xbf16>, vector<64x32xbf16>, vector<8x32xf32> -> vector<8x32xf32>
    %c0_137 = arith.constant 0 : index
    %c0_138 = arith.constant 0 : index
    %217 = vector.load %arg15[%c0_137, %c0_138] : memref<1x32xf32, #tpu.memory_space<vmem>>, vector<1x32xf32>
    %218 = vector.broadcast %217 : vector<1x32xf32> to vector<8x32xf32>
    %219 = arith.addf %216, %218 : vector<8x32xf32>
    %220 = arith.addf %219, %205 : vector<8x32xf32>
    %c0_139 = arith.constant 0 : index
    %c0_140 = arith.constant 0 : index
    %221 = vector.load %arg16[%c0_139, %c0_140] : memref<1x32xf32, #tpu.memory_space<vmem>>, vector<1x32xf32>
    %c0_141 = arith.constant 0 : index
    %c0_142 = arith.constant 0 : index
    %222 = vector.load %arg17[%c0_141, %c0_142] : memref<1x32xf32, #tpu.memory_space<vmem>>, vector<1x32xf32>
    %cst_143 = arith.constant dense<0.000000e+00> : vector<8xf32>
    %223 = vector.multi_reduction <add>, %220, %cst_143 [1] : vector<8x32xf32> to vector<8xf32>
    %224 = vector.shape_cast %223 : vector<8xf32> to vector<8x1xf32>
    %cst_144 = arith.constant 3.200000e+01 : f32
    %225 = vector.broadcast %cst_144 : f32 to vector<8x1xf32>
    %226 = arith.divf %224, %225 : vector<8x1xf32>
    %227 = vector.broadcast %226 : vector<8x1xf32> to vector<8x32xf32>
    %228 = arith.subf %220, %227 : vector<8x32xf32>
    %229 = arith.mulf %228, %228 : vector<8x32xf32>
    %cst_145 = arith.constant dense<0.000000e+00> : vector<8xf32>
    %230 = vector.multi_reduction <add>, %229, %cst_145 [1] : vector<8x32xf32> to vector<8xf32>
    %231 = vector.shape_cast %230 : vector<8xf32> to vector<8x1xf32>
    %cst_146 = arith.constant 3.200000e+01 : f32
    %232 = vector.broadcast %cst_146 : f32 to vector<8x1xf32>
    %233 = arith.divf %231, %232 : vector<8x1xf32>
    %234 = vector.broadcast %226 : vector<8x1xf32> to vector<8x32xf32>
    %235 = arith.subf %220, %234 : vector<8x32xf32>
    %cst_147 = arith.constant 9.99999974E-6 : f32
    %236 = vector.broadcast %cst_147 : f32 to vector<8x1xf32>
    %237 = arith.addf %233, %236 : vector<8x1xf32>
    %238 = math.rsqrt %237 : vector<8x1xf32>
    %239 = vector.broadcast %238 : vector<8x1xf32> to vector<8x32xf32>
    %240 = arith.mulf %235, %239 : vector<8x32xf32>
    %241 = vector.broadcast %221 : vector<1x32xf32> to vector<8x32xf32>
    %242 = arith.mulf %241, %240 : vector<8x32xf32>
    %243 = vector.broadcast %222 : vector<1x32xf32> to vector<8x32xf32>
    %244 = arith.addf %242, %243 : vector<8x32xf32>
    %c0_148 = arith.constant 0 : index
    %c0_149 = arith.constant 0 : index
    %245 = vector.load %arg18[%c0_148, %c0_149] : memref<8x32xf32, #tpu.memory_space<vmem>>, vector<8x32xf32>
    tpu.vector_store %arg18[%c0_148, %c0_149], %244 {strides = array<i32>} : memref<8x32xf32, #tpu.memory_space<vmem>>, vector<8x32xf32>,
    return
  }
  func.func @transform_0(%arg0: i32) -> (i32, i32) {
    %c0_i32 = arith.constant 0 : i32
    %c0_i32_0 = arith.constant 0 : i32
    return %arg0, %c0_i32 : i32, i32
  }
  func.func @transform_1(%arg0: i32) -> (i32, i32, i32) {
    %c0_i32 = arith.constant 0 : i32
    %c0_i32_0 = arith.constant 0 : i32
    %c0_i32_1 = arith.constant 0 : i32
    %c0_i32_2 = arith.constant 0 : i32
    return %c0_i32, %c0_i32_0, %c0_i32_1 : i32, i32, i32
  }
  func.func @transform_2(%arg0: i32) -> (i32, i32, i32) {
    %c0_i32 = arith.constant 0 : i32
    %c0_i32_0 = arith.constant 0 : i32
    %c0_i32_1 = arith.constant 0 : i32
    %c0_i32_2 = arith.constant 0 : i32
    return %c0_i32, %c0_i32_0, %c0_i32_1 : i32, i32, i32
  }
  func.func @transform_3(%arg0: i32) -> (i32, i32, i32) {
    %c0_i32 = arith.constant 0 : i32
    %c0_i32_0 = arith.constant 0 : i32
    %c0_i32_1 = arith.constant 0 : i32
    %c0_i32_2 = arith.constant 0 : i32
    return %c0_i32, %c0_i32_0, %c0_i32_1 : i32, i32, i32
  }
  func.func @transform_4(%arg0: i32) -> (i32, i32, i32) {
    %c0_i32 = arith.constant 0 : i32
    %c0_i32_0 = arith.constant 0 : i32
    %c0_i32_1 = arith.constant 0 : i32
    %c0_i32_2 = arith.constant 0 : i32
    return %c0_i32, %c0_i32_0, %c0_i32_1 : i32, i32, i32
  }
  func.func @transform_5(%arg0: i32) -> (i32, i32, i32) {
    %c0_i32 = arith.constant 0 : i32
    %c0_i32_0 = arith.constant 0 : i32
    %c0_i32_1 = arith.constant 0 : i32
    %c0_i32_2 = arith.constant 0 : i32
    return %c0_i32, %c0_i32_0, %c0_i32_1 : i32, i32, i32
  }
  func.func @transform_6(%arg0: i32) -> (i32, i32, i32) {
    %c0_i32 = arith.constant 0 : i32
    %c0_i32_0 = arith.constant 0 : i32
    %c0_i32_1 = arith.constant 0 : i32
    %c0_i32_2 = arith.constant 0 : i32
    return %c0_i32, %c0_i32_0, %c0_i32_1 : i32, i32, i32
  }
  func.func @transform_7(%arg0: i32) -> (i32, i32, i32) {
    %c0_i32 = arith.constant 0 : i32
    %c0_i32_0 = arith.constant 0 : i32
    %c0_i32_1 = arith.constant 0 : i32
    %c0_i32_2 = arith.constant 0 : i32
    return %c0_i32, %c0_i32_0, %c0_i32_1 : i32, i32, i32
  }
  func.func @transform_8(%arg0: i32) -> (i32, i32) {
    %c0_i32 = arith.constant 0 : i32
    %c0_i32_0 = arith.constant 0 : i32
    %c0_i32_1 = arith.constant 0 : i32
    return %c0_i32, %c0_i32_0 : i32, i32
  }
  func.func @transform_9(%arg0: i32) -> (i32, i32) {
    %c0_i32 = arith.constant 0 : i32
    %c0_i32_0 = arith.constant 0 : i32
    %c0_i32_1 = arith.constant 0 : i32
    return %c0_i32, %c0_i32_0 : i32, i32
  }
  func.func @transform_10(%arg0: i32) -> (i32, i32) {
    %c0_i32 = arith.constant 0 : i32
    %c0_i32_0 = arith.constant 0 : i32
    %c0_i32_1 = arith.constant 0 : i32
    return %c0_i32, %c0_i32_0 : i32, i32
  }
  func.func @transform_11(%arg0: i32) -> (i32, i32) {
    %c0_i32 = arith.constant 0 : i32
    %c0_i32_0 = arith.constant 0 : i32
    %c0_i32_1 = arith.constant 0 : i32
    return %c0_i32, %c0_i32_0 : i32, i32
  }
  func.func @transform_12(%arg0: i32) -> (i32, i32) {
    %c0_i32 = arith.constant 0 : i32
    %c0_i32_0 = arith.constant 0 : i32
    %c0_i32_1 = arith.constant 0 : i32
    return %c0_i32, %c0_i32_0 : i32, i32
  }
  func.func @transform_13(%arg0: i32) -> (i32, i32) {
    %c0_i32 = arith.constant 0 : i32
    %c0_i32_0 = arith.constant 0 : i32
    %c0_i32_1 = arith.constant 0 : i32
    return %c0_i32, %c0_i32_0 : i32, i32
  }
  func.func @transform_14(%arg0: i32) -> (i32, i32) {
    %c0_i32 = arith.constant 0 : i32
    %c0_i32_0 = arith.constant 0 : i32
    %c0_i32_1 = arith.constant 0 : i32
    return %c0_i32, %c0_i32_0 : i32, i32
  }
  func.func @transform_15(%arg0: i32) -> (i32, i32) {
    %c0_i32 = arith.constant 0 : i32
    %c0_i32_0 = arith.constant 0 : i32
    %c0_i32_1 = arith.constant 0 : i32
    return %c0_i32, %c0_i32_0 : i32, i32
  }
  func.func @transform_16(%arg0: i32) -> (i32, i32) {
    %c0_i32 = arith.constant 0 : i32
    %c0_i32_0 = arith.constant 0 : i32
    %c0_i32_1 = arith.constant 0 : i32
    return %c0_i32, %c0_i32_0 : i32, i32
  }
  func.func @transform_17(%arg0: i32) -> (i32, i32) {
    %c0_i32 = arith.constant 0 : i32
    %c0_i32_0 = arith.constant 0 : i32
    return %arg0, %c0_i32 : i32, i32
  }
}

module attributes {stable_mosaic.version = 11 : i64} {
  func.func @_decoder_layer_kernel(%arg0: i32, %arg1: memref<8x32xf32, #tpu.memory_space<vmem>>, %arg2: memref<8x32xf32, #tpu.memory_space<vmem>>, %arg3: memref<4x32x8xbf16, #tpu.memory_space<vmem>>, %arg4: memref<4x1x8xf32, #tpu.memory_space<vmem>>, %arg5: memref<4x32x8xbf16, #tpu.memory_space<vmem>>, %arg6: memref<4x1x8xf32, #tpu.memory_space<vmem>>, %arg7: memref<4x32x8xbf16, #tpu.memory_space<vmem>>, %arg8: memref<4x1x8xf32, #tpu.memory_space<vmem>>, %arg9: memref<4x8x32xbf16, #tpu.memory_space<vmem>>, %arg10: memref<1x32xf32, #tpu.memory_space<vmem>>, %arg11: memref<1x32xf32, #tpu.memory_space<vmem>>, %arg12: memref<1x32xf32, #tpu.memory_space<vmem>>, %arg13: memref<4x32x8xbf16, #tpu.memory_space<vmem>>, %arg14: memref<4x1x8xf32, #tpu.memory_space<vmem>>, %arg15: memref<4x32x8xbf16, #tpu.memory_space<vmem>>, %arg16: memref<4x1x8xf32, #tpu.memory_space<vmem>>, %arg17: memref<4x32x8xbf16, #tpu.memory_space<vmem>>, %arg18: memref<4x1x8xf32, #tpu.memory_space<vmem>>, %arg19: memref<4x8x32xbf16, #tpu.memory_space<vmem>>, %arg20: memref<1x32xf32, #tpu.memory_space<vmem>>, %arg21: memref<1x32xf32, #tpu.memory_space<vmem>>, %arg22: memref<1x32xf32, #tpu.memory_space<vmem>>, %arg23: memref<32x64xbf16, #tpu.memory_space<vmem>>, %arg24: memref<1x64xf32, #tpu.memory_space<vmem>>, %arg25: memref<64x32xbf16, #tpu.memory_space<vmem>>, %arg26: memref<1x32xf32, #tpu.memory_space<vmem>>, %arg27: memref<1x32xf32, #tpu.memory_space<vmem>>, %arg28: memref<1x32xf32, #tpu.memory_space<vmem>>, %arg29: memref<8x32xf32, #tpu.memory_space<vmem>>) attributes {dimension_semantics = [#tpu.dimension_semantics<parallel>], iteration_bounds = array<i64: 2>, scalar_prefetch = 0 : i64, scratch_operands = 0 : i64, tpu.core_type = #tpu.core_type<tc>, window_params = [{transform_indices = @transform_0, window_bounds = array<i64: 8, 32>}, {transform_indices = @transform_1, window_bounds = array<i64: 8, 32>}, {pipeline_mode = #tpu.pipeline_mode<synchronous>, transform_indices = @transform_2, window_bounds = array<i64: 4, 32, 8>}, {pipeline_mode = #tpu.pipeline_mode<synchronous>, transform_indices = @transform_3, window_bounds = array<i64: 4, 1, 8>}, {pipeline_mode = #tpu.pipeline_mode<synchronous>, transform_indices = @transform_4, window_bounds = array<i64: 4, 32, 8>}, {pipeline_mode = #tpu.pipeline_mode<synchronous>, transform_indices = @transform_5, window_bounds = array<i64: 4, 1, 8>}, {pipeline_mode = #tpu.pipeline_mode<synchronous>, transform_indices = @transform_6, window_bounds = array<i64: 4, 32, 8>}, {pipeline_mode = #tpu.pipeline_mode<synchronous>, transform_indices = @transform_7, window_bounds = array<i64: 4, 1, 8>}, {pipeline_mode = #tpu.pipeline_mode<synchronous>, transform_indices = @transform_8, window_bounds = array<i64: 4, 8, 32>}, {pipeline_mode = #tpu.pipeline_mode<synchronous>, transform_indices = @transform_9, window_bounds = array<i64: 1, 32>}, {pipeline_mode = #tpu.pipeline_mode<synchronous>, transform_indices = @transform_10, window_bounds = array<i64: 1, 32>}, {pipeline_mode = #tpu.pipeline_mode<synchronous>, transform_indices = @transform_11, window_bounds = array<i64: 1, 32>}, {pipeline_mode = #tpu.pipeline_mode<synchronous>, transform_indices = @transform_12, window_bounds = array<i64: 4, 32, 8>}, {pipeline_mode = #tpu.pipeline_mode<synchronous>, transform_indices = @transform_13, window_bounds = array<i64: 4, 1, 8>}, {pipeline_mode = #tpu.pipeline_mode<synchronous>, transform_indices = @transform_14, window_bounds = array<i64: 4, 32, 8>}, {pipeline_mode = #tpu.pipeline_mode<synchronous>, transform_indices = @transform_15, window_bounds = array<i64: 4, 1, 8>}, {pipeline_mode = #tpu.pipeline_mode<synchronous>, transform_indices = @transform_16, window_bounds = array<i64: 4, 32, 8>}, {pipeline_mode = #tpu.pipeline_mode<synchronous>, transform_indices = @transform_17, window_bounds = array<i64: 4, 1, 8>}, {pipeline_mode = #tpu.pipeline_mode<synchronous>, transform_indices = @transform_18, window_bounds = array<i64: 4, 8, 32>}, {pipeline_mode = #tpu.pipeline_mode<synchronous>, transform_indices = @transform_19, window_bounds = array<i64: 1, 32>}, {pipeline_mode = #tpu.pipeline_mode<synchronous>, transform_indices = @transform_20, window_bounds = array<i64: 1, 32>}, {pipeline_mode = #tpu.pipeline_mode<synchronous>, transform_indices = @transform_21, window_bounds = array<i64: 1, 32>}, {pipeline_mode = #tpu.pipeline_mode<synchronous>, transform_indices = @transform_22, window_bounds = array<i64: 32, 64>}, {pipeline_mode = #tpu.pipeline_mode<synchronous>, transform_indices = @transform_23, window_bounds = array<i64: 1, 64>}, {pipeline_mode = #tpu.pipeline_mode<synchronous>, transform_indices = @transform_24, window_bounds = array<i64: 64, 32>}, {pipeline_mode = #tpu.pipeline_mode<synchronous>, transform_indices = @transform_25, window_bounds = array<i64: 1, 32>}, {pipeline_mode = #tpu.pipeline_mode<synchronous>, transform_indices = @transform_26, window_bounds = array<i64: 1, 32>}, {pipeline_mode = #tpu.pipeline_mode<synchronous>, transform_indices = @transform_27, window_bounds = array<i64: 1, 32>}, {transform_indices = @transform_28, window_bounds = array<i64: 8, 32>}]} {
    %c0 = arith.constant 0 : index
    %c0_0 = arith.constant 0 : index
    %0 = vector.load %arg1[%c0, %c0_0] : memref<8x32xf32, #tpu.memory_space<vmem>>, vector<8x32xf32>
    %c0_1 = arith.constant 0 : index
    %c0_2 = arith.constant 0 : index
    %1 = vector.load %arg2[%c0_1, %c0_2] : memref<8x32xf32, #tpu.memory_space<vmem>>, vector<8x32xf32>
    %2 = arith.truncf %1 : vector<8x32xf32> to vector<8x32xbf16>
    %3 = arith.truncf %1 : vector<8x32xf32> to vector<8x32xbf16>
    %c0_3 = arith.constant 0 : index
    %c0_4 = arith.constant 0 : index
    %c0_5 = arith.constant 0 : index
    %4 = vector.load %arg3[%c0_3, %c0_4, %c0_5] : memref<4x32x8xbf16, #tpu.memory_space<vmem>>, vector<1x32x8xbf16>
    %5 = vector.shape_cast %4 : vector<1x32x8xbf16> to vector<32x8xbf16>
    %cst = arith.constant dense<0.000000e+00> : vector<8x8xf32>
    %6 = tpu.matmul %2, %5, %cst {dimension_numbers = #tpu.dot_dimension_numbers<[1], [0], [0], [1], [0, 0, 1, 1], [], []>} : vector<8x32xbf16>, vector<32x8xbf16>, vector<8x8xf32> -> vector<8x8xf32>
    %c0_6 = arith.constant 0 : index
    %c0_7 = arith.constant 0 : index
    %c0_8 = arith.constant 0 : index
    %7 = vector.load %arg4[%c0_6, %c0_7, %c0_8] : memref<4x1x8xf32, #tpu.memory_space<vmem>>, vector<1x1x8xf32>
    %8 = vector.shape_cast %7 : vector<1x1x8xf32> to vector<1x8xf32>
    %9 = vector.broadcast %8 : vector<1x8xf32> to vector<8x8xf32>
    %10 = arith.addf %6, %9 : vector<8x8xf32>
    %c0_9 = arith.constant 0 : index
    %c0_10 = arith.constant 0 : index
    %c0_11 = arith.constant 0 : index
    %11 = vector.load %arg5[%c0_9, %c0_10, %c0_11] : memref<4x32x8xbf16, #tpu.memory_space<vmem>>, vector<1x32x8xbf16>
    %12 = vector.shape_cast %11 : vector<1x32x8xbf16> to vector<32x8xbf16>
    %cst_12 = arith.constant dense<0.000000e+00> : vector<8x8xf32>
    %13 = tpu.matmul %3, %12, %cst_12 {dimension_numbers = #tpu.dot_dimension_numbers<[1], [0], [0], [1], [0, 0, 1, 1], [], []>} : vector<8x32xbf16>, vector<32x8xbf16>, vector<8x8xf32> -> vector<8x8xf32>
    %c0_13 = arith.constant 0 : index
    %c0_14 = arith.constant 0 : index
    %c0_15 = arith.constant 0 : index
    %14 = vector.load %arg6[%c0_13, %c0_14, %c0_15] : memref<4x1x8xf32, #tpu.memory_space<vmem>>, vector<1x1x8xf32>
    %15 = vector.shape_cast %14 : vector<1x1x8xf32> to vector<1x8xf32>
    %16 = vector.broadcast %15 : vector<1x8xf32> to vector<8x8xf32>
    %17 = arith.addf %13, %16 : vector<8x8xf32>
    %c0_16 = arith.constant 0 : index
    %c0_17 = arith.constant 0 : index
    %c0_18 = arith.constant 0 : index
    %18 = vector.load %arg7[%c0_16, %c0_17, %c0_18] : memref<4x32x8xbf16, #tpu.memory_space<vmem>>, vector<1x32x8xbf16>
    %19 = vector.shape_cast %18 : vector<1x32x8xbf16> to vector<32x8xbf16>
    %cst_19 = arith.constant dense<0.000000e+00> : vector<8x8xf32>
    %20 = tpu.matmul %3, %19, %cst_19 {dimension_numbers = #tpu.dot_dimension_numbers<[1], [0], [0], [1], [0, 0, 1, 1], [], []>} : vector<8x32xbf16>, vector<32x8xbf16>, vector<8x8xf32> -> vector<8x8xf32>
    %c0_20 = arith.constant 0 : index
    %c0_21 = arith.constant 0 : index
    %c0_22 = arith.constant 0 : index
    %21 = vector.load %arg8[%c0_20, %c0_21, %c0_22] : memref<4x1x8xf32, #tpu.memory_space<vmem>>, vector<1x1x8xf32>
    %22 = vector.shape_cast %21 : vector<1x1x8xf32> to vector<1x8xf32>
    %23 = vector.broadcast %22 : vector<1x8xf32> to vector<8x8xf32>
    %24 = arith.addf %20, %23 : vector<8x8xf32>
    %25 = arith.truncf %10 : vector<8x8xf32> to vector<8x8xbf16>
    %26 = arith.truncf %17 : vector<8x8xf32> to vector<8x8xbf16>
    %cst_23 = arith.constant dense<0.000000e+00> : vector<8x8xf32>
    %27 = tpu.matmul %25, %26, %cst_23 {dimension_numbers = #tpu.dot_dimension_numbers<[1], [1], [0], [0], [0, 0, 1, 0], [], []>} : vector<8x8xbf16>, vector<8x8xbf16>, vector<8x8xf32> -> vector<8x8xf32>
    %cst_24 = arith.constant 0.353553385 : f32
    %28 = vector.broadcast %cst_24 : f32 to vector<8x8xf32>
    %29 = arith.mulf %27, %28 : vector<8x8xf32>
    %cst_25 = arith.constant dense<0xFF800000> : vector<8xf32>
    %30 = vector.multi_reduction <maximumf>, %29, %cst_25 [1] : vector<8x8xf32> to vector<8xf32>
    %31 = vector.shape_cast %30 : vector<8xf32> to vector<8x1xf32>
    %32 = vector.broadcast %31 : vector<8x1xf32> to vector<8x8xf32>
    %33 = arith.subf %29, %32 : vector<8x8xf32>
    %34 = math.exp %33 : vector<8x8xf32>
    %cst_26 = arith.constant dense<0.000000e+00> : vector<8xf32>
    %35 = vector.multi_reduction <add>, %34, %cst_26 [1] : vector<8x8xf32> to vector<8xf32>
    %36 = vector.shape_cast %35 : vector<8xf32> to vector<8x1xf32>
    %37 = arith.truncf %34 : vector<8x8xf32> to vector<8x8xbf16>
    %38 = arith.truncf %24 : vector<8x8xf32> to vector<8x8xbf16>
    %cst_27 = arith.constant dense<0.000000e+00> : vector<8x8xf32>
    %39 = tpu.matmul %37, %38, %cst_27 {dimension_numbers = #tpu.dot_dimension_numbers<[1], [0], [0], [1], [0, 0, 1, 1], [], []>} : vector<8x8xbf16>, vector<8x8xbf16>, vector<8x8xf32> -> vector<8x8xf32>
    %40 = tpu.reciprocal %36 {approx = true} : vector<8x1xf32> -> vector<8x1xf32>
    %41 = vector.broadcast %40 : vector<8x1xf32> to vector<8x8xf32>
    %42 = arith.mulf %39, %41 : vector<8x8xf32>
    %43 = arith.truncf %42 : vector<8x8xf32> to vector<8x8xbf16>
    %c0_28 = arith.constant 0 : index
    %c0_29 = arith.constant 0 : index
    %c0_30 = arith.constant 0 : index
    %44 = vector.load %arg9[%c0_28, %c0_29, %c0_30] : memref<4x8x32xbf16, #tpu.memory_space<vmem>>, vector<1x8x32xbf16>
    %45 = vector.shape_cast %44 : vector<1x8x32xbf16> to vector<8x32xbf16>
    %cst_31 = arith.constant dense<0.000000e+00> : vector<8x32xf32>
    %46 = tpu.matmul %43, %45, %cst_31 {dimension_numbers = #tpu.dot_dimension_numbers<[1], [0], [0], [1], [0, 0, 1, 1], [], []>} : vector<8x8xbf16>, vector<8x32xbf16>, vector<8x32xf32> -> vector<8x32xf32>
    %c1 = arith.constant 1 : index
    %c0_32 = arith.constant 0 : index
    %c0_33 = arith.constant 0 : index
    %47 = vector.load %arg3[%c1, %c0_32, %c0_33] : memref<4x32x8xbf16, #tpu.memory_space<vmem>>, vector<1x32x8xbf16>
    %48 = vector.shape_cast %47 : vector<1x32x8xbf16> to vector<32x8xbf16>
    %cst_34 = arith.constant dense<0.000000e+00> : vector<8x8xf32>
    %49 = tpu.matmul %2, %48, %cst_34 {dimension_numbers = #tpu.dot_dimension_numbers<[1], [0], [0], [1], [0, 0, 1, 1], [], []>} : vector<8x32xbf16>, vector<32x8xbf16>, vector<8x8xf32> -> vector<8x8xf32>
    %c1_35 = arith.constant 1 : index
    %c0_36 = arith.constant 0 : index
    %c0_37 = arith.constant 0 : index
    %50 = vector.load %arg4[%c1_35, %c0_36, %c0_37] : memref<4x1x8xf32, #tpu.memory_space<vmem>>, vector<1x1x8xf32>
    %51 = vector.shape_cast %50 : vector<1x1x8xf32> to vector<1x8xf32>
    %52 = vector.broadcast %51 : vector<1x8xf32> to vector<8x8xf32>
    %53 = arith.addf %49, %52 : vector<8x8xf32>
    %c1_38 = arith.constant 1 : index
    %c0_39 = arith.constant 0 : index
    %c0_40 = arith.constant 0 : index
    %54 = vector.load %arg5[%c1_38, %c0_39, %c0_40] : memref<4x32x8xbf16, #tpu.memory_space<vmem>>, vector<1x32x8xbf16>
    %55 = vector.shape_cast %54 : vector<1x32x8xbf16> to vector<32x8xbf16>
    %cst_41 = arith.constant dense<0.000000e+00> : vector<8x8xf32>
    %56 = tpu.matmul %3, %55, %cst_41 {dimension_numbers = #tpu.dot_dimension_numbers<[1], [0], [0], [1], [0, 0, 1, 1], [], []>} : vector<8x32xbf16>, vector<32x8xbf16>, vector<8x8xf32> -> vector<8x8xf32>
    %c1_42 = arith.constant 1 : index
    %c0_43 = arith.constant 0 : index
    %c0_44 = arith.constant 0 : index
    %57 = vector.load %arg6[%c1_42, %c0_43, %c0_44] : memref<4x1x8xf32, #tpu.memory_space<vmem>>, vector<1x1x8xf32>
    %58 = vector.shape_cast %57 : vector<1x1x8xf32> to vector<1x8xf32>
    %59 = vector.broadcast %58 : vector<1x8xf32> to vector<8x8xf32>
    %60 = arith.addf %56, %59 : vector<8x8xf32>
    %c1_45 = arith.constant 1 : index
    %c0_46 = arith.constant 0 : index
    %c0_47 = arith.constant 0 : index
    %61 = vector.load %arg7[%c1_45, %c0_46, %c0_47] : memref<4x32x8xbf16, #tpu.memory_space<vmem>>, vector<1x32x8xbf16>
    %62 = vector.shape_cast %61 : vector<1x32x8xbf16> to vector<32x8xbf16>
    %cst_48 = arith.constant dense<0.000000e+00> : vector<8x8xf32>
    %63 = tpu.matmul %3, %62, %cst_48 {dimension_numbers = #tpu.dot_dimension_numbers<[1], [0], [0], [1], [0, 0, 1, 1], [], []>} : vector<8x32xbf16>, vector<32x8xbf16>, vector<8x8xf32> -> vector<8x8xf32>
    %c1_49 = arith.constant 1 : index
    %c0_50 = arith.constant 0 : index
    %c0_51 = arith.constant 0 : index
    %64 = vector.load %arg8[%c1_49, %c0_50, %c0_51] : memref<4x1x8xf32, #tpu.memory_space<vmem>>, vector<1x1x8xf32>
    %65 = vector.shape_cast %64 : vector<1x1x8xf32> to vector<1x8xf32>
    %66 = vector.broadcast %65 : vector<1x8xf32> to vector<8x8xf32>
    %67 = arith.addf %63, %66 : vector<8x8xf32>
    %68 = arith.truncf %53 : vector<8x8xf32> to vector<8x8xbf16>
    %69 = arith.truncf %60 : vector<8x8xf32> to vector<8x8xbf16>
    %cst_52 = arith.constant dense<0.000000e+00> : vector<8x8xf32>
    %70 = tpu.matmul %68, %69, %cst_52 {dimension_numbers = #tpu.dot_dimension_numbers<[1], [1], [0], [0], [0, 0, 1, 0], [], []>} : vector<8x8xbf16>, vector<8x8xbf16>, vector<8x8xf32> -> vector<8x8xf32>
    %cst_53 = arith.constant 0.353553385 : f32
    %71 = vector.broadcast %cst_53 : f32 to vector<8x8xf32>
    %72 = arith.mulf %70, %71 : vector<8x8xf32>
    %cst_54 = arith.constant dense<0xFF800000> : vector<8xf32>
    %73 = vector.multi_reduction <maximumf>, %72, %cst_54 [1] : vector<8x8xf32> to vector<8xf32>
    %74 = vector.shape_cast %73 : vector<8xf32> to vector<8x1xf32>
    %75 = vector.broadcast %74 : vector<8x1xf32> to vector<8x8xf32>
    %76 = arith.subf %72, %75 : vector<8x8xf32>
    %77 = math.exp %76 : vector<8x8xf32>
    %cst_55 = arith.constant dense<0.000000e+00> : vector<8xf32>
    %78 = vector.multi_reduction <add>, %77, %cst_55 [1] : vector<8x8xf32> to vector<8xf32>
    %79 = vector.shape_cast %78 : vector<8xf32> to vector<8x1xf32>
    %80 = arith.truncf %77 : vector<8x8xf32> to vector<8x8xbf16>
    %81 = arith.truncf %67 : vector<8x8xf32> to vector<8x8xbf16>
    %cst_56 = arith.constant dense<0.000000e+00> : vector<8x8xf32>
    %82 = tpu.matmul %80, %81, %cst_56 {dimension_numbers = #tpu.dot_dimension_numbers<[1], [0], [0], [1], [0, 0, 1, 1], [], []>} : vector<8x8xbf16>, vector<8x8xbf16>, vector<8x8xf32> -> vector<8x8xf32>
    %83 = tpu.reciprocal %79 {approx = true} : vector<8x1xf32> -> vector<8x1xf32>
    %84 = vector.broadcast %83 : vector<8x1xf32> to vector<8x8xf32>
    %85 = arith.mulf %82, %84 : vector<8x8xf32>
    %86 = arith.truncf %85 : vector<8x8xf32> to vector<8x8xbf16>
    %c1_57 = arith.constant 1 : index
    %c0_58 = arith.constant 0 : index
    %c0_59 = arith.constant 0 : index
    %87 = vector.load %arg9[%c1_57, %c0_58, %c0_59] : memref<4x8x32xbf16, #tpu.memory_space<vmem>>, vector<1x8x32xbf16>
    %88 = vector.shape_cast %87 : vector<1x8x32xbf16> to vector<8x32xbf16>
    %cst_60 = arith.constant dense<0.000000e+00> : vector<8x32xf32>
    %89 = tpu.matmul %86, %88, %cst_60 {dimension_numbers = #tpu.dot_dimension_numbers<[1], [0], [0], [1], [0, 0, 1, 1], [], []>} : vector<8x8xbf16>, vector<8x32xbf16>, vector<8x32xf32> -> vector<8x32xf32>
    %90 = arith.addf %46, %89 : vector<8x32xf32>
    %c2 = arith.constant 2 : index
    %c0_61 = arith.constant 0 : index
    %c0_62 = arith.constant 0 : index
    %91 = vector.load %arg3[%c2, %c0_61, %c0_62] : memref<4x32x8xbf16, #tpu.memory_space<vmem>>, vector<1x32x8xbf16>
    %92 = vector.shape_cast %91 : vector<1x32x8xbf16> to vector<32x8xbf16>
    %cst_63 = arith.constant dense<0.000000e+00> : vector<8x8xf32>
    %93 = tpu.matmul %2, %92, %cst_63 {dimension_numbers = #tpu.dot_dimension_numbers<[1], [0], [0], [1], [0, 0, 1, 1], [], []>} : vector<8x32xbf16>, vector<32x8xbf16>, vector<8x8xf32> -> vector<8x8xf32>
    %c2_64 = arith.constant 2 : index
    %c0_65 = arith.constant 0 : index
    %c0_66 = arith.constant 0 : index
    %94 = vector.load %arg4[%c2_64, %c0_65, %c0_66] : memref<4x1x8xf32, #tpu.memory_space<vmem>>, vector<1x1x8xf32>
    %95 = vector.shape_cast %94 : vector<1x1x8xf32> to vector<1x8xf32>
    %96 = vector.broadcast %95 : vector<1x8xf32> to vector<8x8xf32>
    %97 = arith.addf %93, %96 : vector<8x8xf32>
    %c2_67 = arith.constant 2 : index
    %c0_68 = arith.constant 0 : index
    %c0_69 = arith.constant 0 : index
    %98 = vector.load %arg5[%c2_67, %c0_68, %c0_69] : memref<4x32x8xbf16, #tpu.memory_space<vmem>>, vector<1x32x8xbf16>
    %99 = vector.shape_cast %98 : vector<1x32x8xbf16> to vector<32x8xbf16>
    %cst_70 = arith.constant dense<0.000000e+00> : vector<8x8xf32>
    %100 = tpu.matmul %3, %99, %cst_70 {dimension_numbers = #tpu.dot_dimension_numbers<[1], [0], [0], [1], [0, 0, 1, 1], [], []>} : vector<8x32xbf16>, vector<32x8xbf16>, vector<8x8xf32> -> vector<8x8xf32>
    %c2_71 = arith.constant 2 : index
    %c0_72 = arith.constant 0 : index
    %c0_73 = arith.constant 0 : index
    %101 = vector.load %arg6[%c2_71, %c0_72, %c0_73] : memref<4x1x8xf32, #tpu.memory_space<vmem>>, vector<1x1x8xf32>
    %102 = vector.shape_cast %101 : vector<1x1x8xf32> to vector<1x8xf32>
    %103 = vector.broadcast %102 : vector<1x8xf32> to vector<8x8xf32>
    %104 = arith.addf %100, %103 : vector<8x8xf32>
    %c2_74 = arith.constant 2 : index
    %c0_75 = arith.constant 0 : index
    %c0_76 = arith.constant 0 : index
    %105 = vector.load %arg7[%c2_74, %c0_75, %c0_76] : memref<4x32x8xbf16, #tpu.memory_space<vmem>>, vector<1x32x8xbf16>
    %106 = vector.shape_cast %105 : vector<1x32x8xbf16> to vector<32x8xbf16>
    %cst_77 = arith.constant dense<0.000000e+00> : vector<8x8xf32>
    %107 = tpu.matmul %3, %106, %cst_77 {dimension_numbers = #tpu.dot_dimension_numbers<[1], [0], [0], [1], [0, 0, 1, 1], [], []>} : vector<8x32xbf16>, vector<32x8xbf16>, vector<8x8xf32> -> vector<8x8xf32>
    %c2_78 = arith.constant 2 : index
    %c0_79 = arith.constant 0 : index
    %c0_80 = arith.constant 0 : index
    %108 = vector.load %arg8[%c2_78, %c0_79, %c0_80] : memref<4x1x8xf32, #tpu.memory_space<vmem>>, vector<1x1x8xf32>
    %109 = vector.shape_cast %108 : vector<1x1x8xf32> to vector<1x8xf32>
    %110 = vector.broadcast %109 : vector<1x8xf32> to vector<8x8xf32>
    %111 = arith.addf %107, %110 : vector<8x8xf32>
    %112 = arith.truncf %97 : vector<8x8xf32> to vector<8x8xbf16>
    %113 = arith.truncf %104 : vector<8x8xf32> to vector<8x8xbf16>
    %cst_81 = arith.constant dense<0.000000e+00> : vector<8x8xf32>
    %114 = tpu.matmul %112, %113, %cst_81 {dimension_numbers = #tpu.dot_dimension_numbers<[1], [1], [0], [0], [0, 0, 1, 0], [], []>} : vector<8x8xbf16>, vector<8x8xbf16>, vector<8x8xf32> -> vector<8x8xf32>
    %cst_82 = arith.constant 0.353553385 : f32
    %115 = vector.broadcast %cst_82 : f32 to vector<8x8xf32>
    %116 = arith.mulf %114, %115 : vector<8x8xf32>
    %cst_83 = arith.constant dense<0xFF800000> : vector<8xf32>
    %117 = vector.multi_reduction <maximumf>, %116, %cst_83 [1] : vector<8x8xf32> to vector<8xf32>
    %118 = vector.shape_cast %117 : vector<8xf32> to vector<8x1xf32>
    %119 = vector.broadcast %118 : vector<8x1xf32> to vector<8x8xf32>
    %120 = arith.subf %116, %119 : vector<8x8xf32>
    %121 = math.exp %120 : vector<8x8xf32>
    %cst_84 = arith.constant dense<0.000000e+00> : vector<8xf32>
    %122 = vector.multi_reduction <add>, %121, %cst_84 [1] : vector<8x8xf32> to vector<8xf32>
    %123 = vector.shape_cast %122 : vector<8xf32> to vector<8x1xf32>
    %124 = arith.truncf %121 : vector<8x8xf32> to vector<8x8xbf16>
    %125 = arith.truncf %111 : vector<8x8xf32> to vector<8x8xbf16>
    %cst_85 = arith.constant dense<0.000000e+00> : vector<8x8xf32>
    %126 = tpu.matmul %124, %125, %cst_85 {dimension_numbers = #tpu.dot_dimension_numbers<[1], [0], [0], [1], [0, 0, 1, 1], [], []>} : vector<8x8xbf16>, vector<8x8xbf16>, vector<8x8xf32> -> vector<8x8xf32>
    %127 = tpu.reciprocal %123 {approx = true} : vector<8x1xf32> -> vector<8x1xf32>
    %128 = vector.broadcast %127 : vector<8x1xf32> to vector<8x8xf32>
    %129 = arith.mulf %126, %128 : vector<8x8xf32>
    %130 = arith.truncf %129 : vector<8x8xf32> to vector<8x8xbf16>
    %c2_86 = arith.constant 2 : index
    %c0_87 = arith.constant 0 : index
    %c0_88 = arith.constant 0 : index
    %131 = vector.load %arg9[%c2_86, %c0_87, %c0_88] : memref<4x8x32xbf16, #tpu.memory_space<vmem>>, vector<1x8x32xbf16>
    %132 = vector.shape_cast %131 : vector<1x8x32xbf16> to vector<8x32xbf16>
    %cst_89 = arith.constant dense<0.000000e+00> : vector<8x32xf32>
    %133 = tpu.matmul %130, %132, %cst_89 {dimension_numbers = #tpu.dot_dimension_numbers<[1], [0], [0], [1], [0, 0, 1, 1], [], []>} : vector<8x8xbf16>, vector<8x32xbf16>, vector<8x32xf32> -> vector<8x32xf32>
    %134 = arith.addf %90, %133 : vector<8x32xf32>
    %c3 = arith.constant 3 : index
    %c0_90 = arith.constant 0 : index
    %c0_91 = arith.constant 0 : index
    %135 = vector.load %arg3[%c3, %c0_90, %c0_91] : memref<4x32x8xbf16, #tpu.memory_space<vmem>>, vector<1x32x8xbf16>
    %136 = vector.shape_cast %135 : vector<1x32x8xbf16> to vector<32x8xbf16>
    %cst_92 = arith.constant dense<0.000000e+00> : vector<8x8xf32>
    %137 = tpu.matmul %2, %136, %cst_92 {dimension_numbers = #tpu.dot_dimension_numbers<[1], [0], [0], [1], [0, 0, 1, 1], [], []>} : vector<8x32xbf16>, vector<32x8xbf16>, vector<8x8xf32> -> vector<8x8xf32>
    %c3_93 = arith.constant 3 : index
    %c0_94 = arith.constant 0 : index
    %c0_95 = arith.constant 0 : index
    %138 = vector.load %arg4[%c3_93, %c0_94, %c0_95] : memref<4x1x8xf32, #tpu.memory_space<vmem>>, vector<1x1x8xf32>
    %139 = vector.shape_cast %138 : vector<1x1x8xf32> to vector<1x8xf32>
    %140 = vector.broadcast %139 : vector<1x8xf32> to vector<8x8xf32>
    %141 = arith.addf %137, %140 : vector<8x8xf32>
    %c3_96 = arith.constant 3 : index
    %c0_97 = arith.constant 0 : index
    %c0_98 = arith.constant 0 : index
    %142 = vector.load %arg5[%c3_96, %c0_97, %c0_98] : memref<4x32x8xbf16, #tpu.memory_space<vmem>>, vector<1x32x8xbf16>
    %143 = vector.shape_cast %142 : vector<1x32x8xbf16> to vector<32x8xbf16>
    %cst_99 = arith.constant dense<0.000000e+00> : vector<8x8xf32>
    %144 = tpu.matmul %3, %143, %cst_99 {dimension_numbers = #tpu.dot_dimension_numbers<[1], [0], [0], [1], [0, 0, 1, 1], [], []>} : vector<8x32xbf16>, vector<32x8xbf16>, vector<8x8xf32> -> vector<8x8xf32>
    %c3_100 = arith.constant 3 : index
    %c0_101 = arith.constant 0 : index
    %c0_102 = arith.constant 0 : index
    %145 = vector.load %arg6[%c3_100, %c0_101, %c0_102] : memref<4x1x8xf32, #tpu.memory_space<vmem>>, vector<1x1x8xf32>
    %146 = vector.shape_cast %145 : vector<1x1x8xf32> to vector<1x8xf32>
    %147 = vector.broadcast %146 : vector<1x8xf32> to vector<8x8xf32>
    %148 = arith.addf %144, %147 : vector<8x8xf32>
    %c3_103 = arith.constant 3 : index
    %c0_104 = arith.constant 0 : index
    %c0_105 = arith.constant 0 : index
    %149 = vector.load %arg7[%c3_103, %c0_104, %c0_105] : memref<4x32x8xbf16, #tpu.memory_space<vmem>>, vector<1x32x8xbf16>
    %150 = vector.shape_cast %149 : vector<1x32x8xbf16> to vector<32x8xbf16>
    %cst_106 = arith.constant dense<0.000000e+00> : vector<8x8xf32>
    %151 = tpu.matmul %3, %150, %cst_106 {dimension_numbers = #tpu.dot_dimension_numbers<[1], [0], [0], [1], [0, 0, 1, 1], [], []>} : vector<8x32xbf16>, vector<32x8xbf16>, vector<8x8xf32> -> vector<8x8xf32>
    %c3_107 = arith.constant 3 : index
    %c0_108 = arith.constant 0 : index
    %c0_109 = arith.constant 0 : index
    %152 = vector.load %arg8[%c3_107, %c0_108, %c0_109] : memref<4x1x8xf32, #tpu.memory_space<vmem>>, vector<1x1x8xf32>
    %153 = vector.shape_cast %152 : vector<1x1x8xf32> to vector<1x8xf32>
    %154 = vector.broadcast %153 : vector<1x8xf32> to vector<8x8xf32>
    %155 = arith.addf %151, %154 : vector<8x8xf32>
    %156 = arith.truncf %141 : vector<8x8xf32> to vector<8x8xbf16>
    %157 = arith.truncf %148 : vector<8x8xf32> to vector<8x8xbf16>
    %cst_110 = arith.constant dense<0.000000e+00> : vector<8x8xf32>
    %158 = tpu.matmul %156, %157, %cst_110 {dimension_numbers = #tpu.dot_dimension_numbers<[1], [1], [0], [0], [0, 0, 1, 0], [], []>} : vector<8x8xbf16>, vector<8x8xbf16>, vector<8x8xf32> -> vector<8x8xf32>
    %cst_111 = arith.constant 0.353553385 : f32
    %159 = vector.broadcast %cst_111 : f32 to vector<8x8xf32>
    %160 = arith.mulf %158, %159 : vector<8x8xf32>
    %cst_112 = arith.constant dense<0xFF800000> : vector<8xf32>
    %161 = vector.multi_reduction <maximumf>, %160, %cst_112 [1] : vector<8x8xf32> to vector<8xf32>
    %162 = vector.shape_cast %161 : vector<8xf32> to vector<8x1xf32>
    %163 = vector.broadcast %162 : vector<8x1xf32> to vector<8x8xf32>
    %164 = arith.subf %160, %163 : vector<8x8xf32>
    %165 = math.exp %164 : vector<8x8xf32>
    %cst_113 = arith.constant dense<0.000000e+00> : vector<8xf32>
    %166 = vector.multi_reduction <add>, %165, %cst_113 [1] : vector<8x8xf32> to vector<8xf32>
    %167 = vector.shape_cast %166 : vector<8xf32> to vector<8x1xf32>
    %168 = arith.truncf %165 : vector<8x8xf32> to vector<8x8xbf16>
    %169 = arith.truncf %155 : vector<8x8xf32> to vector<8x8xbf16>
    %cst_114 = arith.constant dense<0.000000e+00> : vector<8x8xf32>
    %170 = tpu.matmul %168, %169, %cst_114 {dimension_numbers = #tpu.dot_dimension_numbers<[1], [0], [0], [1], [0, 0, 1, 1], [], []>} : vector<8x8xbf16>, vector<8x8xbf16>, vector<8x8xf32> -> vector<8x8xf32>
    %171 = tpu.reciprocal %167 {approx = true} : vector<8x1xf32> -> vector<8x1xf32>
    %172 = vector.broadcast %171 : vector<8x1xf32> to vector<8x8xf32>
    %173 = arith.mulf %170, %172 : vector<8x8xf32>
    %174 = arith.truncf %173 : vector<8x8xf32> to vector<8x8xbf16>
    %c3_115 = arith.constant 3 : index
    %c0_116 = arith.constant 0 : index
    %c0_117 = arith.constant 0 : index
    %175 = vector.load %arg9[%c3_115, %c0_116, %c0_117] : memref<4x8x32xbf16, #tpu.memory_space<vmem>>, vector<1x8x32xbf16>
    %176 = vector.shape_cast %175 : vector<1x8x32xbf16> to vector<8x32xbf16>
    %cst_118 = arith.constant dense<0.000000e+00> : vector<8x32xf32>
    %177 = tpu.matmul %174, %176, %cst_118 {dimension_numbers = #tpu.dot_dimension_numbers<[1], [0], [0], [1], [0, 0, 1, 1], [], []>} : vector<8x8xbf16>, vector<8x32xbf16>, vector<8x32xf32> -> vector<8x32xf32>
    %178 = arith.addf %134, %177 : vector<8x32xf32>
    %c0_119 = arith.constant 0 : index
    %c0_120 = arith.constant 0 : index
    %179 = vector.load %arg10[%c0_119, %c0_120] : memref<1x32xf32, #tpu.memory_space<vmem>>, vector<1x32xf32>
    %180 = vector.broadcast %179 : vector<1x32xf32> to vector<8x32xf32>
    %181 = arith.addf %178, %180 : vector<8x32xf32>
    %182 = arith.addf %181, %1 : vector<8x32xf32>
    %c0_121 = arith.constant 0 : index
    %c0_122 = arith.constant 0 : index
    %183 = vector.load %arg11[%c0_121, %c0_122] : memref<1x32xf32, #tpu.memory_space<vmem>>, vector<1x32xf32>
    %c0_123 = arith.constant 0 : index
    %c0_124 = arith.constant 0 : index
    %184 = vector.load %arg12[%c0_123, %c0_124] : memref<1x32xf32, #tpu.memory_space<vmem>>, vector<1x32xf32>
    %cst_125 = arith.constant dense<0.000000e+00> : vector<8xf32>
    %185 = vector.multi_reduction <add>, %182, %cst_125 [1] : vector<8x32xf32> to vector<8xf32>
    %186 = vector.shape_cast %185 : vector<8xf32> to vector<8x1xf32>
    %cst_126 = arith.constant 3.200000e+01 : f32
    %187 = vector.broadcast %cst_126 : f32 to vector<8x1xf32>
    %188 = arith.divf %186, %187 : vector<8x1xf32>
    %189 = vector.broadcast %188 : vector<8x1xf32> to vector<8x32xf32>
    %190 = arith.subf %182, %189 : vector<8x32xf32>
    %191 = arith.mulf %190, %190 : vector<8x32xf32>
    %cst_127 = arith.constant dense<0.000000e+00> : vector<8xf32>
    %192 = vector.multi_reduction <add>, %191, %cst_127 [1] : vector<8x32xf32> to vector<8xf32>
    %193 = vector.shape_cast %192 : vector<8xf32> to vector<8x1xf32>
    %cst_128 = arith.constant 3.200000e+01 : f32
    %194 = vector.broadcast %cst_128 : f32 to vector<8x1xf32>
    %195 = arith.divf %193, %194 : vector<8x1xf32>
    %196 = vector.broadcast %188 : vector<8x1xf32> to vector<8x32xf32>
    %197 = arith.subf %182, %196 : vector<8x32xf32>
    %cst_129 = arith.constant 9.99999974E-6 : f32
    %198 = vector.broadcast %cst_129 : f32 to vector<8x1xf32>
    %199 = arith.addf %195, %198 : vector<8x1xf32>
    %200 = math.rsqrt %199 : vector<8x1xf32>
    %201 = vector.broadcast %200 : vector<8x1xf32> to vector<8x32xf32>
    %202 = arith.mulf %197, %201 : vector<8x32xf32>
    %203 = vector.broadcast %183 : vector<1x32xf32> to vector<8x32xf32>
    %204 = arith.mulf %203, %202 : vector<8x32xf32>
    %205 = vector.broadcast %184 : vector<1x32xf32> to vector<8x32xf32>
    %206 = arith.addf %204, %205 : vector<8x32xf32>
    %207 = arith.truncf %206 : vector<8x32xf32> to vector<8x32xbf16>
    %208 = arith.truncf %0 : vector<8x32xf32> to vector<8x32xbf16>
    %c0_130 = arith.constant 0 : index
    %c0_131 = arith.constant 0 : index
    %c0_132 = arith.constant 0 : index
    %209 = vector.load %arg13[%c0_130, %c0_131, %c0_132] : memref<4x32x8xbf16, #tpu.memory_space<vmem>>, vector<1x32x8xbf16>
    %210 = vector.shape_cast %209 : vector<1x32x8xbf16> to vector<32x8xbf16>
    %cst_133 = arith.constant dense<0.000000e+00> : vector<8x8xf32>
    %211 = tpu.matmul %207, %210, %cst_133 {dimension_numbers = #tpu.dot_dimension_numbers<[1], [0], [0], [1], [0, 0, 1, 1], [], []>} : vector<8x32xbf16>, vector<32x8xbf16>, vector<8x8xf32> -> vector<8x8xf32>
    %c0_134 = arith.constant 0 : index
    %c0_135 = arith.constant 0 : index
    %c0_136 = arith.constant 0 : index
    %212 = vector.load %arg14[%c0_134, %c0_135, %c0_136] : memref<4x1x8xf32, #tpu.memory_space<vmem>>, vector<1x1x8xf32>
    %213 = vector.shape_cast %212 : vector<1x1x8xf32> to vector<1x8xf32>
    %214 = vector.broadcast %213 : vector<1x8xf32> to vector<8x8xf32>
    %215 = arith.addf %211, %214 : vector<8x8xf32>
    %c0_137 = arith.constant 0 : index
    %c0_138 = arith.constant 0 : index
    %c0_139 = arith.constant 0 : index
    %216 = vector.load %arg15[%c0_137, %c0_138, %c0_139] : memref<4x32x8xbf16, #tpu.memory_space<vmem>>, vector<1x32x8xbf16>
    %217 = vector.shape_cast %216 : vector<1x32x8xbf16> to vector<32x8xbf16>
    %cst_140 = arith.constant dense<0.000000e+00> : vector<8x8xf32>
    %218 = tpu.matmul %208, %217, %cst_140 {dimension_numbers = #tpu.dot_dimension_numbers<[1], [0], [0], [1], [0, 0, 1, 1], [], []>} : vector<8x32xbf16>, vector<32x8xbf16>, vector<8x8xf32> -> vector<8x8xf32>
    %c0_141 = arith.constant 0 : index
    %c0_142 = arith.constant 0 : index
    %c0_143 = arith.constant 0 : index
    %219 = vector.load %arg16[%c0_141, %c0_142, %c0_143] : memref<4x1x8xf32, #tpu.memory_space<vmem>>, vector<1x1x8xf32>
    %220 = vector.shape_cast %219 : vector<1x1x8xf32> to vector<1x8xf32>
    %221 = vector.broadcast %220 : vector<1x8xf32> to vector<8x8xf32>
    %222 = arith.addf %218, %221 : vector<8x8xf32>
    %c0_144 = arith.constant 0 : index
    %c0_145 = arith.constant 0 : index
    %c0_146 = arith.constant 0 : index
    %223 = vector.load %arg17[%c0_144, %c0_145, %c0_146] : memref<4x32x8xbf16, #tpu.memory_space<vmem>>, vector<1x32x8xbf16>
    %224 = vector.shape_cast %223 : vector<1x32x8xbf16> to vector<32x8xbf16>
    %cst_147 = arith.constant dense<0.000000e+00> : vector<8x8xf32>
    %225 = tpu.matmul %208, %224, %cst_147 {dimension_numbers = #tpu.dot_dimension_numbers<[1], [0], [0], [1], [0, 0, 1, 1], [], []>} : vector<8x32xbf16>, vector<32x8xbf16>, vector<8x8xf32> -> vector<8x8xf32>
    %c0_148 = arith.constant 0 : index
    %c0_149 = arith.constant 0 : index
    %c0_150 = arith.constant 0 : index
    %226 = vector.load %arg18[%c0_148, %c0_149, %c0_150] : memref<4x1x8xf32, #tpu.memory_space<vmem>>, vector<1x1x8xf32>
    %227 = vector.shape_cast %226 : vector<1x1x8xf32> to vector<1x8xf32>
    %228 = vector.broadcast %227 : vector<1x8xf32> to vector<8x8xf32>
    %229 = arith.addf %225, %228 : vector<8x8xf32>
    %230 = arith.truncf %215 : vector<8x8xf32> to vector<8x8xbf16>
    %231 = arith.truncf %222 : vector<8x8xf32> to vector<8x8xbf16>
    %cst_151 = arith.constant dense<0.000000e+00> : vector<8x8xf32>
    %232 = tpu.matmul %230, %231, %cst_151 {dimension_numbers = #tpu.dot_dimension_numbers<[1], [1], [0], [0], [0, 0, 1, 0], [], []>} : vector<8x8xbf16>, vector<8x8xbf16>, vector<8x8xf32> -> vector<8x8xf32>
    %cst_152 = arith.constant 0.353553385 : f32
    %233 = vector.broadcast %cst_152 : f32 to vector<8x8xf32>
    %234 = arith.mulf %232, %233 : vector<8x8xf32>
    %cst_153 = arith.constant dense<0xFF800000> : vector<8xf32>
    %235 = vector.multi_reduction <maximumf>, %234, %cst_153 [1] : vector<8x8xf32> to vector<8xf32>
    %236 = vector.shape_cast %235 : vector<8xf32> to vector<8x1xf32>
    %237 = vector.broadcast %236 : vector<8x1xf32> to vector<8x8xf32>
    %238 = arith.subf %234, %237 : vector<8x8xf32>
    %239 = math.exp %238 : vector<8x8xf32>
    %cst_154 = arith.constant dense<0.000000e+00> : vector<8xf32>
    %240 = vector.multi_reduction <add>, %239, %cst_154 [1] : vector<8x8xf32> to vector<8xf32>
    %241 = vector.shape_cast %240 : vector<8xf32> to vector<8x1xf32>
    %242 = arith.truncf %239 : vector<8x8xf32> to vector<8x8xbf16>
    %243 = arith.truncf %229 : vector<8x8xf32> to vector<8x8xbf16>
    %cst_155 = arith.constant dense<0.000000e+00> : vector<8x8xf32>
    %244 = tpu.matmul %242, %243, %cst_155 {dimension_numbers = #tpu.dot_dimension_numbers<[1], [0], [0], [1], [0, 0, 1, 1], [], []>} : vector<8x8xbf16>, vector<8x8xbf16>, vector<8x8xf32> -> vector<8x8xf32>
    %245 = tpu.reciprocal %241 {approx = true} : vector<8x1xf32> -> vector<8x1xf32>
    %246 = vector.broadcast %245 : vector<8x1xf32> to vector<8x8xf32>
    %247 = arith.mulf %244, %246 : vector<8x8xf32>
    %248 = arith.truncf %247 : vector<8x8xf32> to vector<8x8xbf16>
    %c0_156 = arith.constant 0 : index
    %c0_157 = arith.constant 0 : index
    %c0_158 = arith.constant 0 : index
    %249 = vector.load %arg19[%c0_156, %c0_157, %c0_158] : memref<4x8x32xbf16, #tpu.memory_space<vmem>>, vector<1x8x32xbf16>
    %250 = vector.shape_cast %249 : vector<1x8x32xbf16> to vector<8x32xbf16>
    %cst_159 = arith.constant dense<0.000000e+00> : vector<8x32xf32>
    %251 = tpu.matmul %248, %250, %cst_159 {dimension_numbers = #tpu.dot_dimension_numbers<[1], [0], [0], [1], [0, 0, 1, 1], [], []>} : vector<8x8xbf16>, vector<8x32xbf16>, vector<8x32xf32> -> vector<8x32xf32>
    %c1_160 = arith.constant 1 : index
    %c0_161 = arith.constant 0 : index
    %c0_162 = arith.constant 0 : index
    %252 = vector.load %arg13[%c1_160, %c0_161, %c0_162] : memref<4x32x8xbf16, #tpu.memory_space<vmem>>, vector<1x32x8xbf16>
    %253 = vector.shape_cast %252 : vector<1x32x8xbf16> to vector<32x8xbf16>
    %cst_163 = arith.constant dense<0.000000e+00> : vector<8x8xf32>
    %254 = tpu.matmul %207, %253, %cst_163 {dimension_numbers = #tpu.dot_dimension_numbers<[1], [0], [0], [1], [0, 0, 1, 1], [], []>} : vector<8x32xbf16>, vector<32x8xbf16>, vector<8x8xf32> -> vector<8x8xf32>
    %c1_164 = arith.constant 1 : index
    %c0_165 = arith.constant 0 : index
    %c0_166 = arith.constant 0 : index
    %255 = vector.load %arg14[%c1_164, %c0_165, %c0_166] : memref<4x1x8xf32, #tpu.memory_space<vmem>>, vector<1x1x8xf32>
    %256 = vector.shape_cast %255 : vector<1x1x8xf32> to vector<1x8xf32>
    %257 = vector.broadcast %256 : vector<1x8xf32> to vector<8x8xf32>
    %258 = arith.addf %254, %257 : vector<8x8xf32>
    %c1_167 = arith.constant 1 : index
    %c0_168 = arith.constant 0 : index
    %c0_169 = arith.constant 0 : index
    %259 = vector.load %arg15[%c1_167, %c0_168, %c0_169] : memref<4x32x8xbf16, #tpu.memory_space<vmem>>, vector<1x32x8xbf16>
    %260 = vector.shape_cast %259 : vector<1x32x8xbf16> to vector<32x8xbf16>
    %cst_170 = arith.constant dense<0.000000e+00> : vector<8x8xf32>
    %261 = tpu.matmul %208, %260, %cst_170 {dimension_numbers = #tpu.dot_dimension_numbers<[1], [0], [0], [1], [0, 0, 1, 1], [], []>} : vector<8x32xbf16>, vector<32x8xbf16>, vector<8x8xf32> -> vector<8x8xf32>
    %c1_171 = arith.constant 1 : index
    %c0_172 = arith.constant 0 : index
    %c0_173 = arith.constant 0 : index
    %262 = vector.load %arg16[%c1_171, %c0_172, %c0_173] : memref<4x1x8xf32, #tpu.memory_space<vmem>>, vector<1x1x8xf32>
    %263 = vector.shape_cast %262 : vector<1x1x8xf32> to vector<1x8xf32>
    %264 = vector.broadcast %263 : vector<1x8xf32> to vector<8x8xf32>
    %265 = arith.addf %261, %264 : vector<8x8xf32>
    %c1_174 = arith.constant 1 : index
    %c0_175 = arith.constant 0 : index
    %c0_176 = arith.constant 0 : index
    %266 = vector.load %arg17[%c1_174, %c0_175, %c0_176] : memref<4x32x8xbf16, #tpu.memory_space<vmem>>, vector<1x32x8xbf16>
    %267 = vector.shape_cast %266 : vector<1x32x8xbf16> to vector<32x8xbf16>
    %cst_177 = arith.constant dense<0.000000e+00> : vector<8x8xf32>
    %268 = tpu.matmul %208, %267, %cst_177 {dimension_numbers = #tpu.dot_dimension_numbers<[1], [0], [0], [1], [0, 0, 1, 1], [], []>} : vector<8x32xbf16>, vector<32x8xbf16>, vector<8x8xf32> -> vector<8x8xf32>
    %c1_178 = arith.constant 1 : index
    %c0_179 = arith.constant 0 : index
    %c0_180 = arith.constant 0 : index
    %269 = vector.load %arg18[%c1_178, %c0_179, %c0_180] : memref<4x1x8xf32, #tpu.memory_space<vmem>>, vector<1x1x8xf32>
    %270 = vector.shape_cast %269 : vector<1x1x8xf32> to vector<1x8xf32>
    %271 = vector.broadcast %270 : vector<1x8xf32> to vector<8x8xf32>
    %272 = arith.addf %268, %271 : vector<8x8xf32>
    %273 = arith.truncf %258 : vector<8x8xf32> to vector<8x8xbf16>
    %274 = arith.truncf %265 : vector<8x8xf32> to vector<8x8xbf16>
    %cst_181 = arith.constant dense<0.000000e+00> : vector<8x8xf32>
    %275 = tpu.matmul %273, %274, %cst_181 {dimension_numbers = #tpu.dot_dimension_numbers<[1], [1], [0], [0], [0, 0, 1, 0], [], []>} : vector<8x8xbf16>, vector<8x8xbf16>, vector<8x8xf32> -> vector<8x8xf32>
    %cst_182 = arith.constant 0.353553385 : f32
    %276 = vector.broadcast %cst_182 : f32 to vector<8x8xf32>
    %277 = arith.mulf %275, %276 : vector<8x8xf32>
    %cst_183 = arith.constant dense<0xFF800000> : vector<8xf32>
    %278 = vector.multi_reduction <maximumf>, %277, %cst_183 [1] : vector<8x8xf32> to vector<8xf32>
    %279 = vector.shape_cast %278 : vector<8xf32> to vector<8x1xf32>
    %280 = vector.broadcast %279 : vector<8x1xf32> to vector<8x8xf32>
    %281 = arith.subf %277, %280 : vector<8x8xf32>
    %282 = math.exp %281 : vector<8x8xf32>
    %cst_184 = arith.constant dense<0.000000e+00> : vector<8xf32>
    %283 = vector.multi_reduction <add>, %282, %cst_184 [1] : vector<8x8xf32> to vector<8xf32>
    %284 = vector.shape_cast %283 : vector<8xf32> to vector<8x1xf32>
    %285 = arith.truncf %282 : vector<8x8xf32> to vector<8x8xbf16>
    %286 = arith.truncf %272 : vector<8x8xf32> to vector<8x8xbf16>
    %cst_185 = arith.constant dense<0.000000e+00> : vector<8x8xf32>
    %287 = tpu.matmul %285, %286, %cst_185 {dimension_numbers = #tpu.dot_dimension_numbers<[1], [0], [0], [1], [0, 0, 1, 1], [], []>} : vector<8x8xbf16>, vector<8x8xbf16>, vector<8x8xf32> -> vector<8x8xf32>
    %288 = tpu.reciprocal %284 {approx = true} : vector<8x1xf32> -> vector<8x1xf32>
    %289 = vector.broadcast %288 : vector<8x1xf32> to vector<8x8xf32>
    %290 = arith.mulf %287, %289 : vector<8x8xf32>
    %291 = arith.truncf %290 : vector<8x8xf32> to vector<8x8xbf16>
    %c1_186 = arith.constant 1 : index
    %c0_187 = arith.constant 0 : index
    %c0_188 = arith.constant 0 : index
    %292 = vector.load %arg19[%c1_186, %c0_187, %c0_188] : memref<4x8x32xbf16, #tpu.memory_space<vmem>>, vector<1x8x32xbf16>
    %293 = vector.shape_cast %292 : vector<1x8x32xbf16> to vector<8x32xbf16>
    %cst_189 = arith.constant dense<0.000000e+00> : vector<8x32xf32>
    %294 = tpu.matmul %291, %293, %cst_189 {dimension_numbers = #tpu.dot_dimension_numbers<[1], [0], [0], [1], [0, 0, 1, 1], [], []>} : vector<8x8xbf16>, vector<8x32xbf16>, vector<8x32xf32> -> vector<8x32xf32>
    %295 = arith.addf %251, %294 : vector<8x32xf32>
    %c2_190 = arith.constant 2 : index
    %c0_191 = arith.constant 0 : index
    %c0_192 = arith.constant 0 : index
    %296 = vector.load %arg13[%c2_190, %c0_191, %c0_192] : memref<4x32x8xbf16, #tpu.memory_space<vmem>>, vector<1x32x8xbf16>
    %297 = vector.shape_cast %296 : vector<1x32x8xbf16> to vector<32x8xbf16>
    %cst_193 = arith.constant dense<0.000000e+00> : vector<8x8xf32>
    %298 = tpu.matmul %207, %297, %cst_193 {dimension_numbers = #tpu.dot_dimension_numbers<[1], [0], [0], [1], [0, 0, 1, 1], [], []>} : vector<8x32xbf16>, vector<32x8xbf16>, vector<8x8xf32> -> vector<8x8xf32>
    %c2_194 = arith.constant 2 : index
    %c0_195 = arith.constant 0 : index
    %c0_196 = arith.constant 0 : index
    %299 = vector.load %arg14[%c2_194, %c0_195, %c0_196] : memref<4x1x8xf32, #tpu.memory_space<vmem>>, vector<1x1x8xf32>
    %300 = vector.shape_cast %299 : vector<1x1x8xf32> to vector<1x8xf32>
    %301 = vector.broadcast %300 : vector<1x8xf32> to vector<8x8xf32>
    %302 = arith.addf %298, %301 : vector<8x8xf32>
    %c2_197 = arith.constant 2 : index
    %c0_198 = arith.constant 0 : index
    %c0_199 = arith.constant 0 : index
    %303 = vector.load %arg15[%c2_197, %c0_198, %c0_199] : memref<4x32x8xbf16, #tpu.memory_space<vmem>>, vector<1x32x8xbf16>
    %304 = vector.shape_cast %303 : vector<1x32x8xbf16> to vector<32x8xbf16>
    %cst_200 = arith.constant dense<0.000000e+00> : vector<8x8xf32>
    %305 = tpu.matmul %208, %304, %cst_200 {dimension_numbers = #tpu.dot_dimension_numbers<[1], [0], [0], [1], [0, 0, 1, 1], [], []>} : vector<8x32xbf16>, vector<32x8xbf16>, vector<8x8xf32> -> vector<8x8xf32>
    %c2_201 = arith.constant 2 : index
    %c0_202 = arith.constant 0 : index
    %c0_203 = arith.constant 0 : index
    %306 = vector.load %arg16[%c2_201, %c0_202, %c0_203] : memref<4x1x8xf32, #tpu.memory_space<vmem>>, vector<1x1x8xf32>
    %307 = vector.shape_cast %306 : vector<1x1x8xf32> to vector<1x8xf32>
    %308 = vector.broadcast %307 : vector<1x8xf32> to vector<8x8xf32>
    %309 = arith.addf %305, %308 : vector<8x8xf32>
    %c2_204 = arith.constant 2 : index
    %c0_205 = arith.constant 0 : index
    %c0_206 = arith.constant 0 : index
    %310 = vector.load %arg17[%c2_204, %c0_205, %c0_206] : memref<4x32x8xbf16, #tpu.memory_space<vmem>>, vector<1x32x8xbf16>
    %311 = vector.shape_cast %310 : vector<1x32x8xbf16> to vector<32x8xbf16>
    %cst_207 = arith.constant dense<0.000000e+00> : vector<8x8xf32>
    %312 = tpu.matmul %208, %311, %cst_207 {dimension_numbers = #tpu.dot_dimension_numbers<[1], [0], [0], [1], [0, 0, 1, 1], [], []>} : vector<8x32xbf16>, vector<32x8xbf16>, vector<8x8xf32> -> vector<8x8xf32>
    %c2_208 = arith.constant 2 : index
    %c0_209 = arith.constant 0 : index
    %c0_210 = arith.constant 0 : index
    %313 = vector.load %arg18[%c2_208, %c0_209, %c0_210] : memref<4x1x8xf32, #tpu.memory_space<vmem>>, vector<1x1x8xf32>
    %314 = vector.shape_cast %313 : vector<1x1x8xf32> to vector<1x8xf32>
    %315 = vector.broadcast %314 : vector<1x8xf32> to vector<8x8xf32>
    %316 = arith.addf %312, %315 : vector<8x8xf32>
    %317 = arith.truncf %302 : vector<8x8xf32> to vector<8x8xbf16>
    %318 = arith.truncf %309 : vector<8x8xf32> to vector<8x8xbf16>
    %cst_211 = arith.constant dense<0.000000e+00> : vector<8x8xf32>
    %319 = tpu.matmul %317, %318, %cst_211 {dimension_numbers = #tpu.dot_dimension_numbers<[1], [1], [0], [0], [0, 0, 1, 0], [], []>} : vector<8x8xbf16>, vector<8x8xbf16>, vector<8x8xf32> -> vector<8x8xf32>
    %cst_212 = arith.constant 0.353553385 : f32
    %320 = vector.broadcast %cst_212 : f32 to vector<8x8xf32>
    %321 = arith.mulf %319, %320 : vector<8x8xf32>
    %cst_213 = arith.constant dense<0xFF800000> : vector<8xf32>
    %322 = vector.multi_reduction <maximumf>, %321, %cst_213 [1] : vector<8x8xf32> to vector<8xf32>
    %323 = vector.shape_cast %322 : vector<8xf32> to vector<8x1xf32>
    %324 = vector.broadcast %323 : vector<8x1xf32> to vector<8x8xf32>
    %325 = arith.subf %321, %324 : vector<8x8xf32>
    %326 = math.exp %325 : vector<8x8xf32>
    %cst_214 = arith.constant dense<0.000000e+00> : vector<8xf32>
    %327 = vector.multi_reduction <add>, %326, %cst_214 [1] : vector<8x8xf32> to vector<8xf32>
    %328 = vector.shape_cast %327 : vector<8xf32> to vector<8x1xf32>
    %329 = arith.truncf %326 : vector<8x8xf32> to vector<8x8xbf16>
    %330 = arith.truncf %316 : vector<8x8xf32> to vector<8x8xbf16>
    %cst_215 = arith.constant dense<0.000000e+00> : vector<8x8xf32>
    %331 = tpu.matmul %329, %330, %cst_215 {dimension_numbers = #tpu.dot_dimension_numbers<[1], [0], [0], [1], [0, 0, 1, 1], [], []>} : vector<8x8xbf16>, vector<8x8xbf16>, vector<8x8xf32> -> vector<8x8xf32>
    %332 = tpu.reciprocal %328 {approx = true} : vector<8x1xf32> -> vector<8x1xf32>
    %333 = vector.broadcast %332 : vector<8x1xf32> to vector<8x8xf32>
    %334 = arith.mulf %331, %333 : vector<8x8xf32>
    %335 = arith.truncf %334 : vector<8x8xf32> to vector<8x8xbf16>
    %c2_216 = arith.constant 2 : index
    %c0_217 = arith.constant 0 : index
    %c0_218 = arith.constant 0 : index
    %336 = vector.load %arg19[%c2_216, %c0_217, %c0_218] : memref<4x8x32xbf16, #tpu.memory_space<vmem>>, vector<1x8x32xbf16>
    %337 = vector.shape_cast %336 : vector<1x8x32xbf16> to vector<8x32xbf16>
    %cst_219 = arith.constant dense<0.000000e+00> : vector<8x32xf32>
    %338 = tpu.matmul %335, %337, %cst_219 {dimension_numbers = #tpu.dot_dimension_numbers<[1], [0], [0], [1], [0, 0, 1, 1], [], []>} : vector<8x8xbf16>, vector<8x32xbf16>, vector<8x32xf32> -> vector<8x32xf32>
    %339 = arith.addf %295, %338 : vector<8x32xf32>
    %c3_220 = arith.constant 3 : index
    %c0_221 = arith.constant 0 : index
    %c0_222 = arith.constant 0 : index
    %340 = vector.load %arg13[%c3_220, %c0_221, %c0_222] : memref<4x32x8xbf16, #tpu.memory_space<vmem>>, vector<1x32x8xbf16>
    %341 = vector.shape_cast %340 : vector<1x32x8xbf16> to vector<32x8xbf16>
    %cst_223 = arith.constant dense<0.000000e+00> : vector<8x8xf32>
    %342 = tpu.matmul %207, %341, %cst_223 {dimension_numbers = #tpu.dot_dimension_numbers<[1], [0], [0], [1], [0, 0, 1, 1], [], []>} : vector<8x32xbf16>, vector<32x8xbf16>, vector<8x8xf32> -> vector<8x8xf32>
    %c3_224 = arith.constant 3 : index
    %c0_225 = arith.constant 0 : index
    %c0_226 = arith.constant 0 : index
    %343 = vector.load %arg14[%c3_224, %c0_225, %c0_226] : memref<4x1x8xf32, #tpu.memory_space<vmem>>, vector<1x1x8xf32>
    %344 = vector.shape_cast %343 : vector<1x1x8xf32> to vector<1x8xf32>
    %345 = vector.broadcast %344 : vector<1x8xf32> to vector<8x8xf32>
    %346 = arith.addf %342, %345 : vector<8x8xf32>
    %c3_227 = arith.constant 3 : index
    %c0_228 = arith.constant 0 : index
    %c0_229 = arith.constant 0 : index
    %347 = vector.load %arg15[%c3_227, %c0_228, %c0_229] : memref<4x32x8xbf16, #tpu.memory_space<vmem>>, vector<1x32x8xbf16>
    %348 = vector.shape_cast %347 : vector<1x32x8xbf16> to vector<32x8xbf16>
    %cst_230 = arith.constant dense<0.000000e+00> : vector<8x8xf32>
    %349 = tpu.matmul %208, %348, %cst_230 {dimension_numbers = #tpu.dot_dimension_numbers<[1], [0], [0], [1], [0, 0, 1, 1], [], []>} : vector<8x32xbf16>, vector<32x8xbf16>, vector<8x8xf32> -> vector<8x8xf32>
    %c3_231 = arith.constant 3 : index
    %c0_232 = arith.constant 0 : index
    %c0_233 = arith.constant 0 : index
    %350 = vector.load %arg16[%c3_231, %c0_232, %c0_233] : memref<4x1x8xf32, #tpu.memory_space<vmem>>, vector<1x1x8xf32>
    %351 = vector.shape_cast %350 : vector<1x1x8xf32> to vector<1x8xf32>
    %352 = vector.broadcast %351 : vector<1x8xf32> to vector<8x8xf32>
    %353 = arith.addf %349, %352 : vector<8x8xf32>
    %c3_234 = arith.constant 3 : index
    %c0_235 = arith.constant 0 : index
    %c0_236 = arith.constant 0 : index
    %354 = vector.load %arg17[%c3_234, %c0_235, %c0_236] : memref<4x32x8xbf16, #tpu.memory_space<vmem>>, vector<1x32x8xbf16>
    %355 = vector.shape_cast %354 : vector<1x32x8xbf16> to vector<32x8xbf16>
    %cst_237 = arith.constant dense<0.000000e+00> : vector<8x8xf32>
    %356 = tpu.matmul %208, %355, %cst_237 {dimension_numbers = #tpu.dot_dimension_numbers<[1], [0], [0], [1], [0, 0, 1, 1], [], []>} : vector<8x32xbf16>, vector<32x8xbf16>, vector<8x8xf32> -> vector<8x8xf32>
    %c3_238 = arith.constant 3 : index
    %c0_239 = arith.constant 0 : index
    %c0_240 = arith.constant 0 : index
    %357 = vector.load %arg18[%c3_238, %c0_239, %c0_240] : memref<4x1x8xf32, #tpu.memory_space<vmem>>, vector<1x1x8xf32>
    %358 = vector.shape_cast %357 : vector<1x1x8xf32> to vector<1x8xf32>
    %359 = vector.broadcast %358 : vector<1x8xf32> to vector<8x8xf32>
    %360 = arith.addf %356, %359 : vector<8x8xf32>
    %361 = arith.truncf %346 : vector<8x8xf32> to vector<8x8xbf16>
    %362 = arith.truncf %353 : vector<8x8xf32> to vector<8x8xbf16>
    %cst_241 = arith.constant dense<0.000000e+00> : vector<8x8xf32>
    %363 = tpu.matmul %361, %362, %cst_241 {dimension_numbers = #tpu.dot_dimension_numbers<[1], [1], [0], [0], [0, 0, 1, 0], [], []>} : vector<8x8xbf16>, vector<8x8xbf16>, vector<8x8xf32> -> vector<8x8xf32>
    %cst_242 = arith.constant 0.353553385 : f32
    %364 = vector.broadcast %cst_242 : f32 to vector<8x8xf32>
    %365 = arith.mulf %363, %364 : vector<8x8xf32>
    %cst_243 = arith.constant dense<0xFF800000> : vector<8xf32>
    %366 = vector.multi_reduction <maximumf>, %365, %cst_243 [1] : vector<8x8xf32> to vector<8xf32>
    %367 = vector.shape_cast %366 : vector<8xf32> to vector<8x1xf32>
    %368 = vector.broadcast %367 : vector<8x1xf32> to vector<8x8xf32>
    %369 = arith.subf %365, %368 : vector<8x8xf32>
    %370 = math.exp %369 : vector<8x8xf32>
    %cst_244 = arith.constant dense<0.000000e+00> : vector<8xf32>
    %371 = vector.multi_reduction <add>, %370, %cst_244 [1] : vector<8x8xf32> to vector<8xf32>
    %372 = vector.shape_cast %371 : vector<8xf32> to vector<8x1xf32>
    %373 = arith.truncf %370 : vector<8x8xf32> to vector<8x8xbf16>
    %374 = arith.truncf %360 : vector<8x8xf32> to vector<8x8xbf16>
    %cst_245 = arith.constant dense<0.000000e+00> : vector<8x8xf32>
    %375 = tpu.matmul %373, %374, %cst_245 {dimension_numbers = #tpu.dot_dimension_numbers<[1], [0], [0], [1], [0, 0, 1, 1], [], []>} : vector<8x8xbf16>, vector<8x8xbf16>, vector<8x8xf32> -> vector<8x8xf32>
    %376 = tpu.reciprocal %372 {approx = true} : vector<8x1xf32> -> vector<8x1xf32>
    %377 = vector.broadcast %376 : vector<8x1xf32> to vector<8x8xf32>
    %378 = arith.mulf %375, %377 : vector<8x8xf32>
    %379 = arith.truncf %378 : vector<8x8xf32> to vector<8x8xbf16>
    %c3_246 = arith.constant 3 : index
    %c0_247 = arith.constant 0 : index
    %c0_248 = arith.constant 0 : index
    %380 = vector.load %arg19[%c3_246, %c0_247, %c0_248] : memref<4x8x32xbf16, #tpu.memory_space<vmem>>, vector<1x8x32xbf16>
    %381 = vector.shape_cast %380 : vector<1x8x32xbf16> to vector<8x32xbf16>
    %cst_249 = arith.constant dense<0.000000e+00> : vector<8x32xf32>
    %382 = tpu.matmul %379, %381, %cst_249 {dimension_numbers = #tpu.dot_dimension_numbers<[1], [0], [0], [1], [0, 0, 1, 1], [], []>} : vector<8x8xbf16>, vector<8x32xbf16>, vector<8x32xf32> -> vector<8x32xf32>
    %383 = arith.addf %339, %382 : vector<8x32xf32>
    %c0_250 = arith.constant 0 : index
    %c0_251 = arith.constant 0 : index
    %384 = vector.load %arg20[%c0_250, %c0_251] : memref<1x32xf32, #tpu.memory_space<vmem>>, vector<1x32xf32>
    %385 = vector.broadcast %384 : vector<1x32xf32> to vector<8x32xf32>
    %386 = arith.addf %383, %385 : vector<8x32xf32>
    %387 = arith.addf %386, %206 : vector<8x32xf32>
    %c0_252 = arith.constant 0 : index
    %c0_253 = arith.constant 0 : index
    %388 = vector.load %arg21[%c0_252, %c0_253] : memref<1x32xf32, #tpu.memory_space<vmem>>, vector<1x32xf32>
    %c0_254 = arith.constant 0 : index
    %c0_255 = arith.constant 0 : index
    %389 = vector.load %arg22[%c0_254, %c0_255] : memref<1x32xf32, #tpu.memory_space<vmem>>, vector<1x32xf32>
    %cst_256 = arith.constant dense<0.000000e+00> : vector<8xf32>
    %390 = vector.multi_reduction <add>, %387, %cst_256 [1] : vector<8x32xf32> to vector<8xf32>
    %391 = vector.shape_cast %390 : vector<8xf32> to vector<8x1xf32>
    %cst_257 = arith.constant 3.200000e+01 : f32
    %392 = vector.broadcast %cst_257 : f32 to vector<8x1xf32>
    %393 = arith.divf %391, %392 : vector<8x1xf32>
    %394 = vector.broadcast %393 : vector<8x1xf32> to vector<8x32xf32>
    %395 = arith.subf %387, %394 : vector<8x32xf32>
    %396 = arith.mulf %395, %395 : vector<8x32xf32>
    %cst_258 = arith.constant dense<0.000000e+00> : vector<8xf32>
    %397 = vector.multi_reduction <add>, %396, %cst_258 [1] : vector<8x32xf32> to vector<8xf32>
    %398 = vector.shape_cast %397 : vector<8xf32> to vector<8x1xf32>
    %cst_259 = arith.constant 3.200000e+01 : f32
    %399 = vector.broadcast %cst_259 : f32 to vector<8x1xf32>
    %400 = arith.divf %398, %399 : vector<8x1xf32>
    %401 = vector.broadcast %393 : vector<8x1xf32> to vector<8x32xf32>
    %402 = arith.subf %387, %401 : vector<8x32xf32>
    %cst_260 = arith.constant 9.99999974E-6 : f32
    %403 = vector.broadcast %cst_260 : f32 to vector<8x1xf32>
    %404 = arith.addf %400, %403 : vector<8x1xf32>
    %405 = math.rsqrt %404 : vector<8x1xf32>
    %406 = vector.broadcast %405 : vector<8x1xf32> to vector<8x32xf32>
    %407 = arith.mulf %402, %406 : vector<8x32xf32>
    %408 = vector.broadcast %388 : vector<1x32xf32> to vector<8x32xf32>
    %409 = arith.mulf %408, %407 : vector<8x32xf32>
    %410 = vector.broadcast %389 : vector<1x32xf32> to vector<8x32xf32>
    %411 = arith.addf %409, %410 : vector<8x32xf32>
    %412 = arith.truncf %411 : vector<8x32xf32> to vector<8x32xbf16>
    %c0_261 = arith.constant 0 : index
    %c0_262 = arith.constant 0 : index
    %413 = vector.load %arg23[%c0_261, %c0_262] : memref<32x64xbf16, #tpu.memory_space<vmem>>, vector<32x64xbf16>
    %cst_263 = arith.constant dense<0.000000e+00> : vector<8x64xf32>
    %414 = tpu.matmul %412, %413, %cst_263 {dimension_numbers = #tpu.dot_dimension_numbers<[1], [0], [0], [1], [0, 0, 1, 1], [], []>} : vector<8x32xbf16>, vector<32x64xbf16>, vector<8x64xf32> -> vector<8x64xf32>
    %c0_264 = arith.constant 0 : index
    %c0_265 = arith.constant 0 : index
    %415 = vector.load %arg24[%c0_264, %c0_265] : memref<1x64xf32, #tpu.memory_space<vmem>>, vector<1x64xf32>
    %416 = vector.broadcast %415 : vector<1x64xf32> to vector<8x64xf32>
    %417 = arith.addf %414, %416 : vector<8x64xf32>
    %cst_266 = arith.constant 0.000000e+00 : f32
    %418 = vector.broadcast %cst_266 : f32 to vector<8x64xf32>
    %419 = arith.maximumf %417, %418 : vector<8x64xf32>
    %420 = arith.truncf %419 : vector<8x64xf32> to vector<8x64xbf16>
    %c0_267 = arith.constant 0 : index
    %c0_268 = arith.constant 0 : index
    %421 = vector.load %arg25[%c0_267, %c0_268] : memref<64x32xbf16, #tpu.memory_space<vmem>>, vector<64x32xbf16>
    %cst_269 = arith.constant dense<0.000000e+00> : vector<8x32xf32>
    %422 = tpu.matmul %420, %421, %cst_269 {dimension_numbers = #tpu.dot_dimension_numbers<[1], [0], [0], [1], [0, 0, 1, 1], [], []>} : vector<8x64xbf16>, vector<64x32xbf16>, vector<8x32xf32> -> vector<8x32xf32>
    %c0_270 = arith.constant 0 : index
    %c0_271 = arith.constant 0 : index
    %423 = vector.load %arg26[%c0_270, %c0_271] : memref<1x32xf32, #tpu.memory_space<vmem>>, vector<1x32xf32>
    %424 = vector.broadcast %423 : vector<1x32xf32> to vector<8x32xf32>
    %425 = arith.addf %422, %424 : vector<8x32xf32>
    %426 = arith.addf %425, %411 : vector<8x32xf32>
    %c0_272 = arith.constant 0 : index
    %c0_273 = arith.constant 0 : index
    %427 = vector.load %arg27[%c0_272, %c0_273] : memref<1x32xf32, #tpu.memory_space<vmem>>, vector<1x32xf32>
    %c0_274 = arith.constant 0 : index
    %c0_275 = arith.constant 0 : index
    %428 = vector.load %arg28[%c0_274, %c0_275] : memref<1x32xf32, #tpu.memory_space<vmem>>, vector<1x32xf32>
    %cst_276 = arith.constant dense<0.000000e+00> : vector<8xf32>
    %429 = vector.multi_reduction <add>, %426, %cst_276 [1] : vector<8x32xf32> to vector<8xf32>
    %430 = vector.shape_cast %429 : vector<8xf32> to vector<8x1xf32>
    %cst_277 = arith.constant 3.200000e+01 : f32
    %431 = vector.broadcast %cst_277 : f32 to vector<8x1xf32>
    %432 = arith.divf %430, %431 : vector<8x1xf32>
    %433 = vector.broadcast %432 : vector<8x1xf32> to vector<8x32xf32>
    %434 = arith.subf %426, %433 : vector<8x32xf32>
    %435 = arith.mulf %434, %434 : vector<8x32xf32>
    %cst_278 = arith.constant dense<0.000000e+00> : vector<8xf32>
    %436 = vector.multi_reduction <add>, %435, %cst_278 [1] : vector<8x32xf32> to vector<8xf32>
    %437 = vector.shape_cast %436 : vector<8xf32> to vector<8x1xf32>
    %cst_279 = arith.constant 3.200000e+01 : f32
    %438 = vector.broadcast %cst_279 : f32 to vector<8x1xf32>
    %439 = arith.divf %437, %438 : vector<8x1xf32>
    %440 = vector.broadcast %432 : vector<8x1xf32> to vector<8x32xf32>
    %441 = arith.subf %426, %440 : vector<8x32xf32>
    %cst_280 = arith.constant 9.99999974E-6 : f32
    %442 = vector.broadcast %cst_280 : f32 to vector<8x1xf32>
    %443 = arith.addf %439, %442 : vector<8x1xf32>
    %444 = math.rsqrt %443 : vector<8x1xf32>
    %445 = vector.broadcast %444 : vector<8x1xf32> to vector<8x32xf32>
    %446 = arith.mulf %441, %445 : vector<8x32xf32>
    %447 = vector.broadcast %427 : vector<1x32xf32> to vector<8x32xf32>
    %448 = arith.mulf %447, %446 : vector<8x32xf32>
    %449 = vector.broadcast %428 : vector<1x32xf32> to vector<8x32xf32>
    %450 = arith.addf %448, %449 : vector<8x32xf32>
    %c0_281 = arith.constant 0 : index
    %c0_282 = arith.constant 0 : index
    %451 = vector.load %arg29[%c0_281, %c0_282] : memref<8x32xf32, #tpu.memory_space<vmem>>, vector<8x32xf32>
    tpu.vector_store %arg29[%c0_281, %c0_282], %450 {strides = array<i32>} : memref<8x32xf32, #tpu.memory_space<vmem>>, vector<8x32xf32>,
    return
  }
  func.func @transform_0(%arg0: i32) -> (i32, i32) {
    %c0_i32 = arith.constant 0 : i32
    %c0_i32_0 = arith.constant 0 : i32
    return %arg0, %c0_i32 : i32, i32
  }
  func.func @transform_1(%arg0: i32) -> (i32, i32) {
    %c0_i32 = arith.constant 0 : i32
    %c0_i32_0 = arith.constant 0 : i32
    return %arg0, %c0_i32 : i32, i32
  }
  func.func @transform_2(%arg0: i32) -> (i32, i32, i32) {
    %c0_i32 = arith.constant 0 : i32
    %c0_i32_0 = arith.constant 0 : i32
    %c0_i32_1 = arith.constant 0 : i32
    %c0_i32_2 = arith.constant 0 : i32
    return %c0_i32, %c0_i32_0, %c0_i32_1 : i32, i32, i32
  }
  func.func @transform_3(%arg0: i32) -> (i32, i32, i32) {
    %c0_i32 = arith.constant 0 : i32
    %c0_i32_0 = arith.constant 0 : i32
    %c0_i32_1 = arith.constant 0 : i32
    %c0_i32_2 = arith.constant 0 : i32
    return %c0_i32, %c0_i32_0, %c0_i32_1 : i32, i32, i32
  }
  func.func @transform_4(%arg0: i32) -> (i32, i32, i32) {
    %c0_i32 = arith.constant 0 : i32
    %c0_i32_0 = arith.constant 0 : i32
    %c0_i32_1 = arith.constant 0 : i32
    %c0_i32_2 = arith.constant 0 : i32
    return %c0_i32, %c0_i32_0, %c0_i32_1 : i32, i32, i32
  }
  func.func @transform_5(%arg0: i32) -> (i32, i32, i32) {
    %c0_i32 = arith.constant 0 : i32
    %c0_i32_0 = arith.constant 0 : i32
    %c0_i32_1 = arith.constant 0 : i32
    %c0_i32_2 = arith.constant 0 : i32
    return %c0_i32, %c0_i32_0, %c0_i32_1 : i32, i32, i32
  }
  func.func @transform_6(%arg0: i32) -> (i32, i32, i32) {
    %c0_i32 = arith.constant 0 : i32
    %c0_i32_0 = arith.constant 0 : i32
    %c0_i32_1 = arith.constant 0 : i32
    %c0_i32_2 = arith.constant 0 : i32
    return %c0_i32, %c0_i32_0, %c0_i32_1 : i32, i32, i32
  }
  func.func @transform_7(%arg0: i32) -> (i32, i32, i32) {
    %c0_i32 = arith.constant 0 : i32
    %c0_i32_0 = arith.constant 0 : i32
    %c0_i32_1 = arith.constant 0 : i32
    %c0_i32_2 = arith.constant 0 : i32
    return %c0_i32, %c0_i32_0, %c0_i32_1 : i32, i32, i32
  }
  func.func @transform_8(%arg0: i32) -> (i32, i32, i32) {
    %c0_i32 = arith.constant 0 : i32
    %c0_i32_0 = arith.constant 0 : i32
    %c0_i32_1 = arith.constant 0 : i32
    %c0_i32_2 = arith.constant 0 : i32
    return %c0_i32, %c0_i32_0, %c0_i32_1 : i32, i32, i32
  }
  func.func @transform_9(%arg0: i32) -> (i32, i32) {
    %c0_i32 = arith.constant 0 : i32
    %c0_i32_0 = arith.constant 0 : i32
    %c0_i32_1 = arith.constant 0 : i32
    return %c0_i32, %c0_i32_0 : i32, i32
  }
  func.func @transform_10(%arg0: i32) -> (i32, i32) {
    %c0_i32 = arith.constant 0 : i32
    %c0_i32_0 = arith.constant 0 : i32
    %c0_i32_1 = arith.constant 0 : i32
    return %c0_i32, %c0_i32_0 : i32, i32
  }
  func.func @transform_11(%arg0: i32) -> (i32, i32) {
    %c0_i32 = arith.constant 0 : i32
    %c0_i32_0 = arith.constant 0 : i32
    %c0_i32_1 = arith.constant 0 : i32
    return %c0_i32, %c0_i32_0 : i32, i32
  }
  func.func @transform_12(%arg0: i32) -> (i32, i32, i32) {
    %c0_i32 = arith.constant 0 : i32
    %c0_i32_0 = arith.constant 0 : i32
    %c0_i32_1 = arith.constant 0 : i32
    %c0_i32_2 = arith.constant 0 : i32
    return %c0_i32, %c0_i32_0, %c0_i32_1 : i32, i32, i32
  }
  func.func @transform_13(%arg0: i32) -> (i32, i32, i32) {
    %c0_i32 = arith.constant 0 : i32
    %c0_i32_0 = arith.constant 0 : i32
    %c0_i32_1 = arith.constant 0 : i32
    %c0_i32_2 = arith.constant 0 : i32
    return %c0_i32, %c0_i32_0, %c0_i32_1 : i32, i32, i32
  }
  func.func @transform_14(%arg0: i32) -> (i32, i32, i32) {
    %c0_i32 = arith.constant 0 : i32
    %c0_i32_0 = arith.constant 0 : i32
    %c0_i32_1 = arith.constant 0 : i32
    %c0_i32_2 = arith.constant 0 : i32
    return %c0_i32, %c0_i32_0, %c0_i32_1 : i32, i32, i32
  }
  func.func @transform_15(%arg0: i32) -> (i32, i32, i32) {
    %c0_i32 = arith.constant 0 : i32
    %c0_i32_0 = arith.constant 0 : i32
    %c0_i32_1 = arith.constant 0 : i32
    %c0_i32_2 = arith.constant 0 : i32
    return %c0_i32, %c0_i32_0, %c0_i32_1 : i32, i32, i32
  }
  func.func @transform_16(%arg0: i32) -> (i32, i32, i32) {
    %c0_i32 = arith.constant 0 : i32
    %c0_i32_0 = arith.constant 0 : i32
    %c0_i32_1 = arith.constant 0 : i32
    %c0_i32_2 = arith.constant 0 : i32
    return %c0_i32, %c0_i32_0, %c0_i32_1 : i32, i32, i32
  }
  func.func @transform_17(%arg0: i32) -> (i32, i32, i32) {
    %c0_i32 = arith.constant 0 : i32
    %c0_i32_0 = arith.constant 0 : i32
    %c0_i32_1 = arith.constant 0 : i32
    %c0_i32_2 = arith.constant 0 : i32
    return %c0_i32, %c0_i32_0, %c0_i32_1 : i32, i32, i32
  }
  func.func @transform_18(%arg0: i32) -> (i32, i32, i32) {
    %c0_i32 = arith.constant 0 : i32
    %c0_i32_0 = arith.constant 0 : i32
    %c0_i32_1 = arith.constant 0 : i32
    %c0_i32_2 = arith.constant 0 : i32
    return %c0_i32, %c0_i32_0, %c0_i32_1 : i32, i32, i32
  }
  func.func @transform_19(%arg0: i32) -> (i32, i32) {
    %c0_i32 = arith.constant 0 : i32
    %c0_i32_0 = arith.constant 0 : i32
    %c0_i32_1 = arith.constant 0 : i32
    return %c0_i32, %c0_i32_0 : i32, i32
  }
  func.func @transform_20(%arg0: i32) -> (i32, i32) {
    %c0_i32 = arith.constant 0 : i32
    %c0_i32_0 = arith.constant 0 : i32
    %c0_i32_1 = arith.constant 0 : i32
    return %c0_i32, %c0_i32_0 : i32, i32
  }
  func.func @transform_21(%arg0: i32) -> (i32, i32) {
    %c0_i32 = arith.constant 0 : i32
    %c0_i32_0 = arith.constant 0 : i32
    %c0_i32_1 = arith.constant 0 : i32
    return %c0_i32, %c0_i32_0 : i32, i32
  }
  func.func @transform_22(%arg0: i32) -> (i32, i32) {
    %c0_i32 = arith.constant 0 : i32
    %c0_i32_0 = arith.constant 0 : i32
    %c0_i32_1 = arith.constant 0 : i32
    return %c0_i32, %c0_i32_0 : i32, i32
  }
  func.func @transform_23(%arg0: i32) -> (i32, i32) {
    %c0_i32 = arith.constant 0 : i32
    %c0_i32_0 = arith.constant 0 : i32
    %c0_i32_1 = arith.constant 0 : i32
    return %c0_i32, %c0_i32_0 : i32, i32
  }
  func.func @transform_24(%arg0: i32) -> (i32, i32) {
    %c0_i32 = arith.constant 0 : i32
    %c0_i32_0 = arith.constant 0 : i32
    %c0_i32_1 = arith.constant 0 : i32
    return %c0_i32, %c0_i32_0 : i32, i32
  }
  func.func @transform_25(%arg0: i32) -> (i32, i32) {
    %c0_i32 = arith.constant 0 : i32
    %c0_i32_0 = arith.constant 0 : i32
    %c0_i32_1 = arith.constant 0 : i32
    return %c0_i32, %c0_i32_0 : i32, i32
  }
  func.func @transform_26(%arg0: i32) -> (i32, i32) {
    %c0_i32 = arith.constant 0 : i32
    %c0_i32_0 = arith.constant 0 : i32
    %c0_i32_1 = arith.constant 0 : i32
    return %c0_i32, %c0_i32_0 : i32, i32
  }
  func.func @transform_27(%arg0: i32) -> (i32, i32) {
    %c0_i32 = arith.constant 0 : i32
    %c0_i32_0 = arith.constant 0 : i32
    %c0_i32_1 = arith.constant 0 : i32
    return %c0_i32, %c0_i32_0 : i32, i32
  }
  func.func @transform_28(%arg0: i32) -> (i32, i32) {
    %c0_i32 = arith.constant 0 : i32
    %c0_i32_0 = arith.constant 0 : i32
    return %arg0, %c0_i32 : i32, i32
  }
}

</mosaic_0001>

<bundles_post_ra>
// kernel: _lambda_.9
= control target key start
LH: loop header
LB: loop body
LE: loop exit
PB: predicated region body
PF: predicated region fallthrough
CT: control target
= control target key end

     0   :  { %s448_s12 = smov 0   ;;  %s450_s13 = smov 0   ;;  %s487_s0 = inlined_call_operand.vmem [shape: f32[16,32], index: 0, kind: input, shape index: {}]   ;;  %s488_s1 = inlined_call_operand.vmem [shape: bf16[32,128], index: 1, kind: input, shape index: {}]   ;;  %s489_s2 = inlined_call_operand.vmem [shape: f32[1,128], index: 2, kind: input, shape index: {}]   ;;  %s490_s3 = inlined_call_operand.vmem [shape: f32[16,128], index: 3, kind: output, shape index: {}]  }
   0x1   :  { %s452_s14 = smov 0  }
   0x2 LB: > { %s25_s15 = sadd.s32 1, %s422_s13  ;;  %p363_p0 = scmp.ge.s32.totalorder %s426_s14, 1  ;;  %s426_s14 = sphi %s452_s14, %s13_s14   ;;  %s422_s13 = sphi %s450_s13, %s492_s13   ;;  %s418_s12 = sphi %s448_s12, %s491_s12  }
   0x3   : > { %p27_p1 = scmp.ge.s32.totalorder %s25_s15, 2  ;;  %p167_p2 = scmp.lt.s32.totalorder %s426_s14, 3 }
   0x5   : > { %s494_s15 = smov (%p27_p1, %s25_s15), 0  ;;  %p168_p3 = pnand %p363_p0, %p167_p2 }
   0x6   : > { %p199_p4 = scmp.lt.s32.totalorder (!%p168_p3), %s418_s12, 1 }
   0x7   : > { %171 = sbr.rel (%p168_p3) target bundleno = 154 (0x9a), region = 32 }
   0xc   : > { %v378_v0 = vld [vmem:[%s488_s1 + $0x8] sm:$0xff]  ;;  %v377_v1 = vld [vmem:[%s488_s1] sm:$0xff]  ;;  %s496_s12 = smov (!%p199_p4, %s418_s12), 1  ;;  %vm240_vm0 = vcmask 261120  }
   0xd   : > { %250 = vmatpush.bf16.msra.mxu0 %v378_v0  ;;  %s364_s20 = sshll.u32 %s496_s12, 3  ;;  %v403_v4 = vld [vmem:[%s489_s2] ss:$0 sm:$0xff] }
   0xe   : > { %s202_s23 = scalar_lea.vmem %s487_s0, %s364_s20  ;;  %s216_s28 = scalar_lea.vmem %s490_s3, %s364_s20 }
   0xf   : > { %v218_v2 = vld [vmem:[%s202_s23] sm:$0xff] }
  0x10   : > { %v219_v3 = vpack.c.bf16 %v218_v2, %v218_v2 }
  0x11   : > { %251 = vmatpush.bf16.msra.mxu0 %v377_v1 }
  0x14   : > { %374 = vmatmul.msk.bf16.vlgmr.msra.gmra.mxu0 %vm240_vm0, %v219_v3 }
  0x91   : > { %v253_v5 = vpop.f32.mrf.mxu0 }
  0x92   : > { %v254_v6 = vadd.f32 %v403_v4, %v253_v5 }
  0x94   : > { %257 = vst [vmem:[%s216_s28] sm:$0xff] %v254_v6 }
  0x99   : > { %v255_v7 = vpop.f32.mrf.mxu0 }
  0x9a PF: > { %s13_s14 = sadd.s32 1, %s426_s14   ;;  %s491_s12 = smov %s422_s13 }
  0x9b   : > { %p10_p5 = scmp.ge.s32.totalorder %s13_s14, 4   ;;  %s492_s13 = smov %s494_s15 }
  0x9d   :  { %12 = sbr.rel (!%p10_p5) target bundleno = 2 (0x2), region = 68 }

// kernel: _lambda_.5
= control target key start
LH: loop header
LB: loop body
LE: loop exit
PB: predicated region body
PF: predicated region fallthrough
CT: control target
= control target key end

     0   :  { %s1878_s24 = smov 0   ;;  %s2133_s0 = inlined_call_operand.vmem [shape: f32[16,32], index: 0, kind: input, shape index: {}]   ;;  %s2134_s1 = inlined_call_operand.vmem [shape: bf16[4,32,8], index: 1, kind: input, shape index: {}]   ;;  %s2135_s2 = inlined_call_operand.vmem [shape: f32[4,1,8], index: 2, kind: input, shape index: {}]   ;;  %s2136_s3 = inlined_call_operand.vmem [shape: bf16[4,32,8], index: 3, kind: input, shape index: {}]   ;;  %s2137_s4 = inlined_call_operand.vmem [shape: f32[4,1,8], index: 4, kind: input, shape index: {}]   ;;  %s2138_s5 = inlined_call_operand.vmem [shape: bf16[4,32,8], index: 5, kind: input, shape index: {}]   ;;  %s2139_s6 = inlined_call_operand.vmem [shape: f32[4,1,8], index: 6, kind: input, shape index: {}]   ;;  %s2140_s7 = inlined_call_operand.vmem [shape: bf16[4,8,32], index: 7, kind: input, shape index: {}]   ;;  %s2141_s8 = inlined_call_operand.vmem [shape: f32[1,32], index: 8, kind: input, shape index: {}]   ;;  %s2142_s9 = inlined_call_operand.vmem [shape: f32[1,32], index: 9, kind: input, shape index: {}]   ;;  %s2143_s10 = inlined_call_operand.vmem [shape: f32[1,32], index: 10, kind: input, shape index: {}]   ;;  %s2144_s11 = inlined_call_operand.vmem [shape: bf16[32,64], index: 11, kind: input, shape index: {}]   ;;  %s2145_s12 = inlined_call_operand.vmem [shape: f32[1,64], index: 12, kind: input, shape index: {}]   ;;  %s2146_s13 = inlined_call_operand.vmem [shape: bf16[64,32], index: 13, kind: input, shape index: {}]   ;;  %s2147_s14 = inlined_call_operand.vmem [shape: f32[1,32], index: 14, kind: input, shape index: {}]   ;;  %s2148_s15 = inlined_call_operand.vmem [shape: f32[1,32], index: 15, kind: input, shape index: {}]   ;;  %s2149_s16 = inlined_call_operand.vmem [shape: f32[1,32], index: 16, kind: input, shape index: {}]   ;;  %s2150_s17 = inlined_call_operand.vmem [shape: f32[16,32], index: 17, kind: output, shape index: {}]  }
   0x1   :  { %2152 = sst [smem:[#allocation2_spill]] %s2133_s0 }
   0x2   :  { %2153 = sst [smem:[#allocation3_spill]] %s2134_s1 }
   0x3 LB: > { %s1496_s25 = sadd.s32 4294967295, %s1785_s24   ;;  %p1500_p0 = scmp.ge.s32.totalorder %s1785_s24, 1  ;;  %s1785_s24 = sphi %s1878_s24, %s27_s24  }
   0x4   : > { %p486_p1 = scmp.lt.s32.totalorder %s1785_s24, 3 }
   0x6   : > { %p487_p2 = pnand %p1500_p0, %p486_p1 }
   0x7   : > { %s2154_s28 = sld [smem:[#allocation3_spill]] (!%p487_p2)  ;;  %p536_p3 = scmp.lt.s32.totalorder (!%p487_p2), %s1496_s25, 1 }
   0x8   : > { %490 = sbr.rel (%p487_p2) target bundleno = 2595 (0xa23), region = 88  ;;  %s2155_s23 = sld [smem:[#allocation2_spill]] (!%p487_p2) }
   0xd   : > { %v1700_v0 = vld [vmem:[%s2154_s28 + $0x8] sm:$0xff]  ;;  %v1699_v2 = vld [vmem:[%s2154_s28] sm:$0xff]  ;;  %s2157_s25 = smov (!%p536_p3, %s1496_s25), 1  ;;  %vm567_vm0 = vcmask 261120   ;;  %v1708_v8 = vld [vmem:[%s2136_s3 + $0x18] sm:$0xff]  ;;  %vm652_vm1 = vcmask 64512  }
   0xe   : > { %v1702_v1 = vld [vmem:[%s2136_s3 + $0x8] sm:$0xff]  ;;  %577 = vmatpush.bf16.msra.mxu0 %v1700_v0  ;;  %v1701_v3 = vld [vmem:[%s2136_s3] sm:$0xff]  ;;  %s1501_s20 = sshll.u32 %s2157_s25, 3  ;;  %v1707_v9 = vld [vmem:[%s2136_s3 + $0x10] sm:$0xff]  ;;  %vm687_vm2 = vcmask 1043456   ;;  %vm1392_vm7 = vcmask 523264  }
   0xf   : > { %610 = vmatpush.bf16.msra.mxu1 %v1702_v1  ;;  %s539_s26 = scalar_lea.vmem %s2155_s23, %s1501_s20  ;;  %v1704_v6 = vld [vmem:[%s2138_s5 + $0x8] sm:$0xff]  ;;  %v1703_v7 = vld [vmem:[%s2138_s5] sm:$0xff]  ;;  %v1706_v21 = vld [vmem:[%s2154_s28 + $0x18] sm:$0xff]  ;;  %s543_s29 = scalar_lea.vmem %s2150_s17, %s1501_s20 }
  0x10   : > { %v1906_v4 = vld [vmem:[%s539_s26] sm:$0xff]  ;;  %643 = vmatpush.bf16.msra.mxu2 %v1704_v6  ;;  %v1705_v22 = vld [vmem:[%s2154_s28 + $0x10] sm:$0xff]  ;;  %v1710_v41 = vld [vmem:[%s2138_s5 + $0x18] sm:$0xff] }
  0x11   : > { %v1910_v5 = vpack.c.bf16 %v1906_v4, %v1906_v4  ;;  %v1739_v10 = vld [vmem:[%s2137_s4] ss:$0 sm:$0xff]  ;;  %v1741_v32 = vld [vmem:[%s2137_s4 + $0x1] ss:$0 sm:$0xff]  ;;  %v1709_v43 = vld [vmem:[%s2138_s5 + $0x10] sm:$0xff] }
  0x12   : > { %578 = vmatpush.bf16.msra.mxu0 %v1699_v2  ;;  %v1738_v13 = vld [vmem:[%s2135_s2] ss:$0 sm:$0xff]  ;;  %v1742_v49 = vld [vmem:[%s2135_s2 + $0x1] ss:$0 sm:$0xff] }
  0x13   : > { %611 = vmatpush.bf16.msra.mxu1 %v1701_v3  ;;  %v1740_v29 = vld [vmem:[%s2139_s6] ss:$0 sm:$0xff]  ;;  %v1743_v55 = vld [vmem:[%s2139_s6 + $0x1] ss:$0 sm:$0xff] }
  0x14   : > { %644 = vmatpush.bf16.msra.mxu2 %v1703_v7  ;;  %v707_v52 = vld [vmem:[%s2140_s7] sm:$0xf] }
  0x15   : > { %1511 = vmatmul.msk.bf16.vlgmr.msra.gmra.mxu0 %vm567_vm0, %v1910_v5  ;;  %v893_v53 = vsel %vm687_vm2, %v707_v52, 0  ;;  %v1720_v52 = vld [vmem:[%s2136_s3 + $0x38] sm:$0xff] }
  0x16   : > { %1520 = vmatmul.msk.bf16.vlgmr.msra.gmra.mxu1 %vm567_vm0, %v1910_v5 }
  0x17   : > { %1529 = vmatmul.msk.bf16.vlgmr.msra.gmra.mxu2 %vm567_vm0, %v1910_v5  ;;  %736 = vmatpush.bf16.msrb.mxu1 %v1706_v21 }
  0x18   : > { %771 = vmatpush.bf16.msrb.mxu2 %v1708_v8  ;;  %v1714_v8 = vld [vmem:[%s2136_s3 + $0x28] sm:$0xff] }
  0x1b   : > { %737 = vmatpush.bf16.msrb.mxu1 %v1705_v22 }
  0x1c   : > { %772 = vmatpush.bf16.msrb.mxu2 %v1707_v9  ;;  %v1713_v9 = vld [vmem:[%s2136_s3 + $0x20] sm:$0xff] }
  0x26   : > { %1545 = vmatmul.msk.bf16.vlgmr.msrb.gmra.mxu1 %vm567_vm0, %v1910_v5 }
  0x27   : > { %1559 = vmatmul.msk.bf16.vlgmr.msrb.gmra.mxu2 %vm567_vm0, %v1910_v5 }
  0x92   : > { %v580_v11 = vpop.f32.mrf.mxu0 }
  0x93   : > { %v613_v12 = vpop.f32.mrf.mxu1  ;;  %v581_v16 = vadd.f32 %v1738_v13, %v580_v11  ;;  %v1711_v11 = vld [vmem:[%s2154_s28 + $0x20] sm:$0xff] }
  0x94   : > { %v614_v14 = vadd.f32 %v1739_v10, %v613_v12  ;;  %v1712_v10 = vld [vmem:[%s2154_s28 + $0x28] sm:$0xff] }
  0x95   : > { %v650_v20 = vpack.c.bf16 %v581_v16, %v581_v16 }
  0x96   : > { %v651_v15 = vpack.c.bf16 %v614_v14, %v614_v14 }
  0x98   : > { %v657_v17 = vsel %vm652_vm1, %v651_v15, 0 }
  0x99   : > { %666 = vmatpush.bf16.xpose.msra.mxu3 %v657_v17 }
  0x9a   : > { %v582_v18 = vpop.f32.mrf.mxu0  ;;  %v646_v23 = vpop.f32.mrf.mxu2 }
  0x9b   : > { %v615_v19 = vpop.f32.mrf.mxu1  ;;  %v647_v30 = vadd.f32 %v1740_v29, %v646_v23 }
  0x9d   : > { %v683_v31 = vpack.c.bf16 %v647_v30, %v647_v30 }
  0x9f   : > { %v689_v34 = vsel %vm687_vm2, %v683_v31, 0  ;;  %v1744_v31 = vld [vmem:[%s2137_s4 + $0x2] ss:$0 sm:$0xff] }
  0xa0   : > { %1530 = vmatmul.msk.bf16.vlgmr.msra.gmra.mxu3 %vm652_vm1, %v650_v20  ;;  %698 = vmatpush.bf16.msrb.mxu0 %v689_v34  ;;  %v1576_v20 = vld [vmem:[%s2140_s7 + $0x4] sm:$0xf]  ;;  %v1745_v34 = vld [vmem:[%s2135_s2 + $0x2] ss:$0 sm:$0xff] }
  0xa1   : > { %806 = vmatpush.bf16.msrb.mxu3 %v1710_v41  ;;  %v874_v21 = vsel %vm687_vm2, %v1576_v20, 0 }
  0xa2   : > { %v648_v24 = vpop.f32.mrf.mxu2  ;;  %883 = vmatpush.bf16.msra.mxu2 %v874_v21 }
  0xa3   : > { %v739_v39 = vpop.f32.mrf.mxu1 }
  0xa4   : > { %v740_v50 = vadd.f32 %v1742_v49, %v739_v39 }
  0xa5   : > { %807 = vmatpush.bf16.msrb.mxu3 %v1709_v43 }
  0xa6   : > { %v813_v51 = vpack.c.bf16 %v740_v50, %v740_v50 }
  0xa9   : > { %902 = vmatpush.bf16.msra.mxu3 %v893_v53 }
  0xaa   : > { %v774_v33 = vpop.f32.mrf.mxu2 }
  0xab   : > { %v775_v35 = vadd.f32 %v1741_v32, %v774_v33  ;;  %v741_v40 = vpop.f32.mrf.mxu1 }
  0xac   : > { %v1715_v40 = vld [vmem:[%s2138_s5 + $0x20] sm:$0xff] }
  0xad   : > { %v814_v36 = vpack.c.bf16 %v775_v35, %v775_v35 }
  0xaf   : > { %v819_v37 = vsel %vm652_vm1, %v814_v36, 0 }
  0xb0   : > { %828 = vmatpush.bf16.xpose.msra.mxu0 %v819_v37  ;;  %1573 = vmatmul.msk.bf16.vlgmr.msrb.gmra.mxu3 %vm567_vm0, %v1910_v5 }
  0xb2   : > { %v776_v38 = vpop.f32.mrf.mxu2 }
 0x123   : > { %v668_v25 = vpop.f32.mrf.mxu3 }
 0x124   : > { %v672_v26 = vmul.f32 0.35355338, %v668_v25  ;;  %v1716_v25 = vld [vmem:[%s2138_s5 + $0x28] sm:$0xff] }
 0x125   : > { %1006 = vmatpush.bf16.msrb.mxu2 %v1716_v25 }
 0x126   : > { %v673_v27 = vsel %vm652_vm1, %v672_v26, -inf }
 0x127   : > { %674 = vmax.xlane.f32.xlu0 %v673_v27 }
 0x129   : > { %1007 = vmatpush.bf16.msrb.mxu2 %v1715_v40 }
 0x12b   : > { %v670_v28 = vpop.f32.mrf.mxu3 }
 0x133   : > { %v809_v56 = vpop.f32.mrf.mxu3 }
 0x134   : > { %v810_v59 = vadd.f32 %v1743_v55, %v809_v56  ;;  %v1718_v55 = vld [vmem:[%s2154_s28 + $0x38] sm:$0xff]  ;;  %v1717_v56 = vld [vmem:[%s2154_s28 + $0x30] sm:$0xff] }
 0x136   : > { %v845_v61 = vpack.c.bf16 %v810_v59, %v810_v59 }
 0x138   : > { %v850_v63 = vsel %vm687_vm2, %v845_v61, 0 }
 0x139   : > { %859 = vmatpush.bf16.msra.mxu1 %v850_v63  ;;  %v1623_v63 = vld [vmem:[%s2140_s7 + $0x8] sm:$0xf] }
 0x13b   : > { %v811_v0 = vpop.f32.mrf.mxu3 }
 0x13c   : > { %v1074_v0 = vsel %vm687_vm2, %v1623_v63, 0 }
 0x13d   : > { %971 = vmatpush.bf16.msrb.mxu1 %v1714_v8 }
 0x141   : > { %972 = vmatpush.bf16.msrb.mxu1 %v1713_v9 }
 0x19a   : > { %v675_v42 = vpop.xlane.xlu0 %674 }
 0x19b   : > { %v676_v44 = vsub.f32 %v672_v26, %v675_v42 }
 0x19d   : > { %v677_v45 = vmul.f32 1.442695, %v676_v44 }
 0x19f   : > { %1757 = vpow2.f32 %v677_v45 }
 0x1a5   : > { %v1758_v46 = vpop.eup %1757 }
 0x1a6   : > { %v679_v47 = vsel %vm652_vm1, %v1758_v46, 0.0  ;;  %v682_v48 = vpack.c.bf16 %v1758_v46, %v1758_v46 }
 0x1a7   : > { %680 = vadd.xlane.f32.xlu1 %v679_v47  ;;  %v1746_v47 = vld [vmem:[%s2139_s6 + $0x2] ss:$0 sm:$0xff] }
 0x1a8   : > { %1531 = vmatmul.msk.bf16.vlgmr.msrb.gmra.mxu0 %vm652_vm1, %v682_v48 }
 0x1a9   : > { %936 = vmatpush.bf16.msrb.mxu0 %v1712_v10 }
 0x1ad   : > { %937 = vmatpush.bf16.msrb.mxu0 %v1711_v11  ;;  %v1722_v11 = vld [vmem:[%s2138_s5 + $0x38] sm:$0xff] }
 0x1b8   : > { %1574 = vmatmul.msk.bf16.vlgmr.msra.gmra.mxu0 %vm652_vm1, %v813_v51 }
 0x1c8   : > { %1592 = vmatmul.msk.bf16.vlgmr.msrb.gmra.mxu0 %vm567_vm0, %v1910_v5 }
 0x21a   : > { %v681_v54 = vpop.xlane.xlu1 %680 }
 0x21b   : > { %1759 = vrcp.f32 %v681_v54  ;;  %v1719_v54 = vld [vmem:[%s2136_s3 + $0x30] sm:$0xff] }
 0x221   : > { %v1760_v57 = vpop.eup %1759 }
 0x225   : > { %v700_v58 = vpop.f32.mrf.mxu0 }
 0x226   : > { %v705_v60 = vmul.f32 %v1760_v57, %v700_v58 }
 0x228   : > { %v706_v62 = vpack.c.bf16 %v705_v60, %v705_v60 }
 0x22a   : > { %1578 = vmatmul.msk.bf16.vlgmr.msra.gmra.mxu3 %vm652_vm1, %v706_v62 }
 0x22d   : > { %v702_v1 = vpop.f32.mrf.mxu0 }
 0x235   : > { %v830_v2 = vpop.f32.mrf.mxu0 }
 0x236   : > { %v834_v3 = vmul.f32 0.35355338, %v830_v2  ;;  %v1747_v2 = vld [vmem:[%s2137_s4 + $0x3] ss:$0 sm:$0xff] }
 0x238   : > { %v835_v6 = vsel %vm652_vm1, %v834_v3, -inf }
 0x239   : > { %836 = vmax.xlane.f32.xlu0 %v835_v6 }
 0x23d   : > { %v832_v7 = vpop.f32.mrf.mxu0 }
 0x245   : > { %v939_v22 = vpop.f32.mrf.mxu0 }
 0x246   : > { %v940_v37 = vadd.f32 %v1745_v34, %v939_v22  ;;  %v1721_v22 = vld [vmem:[%s2138_s5 + $0x30] sm:$0xff] }
 0x248   : > { %v1013_v39 = vpack.c.bf16 %v940_v37, %v940_v37 }
 0x24d   : > { %v941_v24 = vpop.f32.mrf.mxu0 }
 0x2ac   : > { %v837_v12 = vpop.xlane.xlu0 %836 }
 0x2ad   : > { %v838_v13 = vsub.f32 %v834_v3, %v837_v12  ;;  %v1995_v14 = vpop.f32.mrf.mxu3 }
 0x2af   : > { %v839_v15 = vmul.f32 1.442695, %v838_v13 }
 0x2b1   : > { %1761 = vpow2.f32 %v839_v15 }
 0x2b5   : > { %v906_v16 = vpop.f32.mrf.mxu3 }
 0x2b7   : > { %v1762_v17 = vpop.eup %1761 }
 0x2b8   : > { %v844_v18 = vpack.c.bf16 %v1762_v17, %v1762_v17  ;;  %v841_v19 = vsel %vm652_vm1, %v1762_v17, 0.0 }
 0x2b9   : > { %842 = vadd.xlane.f32.xlu1 %v841_v19  ;;  %v1748_v19 = vld [vmem:[%s2135_s2 + $0x3] ss:$0 sm:$0xff] }
 0x2ba   : > { %1575 = vmatmul.msk.bf16.vlgmr.msra.gmra.mxu1 %vm652_vm1, %v844_v18 }
 0x2bb   : > { %1083 = vmatpush.bf16.msra.mxu1 %v1074_v0 }
 0x2ca   : > { %1606 = vmatmul.msk.bf16.vlgmr.msrb.gmra.mxu1 %vm567_vm0, %v1910_v5 }
 0x32c   : > { %v843_v23 = vpop.xlane.xlu1 %842 }
 0x32d   : > { %1763 = vrcp.f32 %v843_v23 }
 0x333   : > { %v1764_v26 = vpop.eup %1763 }
 0x337   : > { %v861_v27 = vpop.f32.mrf.mxu1 }
 0x338   : > { %v866_v28 = vmul.f32 %v1764_v26, %v861_v27 }
 0x33a   : > { %v867_v29 = vpack.c.bf16 %v866_v28, %v866_v28 }
 0x33c   : > { %1577 = vmatmul.msk.bf16.vlgmr.msra.gmra.mxu2 %vm652_vm1, %v867_v29 }
 0x33d   : > { %1118 = vmatpush.bf16.msra.mxu2 %v1718_v55 }
 0x33f   : > { %v863_v30 = vpop.f32.mrf.mxu1 }
 0x341   : > { %1119 = vmatpush.bf16.msra.mxu2 %v1717_v56  ;;  %v1787_v56 = vmov 32.0  }
 0x347   : > { %v974_v32 = vpop.f32.mrf.mxu1 }
 0x348   : > { %v975_v33 = vadd.f32 %v1744_v31, %v974_v32  ;;  %v1749_v31 = vld [vmem:[%s2139_s6 + $0x3] ss:$0 sm:$0xff] }
 0x34a   : > { %v1014_v35 = vpack.c.bf16 %v975_v33, %v975_v33 }
 0x34c   : > { %v1019_v36 = vsel %vm652_vm1, %v1014_v35, 0  ;;  %1620 = vmatmul.msk.bf16.vlgmr.msrb.gmra.mxu2 %vm567_vm0, %v1910_v5 }
 0x34d   : > { %1028 = vmatpush.bf16.xpose.msrb.mxu3 %v1019_v36 }
 0x34f   : > { %v976_v38 = vpop.f32.mrf.mxu1 }
 0x354   : > { %1621 = vmatmul.msk.bf16.vlgmr.msrb.gmra.mxu3 %vm652_vm1, %v1013_v39 }
 0x355   : > { %1153 = vmatpush.bf16.msra.mxu3 %v1720_v52 }
 0x359   : > { %1154 = vmatpush.bf16.msra.mxu3 %v1719_v54 }
 0x35c   : > { %1638 = vmatmul.msk.bf16.vlgmr.msra.gmra.mxu2 %vm567_vm0, %v1910_v5 }
 0x364   : > { %1652 = vmatmul.msk.bf16.vlgmr.msra.gmra.mxu3 %vm567_vm0, %v1910_v5 }
 0x3bf   : > { %v885_v41 = vpop.f32.mrf.mxu2 }
 0x3c0   : > { %v905_v23 = vadd.f32 %v1995_v14, %v885_v41  ;;  %v1669_v41 = vld [vmem:[%s2140_s7 + $0xc] sm:$0xf] }
 0x3c7   : > { %v887_v42 = vpop.f32.mrf.mxu2 }
 0x3c8   : > { %v1256_v42 = vsel %vm687_vm2, %v1669_v41, 0 }
 0x3c9   : > { %1265 = vmatpush.bf16.msrb.mxu3 %v1256_v42 }
 0x3cf   : > { %v1009_v48 = vpop.f32.mrf.mxu2 }
 0x3d0   : > { %v1010_v49 = vadd.f32 %v1746_v47, %v1009_v48 }
 0x3d2   : > { %v1045_v50 = vpack.c.bf16 %v1010_v49, %v1010_v49  ;;  %v1750_v49 = vld [vmem:[%s2141_s8] ss:$0 sm:$0xff] }
 0x3d4   : > { %v1050_v51 = vsel %vm687_vm2, %v1045_v50, 0 }
 0x3d5   : > { %1059 = vmatpush.bf16.msra.mxu0 %v1050_v51 }
 0x3d7   : > { %v1030_v43 = vpop.f32.mrf.mxu3  ;;  %v1011_v53 = vpop.f32.mrf.mxu2 }
 0x3d8   : > { %v1034_v44 = vmul.f32 0.35355338, %v1030_v43 }
 0x3d9   : > { %1188 = vmatpush.bf16.msrb.mxu0 %v1722_v11 }
 0x3da   : > { %v1035_v45 = vsel %vm652_vm1, %v1034_v44, -inf }
 0x3db   : > { %1036 = vmax.xlane.f32.xlu2 %v1035_v45 }
 0x3dd   : > { %1189 = vmatpush.bf16.msrb.mxu0 %v1721_v22 }
 0x3df   : > { %v1032_v46 = vpop.f32.mrf.mxu3  ;;  %v1121_v8 = vpop.f32.mrf.mxu2 }
 0x3e0   : > { %v1122_v20 = vadd.f32 %v1748_v19, %v1121_v8  ;;  %v1751_v19 = vld [vmem:[%s2142_s9] ss:$0 sm:$0xff] }
 0x3e2   : > { %v1195_v21 = vpack.c.bf16 %v1122_v20, %v1122_v20 }
 0x3e7   : > { %v1156_v1 = vpop.f32.mrf.mxu3  ;;  %v1123_v10 = vpop.f32.mrf.mxu2 }
 0x3e8   : > { %v1157_v3 = vadd.f32 %v1747_v2, %v1156_v1  ;;  %v1727_v10 = vld [vmem:[%s2146_s13 + $0x10] sm:$0xff] }
 0x3ea   : > { %v1196_v6 = vpack.c.bf16 %v1157_v3, %v1157_v3 }
 0x3ec   : > { %v1201_v9 = vsel %vm652_vm1, %v1196_v6, 0  ;;  %v1723_v6 = vld [vmem:[%s2144_s11] sm:$0xff] }
 0x3ed   : > { %1210 = vmatpush.bf16.xpose.msrb.mxu1 %v1201_v9 }
 0x3ef   : > { %v1158_v7 = vpop.f32.mrf.mxu3 }
 0x3f0   : > { %v1728_v7 = vld [vmem:[%s2146_s13 + $0x18] sm:$0xff] }
 0x44e   : > { %v1037_v57 = vpop.xlane.xlu2 %1036 }
 0x44f   : > { %v1038_v58 = vsub.f32 %v1034_v44, %v1037_v57 }
 0x451   : > { %v1039_v59 = vmul.f32 1.442695, %v1038_v58 }
 0x453   : > { %1765 = vpow2.f32 %v1039_v59 }
 0x459   : > { %v1766_v60 = vpop.eup %1765 }
 0x45a   : > { %v1044_v61 = vpack.c.bf16 %v1766_v60, %v1766_v60  ;;  %v1041_v62 = vsel %vm652_vm1, %v1766_v60, 0.0 }
 0x45b   : > { %1042 = vadd.xlane.f32.xlu2 %v1041_v62 }
 0x45c   : > { %1622 = vmatmul.msk.bf16.vlgmr.msra.gmra.mxu0 %vm652_vm1, %v1044_v61 }
 0x46c   : > { %1666 = vmatmul.msk.bf16.vlgmr.msrb.gmra.mxu0 %vm567_vm0, %v1910_v5 }
 0x4ce   : > { %v1043_v12 = vpop.xlane.xlu2 %1042 }
 0x4cf   : > { %1767 = vrcp.f32 %v1043_v12 }
 0x4d5   : > { %v1768_v13 = vpop.eup %1767 }
 0x4d9   : > { %v1061_v15 = vpop.f32.mrf.mxu0 }
 0x4da   : > { %v1066_v16 = vmul.f32 %v1768_v13, %v1061_v15 }
 0x4dc   : > { %v1067_v17 = vpack.c.bf16 %v1066_v16, %v1066_v16 }
 0x4de   : > { %1624 = vmatmul.msk.bf16.vlgmr.msra.gmra.mxu1 %vm652_vm1, %v1067_v17 }
 0x4df   : > { %1400 = vmatpush.bf16.msra.mxu1 %v1728_v7 }
 0x4e1   : > { %v1063_v18 = vpop.f32.mrf.mxu0 }
 0x4e3   : > { %1401 = vmatpush.bf16.msra.mxu1 %v1727_v10 }
 0x4e9   : > { %v1191_v32 = vpop.f32.mrf.mxu0 }
 0x4ea   : > { %v1192_v33 = vadd.f32 %v1749_v31, %v1191_v32 }
 0x4ec   : > { %v1227_v34 = vpack.c.bf16 %v1192_v33, %v1192_v33 }
 0x4ee   : > { %1667 = vmatmul.msk.bf16.vlgmr.msrb.gmra.mxu1 %vm652_vm1, %v1195_v21  ;;  %v1232_v5 = vsel %vm687_vm2, %v1227_v34, 0  ;;  %v1752_v21 = vld [vmem:[%s2143_s10] ss:$0 sm:$0xff] }
 0x4ef   : > { %1241 = vmatpush.bf16.msrb.mxu2 %v1232_v5  ;;  %v1754_v34 = vld [vmem:[%s2147_s14] ss:$0 sm:$0xff] }
 0x4f1   : > { %v1193_v14 = vpop.f32.mrf.mxu0 }
 0x55b   : > { %v1085_v24 = vpop.f32.mrf.mxu1 }
 0x55c   : > { %v1089_v25 = vadd.f32 %v1085_v24, %v905_v23 }
 0x563   : > { %v1087_v26 = vpop.f32.mrf.mxu1 }
 0x564   : > { %v1726_v26 = vld [vmem:[%s2146_s13 + $0x8] sm:$0xff] }
 0x565   : > { %1402 = vmatpush.bf16.msra.mxu1 %v1726_v26 }
 0x56b   : > { %v1212_v27 = vpop.f32.mrf.mxu1 }
 0x56c   : > { %v1216_v28 = vmul.f32 0.35355338, %v1212_v27  ;;  %v1725_v27 = vld [vmem:[%s2146_s13] sm:$0xff] }
 0x56d   : > { %1403 = vmatpush.bf16.msra.mxu1 %v1725_v27 }
 0x56e   : > { %v1217_v29 = vsel %vm652_vm1, %v1216_v28, -inf }
 0x56f   : > { %1218 = vmax.xlane.f32.xlu0 %v1217_v29 }
 0x573   : > { %v1214_v30 = vpop.f32.mrf.mxu1 }
 0x5e2   : > { %v1219_v35 = vpop.xlane.xlu0 %1218 }
 0x5e3   : > { %v1220_v36 = vsub.f32 %v1216_v28, %v1219_v35  ;;  %v1753_v28 = vld [vmem:[%s2145_s12] ss:$0 sm:$0xff] }
 0x5e5   : > { %v1221_v37 = vmul.f32 1.442695, %v1220_v36 }
 0x5e7   : > { %1769 = vpow2.f32 %v1221_v37 }
 0x5ed   : > { %v1770_v38 = vpop.eup %1769 }
 0x5ee   : > { %v1226_v39 = vpack.c.bf16 %v1770_v38, %v1770_v38  ;;  %v1223_v40 = vsel %vm652_vm1, %v1770_v38, 0.0 }
 0x5ef   : > { %1224 = vadd.xlane.f32.xlu1 %v1223_v40 }
 0x5f0   : > { %1668 = vmatmul.msk.bf16.vlgmr.msrb.gmra.mxu2 %vm652_vm1, %v1226_v39 }
 0x662   : > { %v1225_v43 = vpop.xlane.xlu1 %1224 }
 0x663   : > { %1771 = vrcp.f32 %v1225_v43 }
 0x664   : > { %1773 = vrcp.f32 %v1787_v56 }
 0x669   : > { %v1772_v44 = vpop.eup %1771 }
 0x66a   : > { %v1774_v57 = vpop.eup %1773 }
 0x66b   : > { %v1284_v58 = vmul.f32 32.0, %v1774_v57  ;;  %vm1288_vm3 = vweird.f32 %v1774_v57 }
 0x66d   : > { %v1285_v59 = vsub.f32 1.0, %v1284_v58 }
 0x66f   : > { %v1286_v60 = vmul.f32 %v1774_v57, %v1285_v59 }
 0x671   : > { %v1287_v61 = vadd.f32 %v1774_v57, %v1286_v60 }
 0x673   : > { %v1243_v45 = vpop.f32.mrf.mxu2  ;;  %v1289_v62 = vsel %vm1288_vm3, %v1774_v57, %v1287_v61 }
 0x674   : > { %v1248_v46 = vmul.f32 %v1772_v44, %v1243_v45 }
 0x676   : > { %v1249_v47 = vpack.c.bf16 %v1248_v46, %v1248_v46 }
 0x678   : > { %1670 = vmatmul.msk.bf16.vlgmr.msrb.gmra.mxu3 %vm652_vm1, %v1249_v47 }
 0x67b   : > { %v1245_v48 = vpop.f32.mrf.mxu2 }
 0x6fb   : > { %v1267_v50 = vpop.f32.mrf.mxu3 }
 0x6fc   : > { %v1271_v51 = vadd.f32 %v1267_v50, %v1089_v25 }
 0x6fe   : > { %v1276_v52 = vadd.f32 %v1750_v49, %v1271_v51 }
 0x700   : > { %v1277_v53 = vadd.f32 %v1276_v52, %v1906_v4  ;;  %v1724_v4 = vld [vmem:[%s2144_s11 + $0x8] sm:$0xff]  ;;  %v1755_v52 = vld [vmem:[%s2148_s15] ss:$0 sm:$0xff] }
 0x701   : > { %1347 = vmatpush.bf16.msra.mxu0 %v1724_v4 }
 0x702   : > { %v1280_v54 = vsel %vm567_vm0, %v1277_v53, 0.0 }
 0x703   : > { %1281 = vadd.xlane.f32.xlu2 %v1280_v54  ;;  %v1269_v55 = vpop.f32.mrf.mxu3  ;;  %v1756_v54 = vld [vmem:[%s2149_s16] ss:$0 sm:$0xff] }
 0x705   : > { %1348 = vmatpush.bf16.msra.mxu0 %v1723_v6 }
 0x776   : > { %v1282_v63 = vpop.xlane.xlu2 %1281 }
 0x777   : > { %v1290_v0 = vmul.f32 %v1289_v62, %v1282_v63 }
 0x779   : > { %v1291_v1 = vsub.f32 %v1277_v53, %v1290_v0 }
 0x77b   : > { %v1292_v2 = vmul.f32 %v1291_v1, %v1291_v1 }
 0x77d   : > { %v1293_v3 = vsel %vm567_vm0, %v1292_v2, 0.0 }
 0x77e   : > { %1294 = vadd.xlane.f32.xlu0 %v1293_v3 }
 0x7f1   : > { %v1295_v8 = vpop.xlane.xlu0 %1294 }
 0x7f2   : > { %v1296_v9 = vmul.f32 %v1295_v8, %v1289_v62 }
 0x7f4   : > { %v1297_v11 = vadd.f32 1e-05, %v1296_v9 }
 0x7f6   : > { %1775 = vrsqrt.f32 %v1297_v11  ;;  %vm1304_vm5 = vweird.f32 %v1297_v11 }
 0x7fc   : > { %v1776_v12 = vpop.eup %1775 }
 0x7fd   : > { %v1299_v13 = vmul.f32 %v1776_v12, %v1297_v11  ;;  %vm1305_vm4 = vweird.f32 %v1776_v12 }
 0x7fe   : > { %vm1306_vm6 = vmor %vm1304_vm5, %vm1305_vm4 }
 0x7ff   : > { %v1300_v15 = vmul.f32 %v1776_v12, %v1299_v13 }
 0x801   : > { %v1301_v16 = vmul.f32 0.5, %v1300_v15 }
 0x803   : > { %v1302_v17 = vsub.f32 1.5, %v1301_v16 }
 0x805   : > { %v1303_v18 = vmul.f32 %v1776_v12, %v1302_v17 }
 0x807   : > { %v1307_v20 = vsel %vm1306_vm6, %v1776_v12, %v1303_v18 }
 0x808   : > { %v1308_v22 = vmul.f32 %v1307_v20, %v1291_v1 }
 0x80a   : > { %v1312_v23 = vmul.f32 %v1751_v19, %v1308_v22 }
 0x80c   : > { %v1316_v24 = vadd.f32 %v1752_v21, %v1312_v23 }
 0x80e   : > { %v1317_v25 = vpack.c.bf16 %v1316_v24, %v1316_v24 }
 0x810   : > { %1679 = vmatmul.msk.bf16.vlgmr.msra.gmra.mxu0 %vm567_vm0, %v1317_v25 }
 0x88d   : > { %v1350_v29 = vpop.f32.mrf.mxu0 }
 0x88e   : > { %v1351_v30 = vadd.f32 %v1753_v28, %v1350_v29 }
 0x890   : > { %v1354_v31 = vmax.f32 %v1351_v30, 0.0 }
 0x892   : > { %v1355_v32 = vpack.c.bf16 %v1354_v31, %v1354_v31 }
 0x894   : > { %1696 = vmatmul.msk.bf16.vlgmr.msra.gmra.mxu1 %vm1392_vm7, %v1355_v32 }
 0x895   : > { %v1352_v33 = vpop.f32.mrf.mxu0 }
 0x911   : > { %v1405_v5 = vpop.f32.mrf.mxu1 }
 0x912   : > { %v1406_v14 = vadd.f32 %v1754_v34, %v1405_v5 }
 0x914   : > { %v1409_v35 = vadd.f32 %v1406_v14, %v1316_v24 }
 0x916   : > { %v1412_v36 = vsel %vm567_vm0, %v1409_v35, 0.0 }
 0x917   : > { %1413 = vadd.xlane.f32.xlu1 %v1412_v36 }
 0x919   : > { %v1407_v37 = vpop.f32.mrf.mxu1 }
 0x98a   : > { %v1414_v38 = vpop.xlane.xlu1 %1413 }
 0x98b   : > { %v1415_v39 = vmul.f32 %v1414_v38, %v1289_v62 }
 0x98d   : > { %v1416_v40 = vsub.f32 %v1409_v35, %v1415_v39 }
 0x98f   : > { %v1417_v41 = vmul.f32 %v1416_v40, %v1416_v40 }
 0x991   : > { %v1418_v42 = vsel %vm567_vm0, %v1417_v41, 0.0 }
 0x992   : > { %1419 = vadd.xlane.f32.xlu2 %v1418_v42 }
 0xa05   : > { %v1420_v43 = vpop.xlane.xlu2 %1419 }
 0xa06   : > { %v1421_v44 = vmul.f32 %v1420_v43, %v1289_v62 }
 0xa08   : > { %v1422_v45 = vadd.f32 1e-05, %v1421_v44 }
 0xa0a   : > { %1777 = vrsqrt.f32 %v1422_v45  ;;  %vm1429_vm9 = vweird.f32 %v1422_v45 }
 0xa10   : > { %v1778_v46 = vpop.eup %1777 }
 0xa11   : > { %v1424_v47 = vmul.f32 %v1778_v46, %v1422_v45  ;;  %vm1430_vm8 = vweird.f32 %v1778_v46 }
 0xa12   : > { %vm1431_vm10 = vmor %vm1429_vm9, %vm1430_vm8 }
 0xa13   : > { %v1425_v48 = vmul.f32 %v1778_v46, %v1424_v47 }
 0xa15   : > { %v1426_v49 = vmul.f32 0.5, %v1425_v48 }
 0xa17   : > { %v1427_v50 = vsub.f32 1.5, %v1426_v49 }
 0xa19   : > { %v1428_v51 = vmul.f32 %v1778_v46, %v1427_v50 }
 0xa1b   : > { %v1432_v53 = vsel %vm1431_vm10, %v1778_v46, %v1428_v51 }
 0xa1c   : > { %v1433_v55 = vmul.f32 %v1432_v53, %v1416_v40 }
 0xa1e   : > { %v1437_v56 = vmul.f32 %v1755_v52, %v1433_v55 }
 0xa20   : > { %v1441_v57 = vadd.f32 %v1756_v54, %v1437_v56 }
 0xa22   : > { %1442 = vst.msk [vmem:[%s543_s29] sm:$0xff] %vm567_vm0, %v1441_v57 }
 0xa23 PF: > { %s27_s24 = sadd.s32 1, %s1785_s24  }
 0xa24   : > { %p24_p4 = scmp.ge.s32.totalorder %s27_s24, 4  }
 0xa26   :  { %26 = sbr.rel (!%p24_p4) target bundleno = 3 (0x3), region = 139 }

// kernel: _lambda_.7
= control target key start
LH: loop header
LB: loop body
LE: loop exit
PB: predicated region body
PF: predicated region fallthrough
CT: control target
= control target key end

     0   :  { %s3714_s0 = inlined_call_operand.vmem [shape: f32[16,32], index: 0, kind: input, shape index: {}]   ;;  %s3715_s1 = inlined_call_operand.vmem [shape: f32[16,32], index: 1, kind: input, shape index: {}]   ;;  %s3716_s2 = inlined_call_operand.vmem [shape: bf16[4,32,8], index: 2, kind: input, shape index: {}]   ;;  %s3717_s3 = inlined_call_operand.vmem [shape: f32[4,1,8], index: 3, kind: input, shape index: {}]   ;;  %s3718_s4 = inlined_call_operand.vmem [shape: bf16[4,32,8], index: 4, kind: input, shape index: {}]   ;;  %s3719_s5 = inlined_call_operand.vmem [shape: f32[4,1,8], index: 5, kind: input, shape index: {}]   ;;  %s3720_s6 = inlined_call_operand.vmem [shape: bf16[4,32,8], index: 6, kind: input, shape index: {}]   ;;  %s3721_s7 = inlined_call_operand.vmem [shape: f32[4,1,8], index: 7, kind: input, shape index: {}]   ;;  %s3722_s8 = inlined_call_operand.vmem [shape: bf16[4,8,32], index: 8, kind: input, shape index: {}]   ;;  %s3723_s9 = inlined_call_operand.vmem [shape: f32[1,32], index: 9, kind: input, shape index: {}]   ;;  %s3724_s10 = inlined_call_operand.vmem [shape: f32[1,32], index: 10, kind: input, shape index: {}]   ;;  %s3725_s11 = inlined_call_operand.vmem [shape: f32[1,32], index: 11, kind: input, shape index: {}]   ;;  %s3726_s12 = inlined_call_operand.vmem [shape: bf16[4,32,8], index: 12, kind: input, shape index: {}]   ;;  %s3727_s13 = inlined_call_operand.vmem [shape: f32[4,1,8], index: 13, kind: input, shape index: {}]   ;;  %s3728_s14 = inlined_call_operand.vmem [shape: bf16[4,32,8], index: 14, kind: input, shape index: {}]   ;;  %s3729_s15 = inlined_call_operand.vmem [shape: f32[4,1,8], index: 15, kind: input, shape index: {}]   ;;  %s3730_s16 = inlined_call_operand.vmem [shape: bf16[4,32,8], index: 16, kind: input, shape index: {}]   ;;  %s3731_s17 = inlined_call_operand.vmem [shape: f32[4,1,8], index: 17, kind: input, shape index: {}]   ;;  %s3732_s18 = inlined_call_operand.vmem [shape: bf16[4,8,32], index: 18, kind: input, shape index: {}]   ;;  %s3733_s19 = inlined_call_operand.vmem [shape: f32[1,32], index: 19, kind: input, shape index: {}]   ;;  %s3734_s20 = inlined_call_operand.vmem [shape: f32[1,32], index: 20, kind: input, shape index: {}]   ;;  %s3735_s21 = inlined_call_operand.vmem [shape: f32[1,32], index: 21, kind: input, shape index: {}]   ;;  %s3736_s22 = inlined_call_operand.vmem [shape: bf16[32,64], index: 22, kind: input, shape index: {}]   ;;  %s3737_s23 = inlined_call_operand.vmem [shape: f32[1,64], index: 23, kind: input, shape index: {}]   ;;  %s3738_s24 = inlined_call_operand.vmem [shape: bf16[64,32], index: 24, kind: input, shape index: {}]   ;;  %s3739_s25 = inlined_call_operand.vmem [shape: f32[1,32], index: 25, kind: input, shape index: {}]   ;;  %s3740_s26 = inlined_call_operand.vmem [shape: f32[1,32], index: 26, kind: input, shape index: {}]   ;;  %s3741_s27 = inlined_call_operand.vmem [shape: f32[1,32], index: 27, kind: input, shape index: {}]   ;;  %s3742_s28 = inlined_call_operand.vmem [shape: f32[16,32], index: 28, kind: output, shape index: {}]  }
   0x1   :  { %3755 = sst [smem:[#allocation3_spill]] %s3714_s0 }
   0x2   :  { %3756 = sst [smem:[#allocation4_spill]] %s3715_s1 }
   0x3   :  { %3757 = sst [smem:[#allocation5_spill]] %s3716_s2 }
   0x4   :  { %3758 = sst [smem:[#allocation6_spill]] %s3717_s3 }
   0x5   :  { %3759 = sst [smem:[#allocation7_spill]] %s3718_s4 }
   0x6   :  { %3760 = sst [smem:[#allocation8_spill]] %s3719_s5 }
   0x7   :  { %3761 = sst [smem:[#allocation9_spill]] %s3720_s6 }
   0x8   :  { %3762 = sst [smem:[#allocation10_spill]] %s3721_s7 }
   0x9   :  { %3763 = sst [smem:[#allocation11_spill]] %s3722_s8  ;;  %s3251_s8 = smov 0  }
   0xa   :  { %3764 = sst [smem:[#allocation12_spill]] %s3723_s9 }
   0xb   :  { %3765 = sst [smem:[#allocation13_spill]] %s3724_s10 }
   0xc   :  { %3766 = sst [smem:[#allocation14_spill]] %s3725_s11 }
   0xd   :  { %3767 = sst [smem:[#allocation15_spill]] %s3726_s12 }
   0xe   :  { %3768 = sst [smem:[#allocation16_spill]] %s3742_s28 }
   0xf LB: > { %3769 = sst [smem:[#allocation2_spill]] %s3103_s8  ;;  %s2588_s5 = sadd.s32 4294967295, %s3103_s8   ;;  %s3103_s8 = sphi %s3251_s8, %s38_s8  }
  0x10   : > { %p2592_p0 = scmp.ge.s32.totalorder %s3103_s8, 1  ;;  %p770_p1 = scmp.lt.s32.totalorder %s3103_s8, 3 }
  0x12   : > { %p771_p2 = pnand %p2592_p0, %p770_p1 }
  0x13   : > { %s3770_s3 = sld [smem:[#allocation5_spill]] (!%p771_p2)  ;;  %p846_p3 = scmp.lt.s32.totalorder (!%p771_p2), %s2588_s5, 1 }
  0x14   : > { %774 = sbr.rel (%p771_p2) target bundleno = 4641 (0x1221), region = 132  ;;  %s3771_s0 = sld [smem:[#allocation7_spill]] (!%p771_p2) }
  0x15   : > { %s3772_s9 = sld [smem:[#allocation4_spill]] (!%p771_p2) }
  0x16   : > { %s3773_s10 = sld [smem:[#allocation9_spill]] (!%p771_p2) }
  0x17   : > { %s3775_s29 = sld [smem:[#allocation6_spill]] (!%p771_p2) }
  0x18   : > { %s3776_s6 = sld [smem:[#allocation10_spill]] (!%p771_p2) }
  0x19   : > { %v2961_v0 = vld [vmem:[%s3770_s3 + $0x8] sm:$0xff]  ;;  %v2960_v2 = vld [vmem:[%s3770_s3] sm:$0xff]  ;;  %s3786_s5 = smov (!%p846_p3, %s2588_s5), 1  ;;  %vm882_vm0 = vcmask 261120   ;;  %vm967_vm1 = vcmask 64512   ;;  %v2967_v21 = vld [vmem:[%s3770_s3 + $0x18] sm:$0xff] }
  0x1a   : > { %v2963_v1 = vld [vmem:[%s3771_s0 + $0x8] sm:$0xff]  ;;  %892 = vmatpush.bf16.msra.mxu0 %v2961_v0  ;;  %v2962_v3 = vld [vmem:[%s3771_s0] sm:$0xff]  ;;  %s3271_s12 = sshll.u32 %s3786_s5, 3  ;;  %v2969_v8 = vld [vmem:[%s3771_s0 + $0x18] sm:$0xff]  ;;  %s3774_s5 = sld [smem:[#allocation8_spill]]  ;;  %vm1002_vm2 = vcmask 1043456  }
  0x1b   : > { %925 = vmatpush.bf16.msra.mxu1 %v2963_v1  ;;  %s853_s30 = scalar_lea.vmem %s3772_s9, %s3271_s12  ;;  %v2968_v9 = vld [vmem:[%s3771_s0 + $0x10] sm:$0xff]  ;;  %s3777_s1 = sld [smem:[#allocation11_spill]]  ;;  %vm2472_vm10 = vcmask 523264  }
  0x1c   : > { %v3277_v4 = vld [vmem:[%s853_s30] sm:$0xff]  ;;  %v2965_v6 = vld [vmem:[%s3773_s10 + $0x8] sm:$0xff]  ;;  %v2966_v22 = vld [vmem:[%s3770_s3 + $0x10] sm:$0xff]  ;;  %s3778_s2 = sld [smem:[#allocation12_spill]] }
  0x1d   : > { %v3281_v5 = vpack.c.bf16 %v3277_v4, %v3277_v4  ;;  %958 = vmatpush.bf16.msra.mxu2 %v2965_v6  ;;  %v2964_v7 = vld [vmem:[%s3773_s10] sm:$0xff]  ;;  %v2971_v41 = vld [vmem:[%s3773_s10 + $0x18] sm:$0xff]  ;;  %v2970_v43 = vld [vmem:[%s3773_s10 + $0x10] sm:$0xff]  ;;  %s3779_s8 = sld [smem:[#allocation3_spill]] }
  0x1e   : > { %893 = vmatpush.bf16.msra.mxu0 %v2960_v2  ;;  %v3023_v13 = vld [vmem:[%s3775_s29] ss:$0 sm:$0xff]  ;;  %v3027_v49 = vld [vmem:[%s3775_s29 + $0x1] ss:$0 sm:$0xff]  ;;  %s3780_s7 = sld [smem:[#allocation15_spill]] }
  0x1f   : > { %926 = vmatpush.bf16.msra.mxu1 %v2962_v3  ;;  %v3025_v29 = vld [vmem:[%s3776_s6] ss:$0 sm:$0xff]  ;;  %v3028_v55 = vld [vmem:[%s3776_s6 + $0x1] ss:$0 sm:$0xff]  ;;  %s3782_s4 = sld [smem:[#allocation14_spill]] }
  0x20   : > { %v3024_v10 = vld [vmem:[%s3774_s5] ss:$0 sm:$0xff]  ;;  %v3026_v32 = vld [vmem:[%s3774_s5 + $0x1] ss:$0 sm:$0xff] }
  0x21   : > { %2604 = vmatmul.msk.bf16.vlgmr.msra.gmra.mxu0 %vm882_vm0, %v3281_v5  ;;  %959 = vmatpush.bf16.msra.mxu2 %v2964_v7  ;;  %v1022_v52 = vld [vmem:[%s3777_s1] sm:$0xf] }
  0x22   : > { %2613 = vmatmul.msk.bf16.vlgmr.msra.gmra.mxu1 %vm882_vm0, %v3281_v5  ;;  %v1208_v53 = vsel %vm1002_vm2, %v1022_v52, 0  ;;  %v2981_v52 = vld [vmem:[%s3771_s0 + $0x38] sm:$0xff] }
  0x23   : > { %1051 = vmatpush.bf16.msrb.mxu1 %v2967_v21  ;;  %s849_s30 = scalar_lea.vmem %s3779_s8, %s3271_s12 }
  0x24   : > { %2622 = vmatmul.msk.bf16.vlgmr.msra.gmra.mxu2 %vm882_vm0, %v3281_v5 }
  0x25   : > { %1086 = vmatpush.bf16.msrb.mxu2 %v2969_v8  ;;  %v2973_v8 = vld [vmem:[%s3770_s3 + $0x28] sm:$0xff] }
  0x27   : > { %1052 = vmatpush.bf16.msrb.mxu1 %v2966_v22 }
  0x29   : > { %1087 = vmatpush.bf16.msrb.mxu2 %v2968_v9  ;;  %v2975_v9 = vld [vmem:[%s3771_s0 + $0x28] sm:$0xff] }
  0x32   : > { %2638 = vmatmul.msk.bf16.vlgmr.msrb.gmra.mxu1 %vm882_vm0, %v3281_v5 }
  0x34   : > { %2652 = vmatmul.msk.bf16.vlgmr.msrb.gmra.mxu2 %vm882_vm0, %v3281_v5 }
  0x9e   : > { %v895_v11 = vpop.f32.mrf.mxu0 }
  0x9f   : > { %v928_v12 = vpop.f32.mrf.mxu1  ;;  %v896_v16 = vadd.f32 %v3023_v13, %v895_v11  ;;  %v2974_v11 = vld [vmem:[%s3771_s0 + $0x20] sm:$0xff] }
  0xa0   : > { %v929_v14 = vadd.f32 %v3024_v10, %v928_v12  ;;  %v2972_v10 = vld [vmem:[%s3770_s3 + $0x20] sm:$0xff] }
  0xa1   : > { %v965_v20 = vpack.c.bf16 %v896_v16, %v896_v16 }
  0xa2   : > { %v966_v15 = vpack.c.bf16 %v929_v14, %v929_v14 }
  0xa4   : > { %v972_v17 = vsel %vm967_vm1, %v966_v15, 0 }
  0xa5   : > { %981 = vmatpush.bf16.xpose.msra.mxu3 %v972_v17 }
  0xa6   : > { %v897_v18 = vpop.f32.mrf.mxu0 }
  0xa7   : > { %v930_v19 = vpop.f32.mrf.mxu1  ;;  %v961_v23 = vpop.f32.mrf.mxu2 }
  0xa8   : > { %v962_v30 = vadd.f32 %v3025_v29, %v961_v23 }
  0xaa   : > { %v998_v31 = vpack.c.bf16 %v962_v30, %v962_v30 }
  0xac   : > { %2623 = vmatmul.msk.bf16.vlgmr.msra.gmra.mxu3 %vm967_vm1, %v965_v20  ;;  %v1004_v34 = vsel %vm1002_vm2, %v998_v31, 0  ;;  %v2669_v20 = vld [vmem:[%s3777_s1 + $0x4] sm:$0xf]  ;;  %v3030_v31 = vld [vmem:[%s3774_s5 + $0x2] ss:$0 sm:$0xff] }
  0xad   : > { %1013 = vmatpush.bf16.msrb.mxu0 %v1004_v34  ;;  %1121 = vmatpush.bf16.msrb.mxu3 %v2971_v41  ;;  %v1189_v21 = vsel %vm1002_vm2, %v2669_v20, 0 }
  0xae   : > { %1198 = vmatpush.bf16.msra.mxu2 %v1189_v21 }
  0xaf   : > { %v963_v24 = vpop.f32.mrf.mxu2  ;;  %v1054_v39 = vpop.f32.mrf.mxu1 }
  0xb0   : > { %v1055_v50 = vadd.f32 %v3027_v49, %v1054_v39 }
  0xb1   : > { %1122 = vmatpush.bf16.msrb.mxu3 %v2970_v43 }
  0xb2   : > { %v1128_v51 = vpack.c.bf16 %v1055_v50, %v1055_v50 }
  0xb5   : > { %1217 = vmatpush.bf16.msra.mxu3 %v1208_v53 }
  0xb7   : > { %v1089_v33 = vpop.f32.mrf.mxu2  ;;  %v1056_v40 = vpop.f32.mrf.mxu1 }
  0xb8   : > { %v1090_v35 = vadd.f32 %v3026_v32, %v1089_v33  ;;  %v3029_v33 = vld [vmem:[%s3775_s29 + $0x2] ss:$0 sm:$0xff] }
  0xb9   : > { %v2976_v40 = vld [vmem:[%s3773_s10 + $0x20] sm:$0xff] }
  0xba   : > { %v1129_v36 = vpack.c.bf16 %v1090_v35, %v1090_v35 }
  0xbc   : > { %v1134_v37 = vsel %vm967_vm1, %v1129_v36, 0  ;;  %2666 = vmatmul.msk.bf16.vlgmr.msrb.gmra.mxu3 %vm882_vm0, %v3281_v5 }
  0xbd   : > { %1143 = vmatpush.bf16.xpose.msra.mxu0 %v1134_v37 }
  0xbf   : > { %v1091_v38 = vpop.f32.mrf.mxu2 }
 0x12f   : > { %v983_v25 = vpop.f32.mrf.mxu3 }
 0x130   : > { %v987_v26 = vmul.f32 0.35355338, %v983_v25  ;;  %v2977_v25 = vld [vmem:[%s3773_s10 + $0x28] sm:$0xff] }
 0x131   : > { %1321 = vmatpush.bf16.msrb.mxu2 %v2977_v25 }
 0x132   : > { %v988_v27 = vsel %vm967_vm1, %v987_v26, -inf }
 0x133   : > { %989 = vmax.xlane.f32.xlu0 %v988_v27 }
 0x135   : > { %1322 = vmatpush.bf16.msrb.mxu2 %v2976_v40 }
 0x137   : > { %v985_v28 = vpop.f32.mrf.mxu3 }
 0x13f   : > { %v1124_v56 = vpop.f32.mrf.mxu3 }
 0x140   : > { %v1125_v59 = vadd.f32 %v3028_v55, %v1124_v56  ;;  %v2979_v55 = vld [vmem:[%s3770_s3 + $0x38] sm:$0xff]  ;;  %v2978_v56 = vld [vmem:[%s3770_s3 + $0x30] sm:$0xff] }
 0x142   : > { %v1160_v61 = vpack.c.bf16 %v1125_v59, %v1125_v59 }
 0x144   : > { %v1165_v63 = vsel %vm1002_vm2, %v1160_v61, 0 }
 0x145   : > { %1174 = vmatpush.bf16.msra.mxu1 %v1165_v63  ;;  %v2716_v63 = vld [vmem:[%s3777_s1 + $0x8] sm:$0xf] }
 0x147   : > { %v1126_v0 = vpop.f32.mrf.mxu3 }
 0x148   : > { %v1389_v0 = vsel %vm1002_vm2, %v2716_v63, 0 }
 0x149   : > { %1286 = vmatpush.bf16.msrb.mxu1 %v2975_v9 }
 0x14d   : > { %1287 = vmatpush.bf16.msrb.mxu1 %v2974_v11  ;;  %v2983_v11 = vld [vmem:[%s3773_s10 + $0x38] sm:$0xff] }
 0x1a6   : > { %v990_v42 = vpop.xlane.xlu0 %989 }
 0x1a7   : > { %v991_v44 = vsub.f32 %v987_v26, %v990_v42 }
 0x1a9   : > { %v992_v45 = vmul.f32 1.442695, %v991_v44 }
 0x1ab   : > { %3057 = vpow2.f32 %v992_v45 }
 0x1b1   : > { %v3058_v46 = vpop.eup %3057 }
 0x1b2   : > { %v994_v47 = vsel %vm967_vm1, %v3058_v46, 0.0  ;;  %v997_v48 = vpack.c.bf16 %v3058_v46, %v3058_v46 }
 0x1b3   : > { %995 = vadd.xlane.f32.xlu1 %v994_v47  ;;  %v3031_v47 = vld [vmem:[%s3776_s6 + $0x2] ss:$0 sm:$0xff] }
 0x1b4   : > { %2624 = vmatmul.msk.bf16.vlgmr.msrb.gmra.mxu0 %vm967_vm1, %v997_v48 }
 0x1b5   : > { %1251 = vmatpush.bf16.msrb.mxu0 %v2973_v8 }
 0x1b9   : > { %1252 = vmatpush.bf16.msrb.mxu0 %v2972_v10 }
 0x1c4   : > { %2667 = vmatmul.msk.bf16.vlgmr.msra.gmra.mxu0 %vm967_vm1, %v1128_v51 }
 0x1d4   : > { %2685 = vmatmul.msk.bf16.vlgmr.msrb.gmra.mxu0 %vm882_vm0, %v3281_v5 }
 0x226   : > { %v996_v54 = vpop.xlane.xlu1 %995 }
 0x227   : > { %3059 = vrcp.f32 %v996_v54  ;;  %v2980_v54 = vld [vmem:[%s3771_s0 + $0x30] sm:$0xff] }
 0x22d   : > { %v3060_v57 = vpop.eup %3059 }
 0x231   : > { %v1015_v58 = vpop.f32.mrf.mxu0 }
 0x232   : > { %v1020_v60 = vmul.f32 %v3060_v57, %v1015_v58 }
 0x234   : > { %v1021_v62 = vpack.c.bf16 %v1020_v60, %v1020_v60 }
 0x236   : > { %2671 = vmatmul.msk.bf16.vlgmr.msra.gmra.mxu3 %vm967_vm1, %v1021_v62 }
 0x239   : > { %v1017_v1 = vpop.f32.mrf.mxu0 }
 0x241   : > { %v1145_v2 = vpop.f32.mrf.mxu0 }
 0x242   : > { %v1149_v3 = vmul.f32 0.35355338, %v1145_v2  ;;  %v3032_v2 = vld [vmem:[%s3774_s5 + $0x3] ss:$0 sm:$0xff] }
 0x244   : > { %v1150_v6 = vsel %vm967_vm1, %v1149_v3, -inf }
 0x245   : > { %1151 = vmax.xlane.f32.xlu0 %v1150_v6 }
 0x249   : > { %v1147_v7 = vpop.f32.mrf.mxu0 }
 0x251   : > { %v1254_v22 = vpop.f32.mrf.mxu0 }
 0x252   : > { %v1255_v36 = vadd.f32 %v3029_v33, %v1254_v22  ;;  %v2982_v22 = vld [vmem:[%s3773_s10 + $0x30] sm:$0xff] }
 0x254   : > { %v1328_v39 = vpack.c.bf16 %v1255_v36, %v1255_v36 }
 0x259   : > { %v1256_v23 = vpop.f32.mrf.mxu0 }
 0x2b8   : > { %v1152_v12 = vpop.xlane.xlu0 %1151 }
 0x2b9   : > { %v1153_v13 = vsub.f32 %v1149_v3, %v1152_v12  ;;  %v3366_v14 = vpop.f32.mrf.mxu3 }
 0x2bb   : > { %v1154_v15 = vmul.f32 1.442695, %v1153_v13 }
 0x2bd   : > { %3061 = vpow2.f32 %v1154_v15 }
 0x2c1   : > { %v1221_v16 = vpop.f32.mrf.mxu3 }
 0x2c3   : > { %v3062_v17 = vpop.eup %3061 }
 0x2c4   : > { %v1159_v18 = vpack.c.bf16 %v3062_v17, %v3062_v17  ;;  %v1156_v19 = vsel %vm967_vm1, %v3062_v17, 0.0 }
 0x2c5   : > { %1157 = vadd.xlane.f32.xlu1 %v1156_v19  ;;  %v3033_v19 = vld [vmem:[%s3775_s29 + $0x3] ss:$0 sm:$0xff] }
 0x2c6   : > { %2668 = vmatmul.msk.bf16.vlgmr.msra.gmra.mxu1 %vm967_vm1, %v1159_v18 }
 0x2c7   : > { %1398 = vmatpush.bf16.msra.mxu1 %v1389_v0 }
 0x2d6   : > { %2699 = vmatmul.msk.bf16.vlgmr.msrb.gmra.mxu1 %vm882_vm0, %v3281_v5 }
 0x338   : > { %v1158_v24 = vpop.xlane.xlu1 %1157 }
 0x339   : > { %3063 = vrcp.f32 %v1158_v24 }
 0x33f   : > { %v3064_v26 = vpop.eup %3063 }
 0x343   : > { %v1176_v27 = vpop.f32.mrf.mxu1 }
 0x344   : > { %v1181_v28 = vmul.f32 %v3064_v26, %v1176_v27 }
 0x346   : > { %v1182_v29 = vpack.c.bf16 %v1181_v28, %v1181_v28 }
 0x348   : > { %2670 = vmatmul.msk.bf16.vlgmr.msra.gmra.mxu2 %vm967_vm1, %v1182_v29 }
 0x349   : > { %1433 = vmatpush.bf16.msra.mxu2 %v2979_v55 }
 0x34b   : > { %v1178_v30 = vpop.f32.mrf.mxu1 }
 0x34d   : > { %1434 = vmatpush.bf16.msra.mxu2 %v2978_v56  ;;  %v3105_v56 = vmov 32.0  }
 0x353   : > { %v1289_v32 = vpop.f32.mrf.mxu1 }
 0x354   : > { %v1290_v34 = vadd.f32 %v3030_v31, %v1289_v32  ;;  %v3034_v31 = vld [vmem:[%s3776_s6 + $0x3] ss:$0 sm:$0xff] }
 0x356   : > { %v1329_v35 = vpack.c.bf16 %v1290_v34, %v1290_v34 }
 0x358   : > { %v1334_v37 = vsel %vm967_vm1, %v1329_v35, 0  ;;  %2713 = vmatmul.msk.bf16.vlgmr.msrb.gmra.mxu2 %vm882_vm0, %v3281_v5 }
 0x359   : > { %1343 = vmatpush.bf16.xpose.msrb.mxu3 %v1334_v37 }
 0x35b   : > { %v1291_v38 = vpop.f32.mrf.mxu1 }
 0x360   : > { %2714 = vmatmul.msk.bf16.vlgmr.msrb.gmra.mxu3 %vm967_vm1, %v1328_v39 }
 0x361   : > { %1468 = vmatpush.bf16.msra.mxu3 %v2981_v52 }
 0x365   : > { %1469 = vmatpush.bf16.msra.mxu3 %v2980_v54 }
 0x368   : > { %2731 = vmatmul.msk.bf16.vlgmr.msra.gmra.mxu2 %vm882_vm0, %v3281_v5 }
 0x370   : > { %2745 = vmatmul.msk.bf16.vlgmr.msra.gmra.mxu3 %vm882_vm0, %v3281_v5 }
 0x3cb   : > { %v1200_v41 = vpop.f32.mrf.mxu2 }
 0x3cc   : > { %v1220_v23 = vadd.f32 %v3366_v14, %v1200_v41  ;;  %v2762_v41 = vld [vmem:[%s3777_s1 + $0xc] sm:$0xf]  ;;  %s3781_s1 = sld [smem:[#allocation13_spill]] }
 0x3d3   : > { %v1202_v42 = vpop.f32.mrf.mxu2 }
 0x3d4   : > { %v1571_v42 = vsel %vm1002_vm2, %v2762_v41, 0 }
 0x3d5   : > { %1580 = vmatpush.bf16.msrb.mxu3 %v1571_v42 }
 0x3db   : > { %v1324_v48 = vpop.f32.mrf.mxu2 }
 0x3dc   : > { %v1325_v49 = vadd.f32 %v3031_v47, %v1324_v48 }
 0x3de   : > { %v1360_v50 = vpack.c.bf16 %v1325_v49, %v1325_v49  ;;  %v3035_v49 = vld [vmem:[%s3778_s2] ss:$0 sm:$0xff] }
 0x3e0   : > { %v1365_v51 = vsel %vm1002_vm2, %v1360_v50, 0 }
 0x3e1   : > { %1374 = vmatpush.bf16.msra.mxu0 %v1365_v51 }
 0x3e3   : > { %v1345_v43 = vpop.f32.mrf.mxu3  ;;  %v1326_v53 = vpop.f32.mrf.mxu2 }
 0x3e4   : > { %v1349_v44 = vmul.f32 0.35355338, %v1345_v43 }
 0x3e5   : > { %1503 = vmatpush.bf16.msrb.mxu0 %v2983_v11  ;;  %v2984_v11 = vld [vmem:[%s3780_s7] sm:$0xff] }
 0x3e6   : > { %v1350_v45 = vsel %vm967_vm1, %v1349_v44, -inf }
 0x3e7   : > { %1351 = vmax.xlane.f32.xlu2 %v1350_v45 }
 0x3e9   : > { %1504 = vmatpush.bf16.msrb.mxu0 %v2982_v22 }
 0x3eb   : > { %v1347_v46 = vpop.f32.mrf.mxu3  ;;  %v1436_v7 = vpop.f32.mrf.mxu2 }
 0x3ec   : > { %v1437_v20 = vadd.f32 %v3033_v19, %v1436_v7  ;;  %v859_v7 = vld [vmem:[%s849_s30] sm:$0xff] }
 0x3ee   : > { %v1510_v21 = vpack.c.bf16 %v1437_v20, %v1437_v20 }
 0x3f3   : > { %v1471_v1 = vpop.f32.mrf.mxu3  ;;  %v1438_v10 = vpop.f32.mrf.mxu2 }
 0x3f4   : > { %v1472_v3 = vadd.f32 %v3032_v2, %v1471_v1  ;;  %v2991_v10 = vld [vmem:[%s3780_s7 + $0x18] sm:$0xff] }
 0x3f6   : > { %v1511_v6 = vpack.c.bf16 %v1472_v3, %v1472_v3  ;;  %v2987_v3 = vld [vmem:[%s3728_s14 + $0x8] sm:$0xff] }
 0x3f8   : > { %v1516_v9 = vsel %vm967_vm1, %v1511_v6, 0  ;;  %v2986_v6 = vld [vmem:[%s3728_s14] sm:$0xff] }
 0x3f9   : > { %1525 = vmatpush.bf16.xpose.msrb.mxu1 %v1516_v9  ;;  %v2985_v9 = vld [vmem:[%s3780_s7 + $0x8] sm:$0xff] }
 0x3fb   : > { %v1473_v8 = vpop.f32.mrf.mxu3 }
 0x3fc   : > { %v3469_v8 = vpack.c.bf16 %v859_v7, %v859_v7  ;;  %v2996_v7 = vld [vmem:[%s3780_s7 + $0x20] sm:$0xff] }
 0x45a   : > { %v1352_v57 = vpop.xlane.xlu2 %1351 }
 0x45b   : > { %v1353_v58 = vsub.f32 %v1349_v44, %v1352_v57 }
 0x45d   : > { %v1354_v59 = vmul.f32 1.442695, %v1353_v58 }
 0x45f   : > { %3065 = vpow2.f32 %v1354_v59 }
 0x465   : > { %v3066_v60 = vpop.eup %3065 }
 0x466   : > { %v1359_v61 = vpack.c.bf16 %v3066_v60, %v3066_v60  ;;  %v1356_v62 = vsel %vm967_vm1, %v3066_v60, 0.0 }
 0x467   : > { %1357 = vadd.xlane.f32.xlu2 %v1356_v62 }
 0x468   : > { %2715 = vmatmul.msk.bf16.vlgmr.msra.gmra.mxu0 %vm967_vm1, %v1359_v61 }
 0x469   : > { %1663 = vmatpush.bf16.msra.mxu0 %v2985_v9  ;;  %v2994_v9 = vld [vmem:[%s3730_s16 + $0x10] sm:$0xff] }
 0x46d   : > { %1664 = vmatpush.bf16.msra.mxu0 %v2984_v11 }
 0x478   : > { %2759 = vmatmul.msk.bf16.vlgmr.msrb.gmra.mxu0 %vm882_vm0, %v3281_v5 }
 0x4da   : > { %v1358_v12 = vpop.xlane.xlu2 %1357 }
 0x4db   : > { %3067 = vrcp.f32 %v1358_v12  ;;  %v2990_v12 = vld [vmem:[%s3780_s7 + $0x10] sm:$0xff] }
 0x4e1   : > { %v3068_v13 = vpop.eup %3067 }
 0x4e5   : > { %v1376_v15 = vpop.f32.mrf.mxu0 }
 0x4e6   : > { %v1381_v16 = vmul.f32 %v3068_v13, %v1376_v15 }
 0x4e8   : > { %v1382_v17 = vpack.c.bf16 %v1381_v16, %v1381_v16 }
 0x4ea   : > { %2717 = vmatmul.msk.bf16.vlgmr.msra.gmra.mxu1 %vm967_vm1, %v1382_v17 }
 0x4eb   : > { %1699 = vmatpush.bf16.msra.mxu1 %v2987_v3 }
 0x4ed   : > { %v1378_v18 = vpop.f32.mrf.mxu0 }
 0x4ef   : > { %1700 = vmatpush.bf16.msra.mxu1 %v2986_v6  ;;  %v2995_v6 = vld [vmem:[%s3730_s16 + $0x18] sm:$0xff] }
 0x4f5   : > { %v1506_v32 = vpop.f32.mrf.mxu0 }
 0x4f6   : > { %v1507_v33 = vadd.f32 %v3034_v31, %v1506_v32 }
 0x4f8   : > { %v1542_v34 = vpack.c.bf16 %v1507_v33, %v1507_v33 }
 0x4fa   : > { %2760 = vmatmul.msk.bf16.vlgmr.msrb.gmra.mxu1 %vm967_vm1, %v1510_v21  ;;  %v1547_v5 = vsel %vm1002_vm2, %v1542_v34, 0 }
 0x4fb   : > { %1556 = vmatpush.bf16.msrb.mxu2 %v1547_v5  ;;  %1823 = vmatpush.bf16.msrb.mxu1 %v2991_v10  ;;  %v3040_v10 = vld [vmem:[%s3727_s13 + $0x1] ss:$0 sm:$0xff] }
 0x4fd   : > { %v1508_v14 = vpop.f32.mrf.mxu0 }
 0x4fe   : > { %v2989_v14 = vld [vmem:[%s3730_s16 + $0x8] sm:$0xff] }
 0x4ff   : > { %1824 = vmatpush.bf16.msrb.mxu1 %v2990_v12  ;;  %1732 = vmatpush.bf16.msra.mxu2 %v2989_v14  ;;  %v2999_v14 = vld [vmem:[%s3728_s14 + $0x28] sm:$0xff] }
 0x50a   : > { %2781 = vmatmul.msk.bf16.vlgmr.msra.gmra.mxu1 %vm882_vm0, %v3469_v8 }
 0x567   : > { %v1400_v24 = vpop.f32.mrf.mxu1 }
 0x568   : > { %v1404_v25 = vadd.f32 %v1400_v24, %v1220_v23  ;;  %v3036_v23 = vld [vmem:[%s3781_s1] ss:$0 sm:$0xff]  ;;  %s3783_s1 = sld [smem:[#allocation16_spill]] }
 0x56e   : > { %s857_s11 = scalar_lea.vmem %s3783_s1, %s3271_s12 }
 0x56f   : > { %v1402_v26 = vpop.f32.mrf.mxu1 }
 0x577   : > { %v1527_v27 = vpop.f32.mrf.mxu1 }
 0x578   : > { %v1531_v28 = vmul.f32 0.35355338, %v1527_v27 }
 0x57a   : > { %v1532_v29 = vsel %vm967_vm1, %v1531_v28, -inf }
 0x57b   : > { %1533 = vmax.xlane.f32.xlu0 %v1532_v29 }
 0x57f   : > { %v1529_v30 = vpop.f32.mrf.mxu1 }
 0x580   : > { %v3038_v30 = vld [vmem:[%s3729_s15] ss:$0 sm:$0xff] }
 0x587   : > { %v1702_v31 = vpop.f32.mrf.mxu1 }
 0x588   : > { %v1703_v32 = vadd.f32 %v3038_v30, %v1702_v31 }
 0x58a   : > { %v1740_v33 = vpack.c.bf16 %v1703_v32, %v1703_v32 }
 0x58c   : > { %v1745_v34 = vsel %vm967_vm1, %v1740_v33, 0 }
 0x58d   : > { %1754 = vmatpush.bf16.xpose.msra.mxu3 %v1745_v34 }
 0x58f   : > { %v1704_v5 = vpop.f32.mrf.mxu1 }
 0x5ee   : > { %v1534_v35 = vpop.xlane.xlu0 %1533 }
 0x5ef   : > { %v1535_v36 = vsub.f32 %v1531_v28, %v1534_v35  ;;  %v2988_v35 = vld [vmem:[%s3730_s16] sm:$0xff] }
 0x5f0   : > { %1733 = vmatpush.bf16.msra.mxu2 %v2988_v35  ;;  %v2998_v35 = vld [vmem:[%s3728_s14 + $0x20] sm:$0xff] }
 0x5f1   : > { %v1536_v37 = vmul.f32 1.442695, %v1535_v36  ;;  %v2993_v36 = vld [vmem:[%s3728_s14 + $0x18] sm:$0xff] }
 0x5f3   : > { %3069 = vpow2.f32 %v1536_v37  ;;  %v2992_v37 = vld [vmem:[%s3728_s14 + $0x10] sm:$0xff] }
 0x5f9   : > { %v3070_v38 = vpop.eup %3069 }
 0x5fa   : > { %v1541_v39 = vpack.c.bf16 %v3070_v38, %v3070_v38  ;;  %v1538_v40 = vsel %vm967_vm1, %v3070_v38, 0.0  ;;  %v3039_v38 = vld [vmem:[%s3727_s13] ss:$0 sm:$0xff] }
 0x5fb   : > { %1539 = vadd.xlane.f32.xlu1 %v1538_v40 }
 0x5fc   : > { %2761 = vmatmul.msk.bf16.vlgmr.msrb.gmra.mxu2 %vm967_vm1, %v1541_v39 }
 0x5fd   : > { %1858 = vmatpush.bf16.msrb.mxu2 %v2993_v36 }
 0x601   : > { %1859 = vmatpush.bf16.msrb.mxu2 %v2992_v37 }
 0x60c   : > { %2790 = vmatmul.msk.bf16.vlgmr.msra.gmra.mxu2 %vm882_vm0, %v3469_v8 }
 0x61c   : > { %2820 = vmatmul.msk.bf16.vlgmr.msrb.gmra.mxu2 %vm882_vm0, %v3469_v8 }
 0x66e   : > { %v1540_v43 = vpop.xlane.xlu1 %1539 }
 0x66f   : > { %3071 = vrcp.f32 %v1540_v43 }
 0x670   : > { %3073 = vrcp.f32 %v3105_v56  ;;  %v3042_v56 = vld [vmem:[%s3729_s15 + $0x1] ss:$0 sm:$0xff] }
 0x675   : > { %v3072_v44 = vpop.eup %3071 }
 0x676   : > { %v3074_v57 = vpop.eup %3073 }
 0x677   : > { %v1599_v58 = vmul.f32 32.0, %v3074_v57  ;;  %vm1603_vm3 = vweird.f32 %v3074_v57 }
 0x679   : > { %v1600_v59 = vsub.f32 1.0, %v1599_v58 }
 0x67b   : > { %v1601_v60 = vmul.f32 %v3074_v57, %v1600_v59 }
 0x67d   : > { %v1602_v61 = vadd.f32 %v3074_v57, %v1601_v60 }
 0x67f   : > { %v1558_v45 = vpop.f32.mrf.mxu2  ;;  %v3455_v62 = vsel %vm1603_vm3, %v3074_v57, %v1602_v61 }
 0x680   : > { %v1563_v46 = vmul.f32 %v3072_v44, %v1558_v45  ;;  %v3041_v45 = vld [vmem:[%s3731_s17] ss:$0 sm:$0xff] }
 0x682   : > { %v1564_v47 = vpack.c.bf16 %v1563_v46, %v1563_v46 }
 0x684   : > { %2763 = vmatmul.msk.bf16.vlgmr.msrb.gmra.mxu3 %vm967_vm1, %v1564_v47 }
 0x685   : > { %1893 = vmatpush.bf16.msrb.mxu3 %v2995_v6 }
 0x687   : > { %v1560_v48 = vpop.f32.mrf.mxu2 }
 0x689   : > { %1894 = vmatpush.bf16.msrb.mxu3 %v2994_v9 }
 0x68f   : > { %v1735_v46 = vpop.f32.mrf.mxu2 }
 0x690   : > { %v1736_v47 = vadd.f32 %v3041_v45, %v1735_v46  ;;  %v3001_v46 = vld [vmem:[%s3730_s16 + $0x28] sm:$0xff] }
 0x692   : > { %v1771_v48 = vpack.c.bf16 %v1736_v47, %v1736_v47  ;;  %v3000_v47 = vld [vmem:[%s3730_s16 + $0x20] sm:$0xff] }
 0x707   : > { %v1582_v50 = vpop.f32.mrf.mxu3 }
 0x708   : > { %v1586_v51 = vadd.f32 %v1582_v50, %v1404_v25  ;;  %v3037_v25 = vld [vmem:[%s3782_s4] ss:$0 sm:$0xff]  ;;  %v1737_v50 = vpop.f32.mrf.mxu2 }
 0x70a   : > { %v1591_v52 = vadd.f32 %v3035_v49, %v1586_v51  ;;  %v1776_v49 = vsel %vm1002_vm2, %v1771_v48, 0 }
 0x70b   : > { %1785 = vmatpush.bf16.msrb.mxu0 %v1776_v49 }
 0x70c   : > { %v1592_v53 = vadd.f32 %v1591_v52, %v3277_v4 }
 0x70e   : > { %v1595_v54 = vsel %vm882_vm0, %v1592_v53, 0.0 }
 0x70f   : > { %1596 = vadd.xlane.f32.xlu2 %v1595_v54  ;;  %v1584_v55 = vpop.f32.mrf.mxu3 }
 0x710   : > { %v1861_v55 = vpop.f32.mrf.mxu2 }
 0x711   : > { %v1862_v57 = vadd.f32 %v3042_v56, %v1861_v55  ;;  %v3045_v56 = vld [vmem:[%s3729_s15 + $0x2] ss:$0 sm:$0xff] }
 0x713   : > { %v1901_v58 = vpack.c.bf16 %v1862_v57, %v1862_v57 }
 0x715   : > { %v1906_v60 = vsel %vm967_vm1, %v1901_v58, 0 }
 0x718   : > { %v1863_v59 = vpop.f32.mrf.mxu2 }
 0x719   : > { %v3043_v59 = vld [vmem:[%s3727_s13 + $0x2] ss:$0 sm:$0xff] }
 0x782   : > { %v1597_v63 = vpop.xlane.xlu2 %1596 }
 0x783   : > { %v1605_v0 = vmul.f32 %v3455_v62, %v1597_v63 }
 0x785   : > { %v1606_v1 = vsub.f32 %v1592_v53, %v1605_v0 }
 0x787   : > { %v1607_v4 = vmul.f32 %v1606_v1, %v1606_v1 }
 0x789   : > { %v1608_v2 = vsel %vm882_vm0, %v1607_v4, 0.0  ;;  %v2997_v4 = vld [vmem:[%s3780_s7 + $0x28] sm:$0xff] }
 0x78a   : > { %1609 = vadd.xlane.f32.xlu0 %v1608_v2 }
 0x7fd   : > { %v1610_v13 = vpop.xlane.xlu0 %1609 }
 0x7fe   : > { %v1611_v15 = vmul.f32 %v1610_v13, %v3455_v62  ;;  %v1794_v13 = vld [vmem:[%s3732_s18] sm:$0xf] }
 0x800   : > { %v1612_v16 = vadd.f32 1e-05, %v1611_v15  ;;  %v1980_v15 = vsel %vm1002_vm2, %v1794_v13, 0 }
 0x802   : > { %3075 = vrsqrt.f32 %v1612_v16  ;;  %vm1619_vm5 = vweird.f32 %v1612_v16 }
 0x808   : > { %v3076_v17 = vpop.eup %3075 }
 0x809   : > { %v1614_v18 = vmul.f32 %v3076_v17, %v1612_v16  ;;  %vm1620_vm4 = vweird.f32 %v3076_v17 }
 0x80a   : > { %vm1621_vm6 = vmor %vm1619_vm5, %vm1620_vm4 }
 0x80b   : > { %v1615_v19 = vmul.f32 %v3076_v17, %v1614_v18 }
 0x80d   : > { %v1616_v20 = vmul.f32 0.5, %v1615_v19 }
 0x80f   : > { %v1617_v21 = vsub.f32 1.5, %v1616_v20 }
 0x811   : > { %v1618_v22 = vmul.f32 %v3076_v17, %v1617_v21 }
 0x813   : > { %v1622_v24 = vsel %vm1621_vm6, %v3076_v17, %v1618_v22  ;;  %v3044_v22 = vld [vmem:[%s3731_s17 + $0x1] ss:$0 sm:$0xff] }
 0x814   : > { %v1623_v26 = vmul.f32 %v1622_v24, %v1606_v1 }
 0x816   : > { %v1627_v27 = vmul.f32 %v3036_v23, %v1623_v26 }
 0x818   : > { %v3492_v28 = vadd.f32 %v3037_v25, %v1627_v27 }
 0x81a   : > { %v3496_v29 = vpack.c.bf16 %v3492_v28, %v3492_v28 }
 0x81c   : > { %2772 = vmatmul.msk.bf16.vlgmr.msra.gmra.mxu0 %vm882_vm0, %v3496_v29  ;;  %2806 = vmatmul.msk.bf16.vlgmr.msrb.gmra.mxu1 %vm882_vm0, %v3496_v29 }
 0x81d   : > { %1915 = vmatpush.bf16.xpose.msra.mxu0 %v1906_v60 }
 0x899   : > { %v1666_v39 = vpop.f32.mrf.mxu0  ;;  %v1826_v40 = vpop.f32.mrf.mxu1 }
 0x89a   : > { %v1667_v41 = vadd.f32 %v3039_v38, %v1666_v39  ;;  %v1827_v11 = vadd.f32 %v3040_v10, %v1826_v40 }
 0x89c   : > { %v1739_v42 = vpack.c.bf16 %v1667_v41, %v1667_v41  ;;  %v1900_v12 = vpack.c.bf16 %v1827_v11, %v1827_v11 }
 0x89e   : > { %2791 = vmatmul.msk.bf16.vlgmr.msra.gmra.mxu3 %vm967_vm1, %v1739_v42 }
 0x89f   : > { %1989 = vmatpush.bf16.msra.mxu3 %v1980_v15 }
 0x8a1   : > { %v1668_v43 = vpop.f32.mrf.mxu0  ;;  %v1828_v44 = vpop.f32.mrf.mxu1 }
 0x8a2   : > { %v2837_v44 = vld [vmem:[%s3732_s18 + $0x4] sm:$0xf] }
 0x8a3   : > { %v1961_v45 = vsel %vm1002_vm2, %v2837_v44, 0 }
 0x8a4   : > { %1970 = vmatpush.bf16.msra.mxu2 %v1961_v45  ;;  %v3006_v45 = vld [vmem:[%s3730_s16 + $0x30] sm:$0xff] }
 0x8a8   : > { %2093 = vmatpush.bf16.msrb.mxu2 %v3001_v46 }
 0x8ac   : > { %2094 = vmatpush.bf16.msrb.mxu2 %v3000_v47 }
 0x8ae   : > { %2834 = vmatmul.msk.bf16.vlgmr.msrb.gmra.mxu3 %vm882_vm0, %v3469_v8 }
 0x921   : > { %v1756_v51 = vpop.f32.mrf.mxu3 }
 0x922   : > { %v1760_v52 = vmul.f32 0.35355338, %v1756_v51 }
 0x924   : > { %v1761_v53 = vsel %vm967_vm1, %v1760_v52, -inf }
 0x925   : > { %1762 = vmax.xlane.f32.xlu1 %v1761_v53 }
 0x929   : > { %v1758_v54 = vpop.f32.mrf.mxu3 }
 0x92a   : > { %v3002_v54 = vld [vmem:[%s3780_s7 + $0x30] sm:$0xff] }
 0x931   : > { %v1896_v23 = vpop.f32.mrf.mxu3 }
 0x932   : > { %v1897_v25 = vadd.f32 %v3044_v22, %v1896_v23 }
 0x934   : > { %v1932_v27 = vpack.c.bf16 %v1897_v25, %v1897_v25 }
 0x936   : > { %v1937_v31 = vsel %vm1002_vm2, %v1932_v27, 0 }
 0x937   : > { %1946 = vmatpush.bf16.msra.mxu1 %v1937_v31  ;;  %v3048_v31 = vld [vmem:[%s3729_s15 + $0x3] ss:$0 sm:$0xff] }
 0x939   : > { %v1898_v32 = vpop.f32.mrf.mxu3 }
 0x93b   : > { %2058 = vmatpush.bf16.msrb.mxu1 %v2999_v14  ;;  %v3007_v14 = vld [vmem:[%s3730_s16 + $0x38] sm:$0xff] }
 0x93f   : > { %2059 = vmatpush.bf16.msrb.mxu1 %v2998_v35 }
 0x998   : > { %v1763_v61 = vpop.xlane.xlu1 %1762 }
 0x999   : > { %v1764_v63 = vsub.f32 %v1760_v52, %v1763_v61  ;;  %v3003_v52 = vld [vmem:[%s3780_s7 + $0x38] sm:$0xff] }
 0x99b   : > { %v1765_v0 = vmul.f32 1.442695, %v1764_v63 }
 0x99d   : > { %3077 = vpow2.f32 %v1765_v0 }
 0x9a3   : > { %v3078_v1 = vpop.eup %3077 }
 0x9a4   : > { %v1770_v2 = vpack.c.bf16 %v3078_v1, %v3078_v1  ;;  %v1767_v3 = vsel %vm967_vm1, %v3078_v1, 0.0 }
 0x9a5   : > { %1768 = vadd.xlane.f32.xlu0 %v1767_v3  ;;  %v3046_v3 = vld [vmem:[%s3731_s17 + $0x2] ss:$0 sm:$0xff] }
 0x9a6   : > { %2792 = vmatmul.msk.bf16.vlgmr.msrb.gmra.mxu0 %vm967_vm1, %v1770_v2 }
 0x9a7   : > { %2023 = vmatpush.bf16.msrb.mxu0 %v2997_v4 }
 0x9ab   : > { %2024 = vmatpush.bf16.msrb.mxu0 %v2996_v7 }
 0x9b6   : > { %2835 = vmatmul.msk.bf16.vlgmr.msra.gmra.mxu0 %vm967_vm1, %v1900_v12 }
 0x9c6   : > { %2853 = vmatmul.msk.bf16.vlgmr.msrb.gmra.mxu0 %vm882_vm0, %v3496_v29 }
 0xa18   : > { %v1769_v16 = vpop.xlane.xlu0 %1768 }
 0xa19   : > { %3079 = vrcp.f32 %v1769_v16 }
 0xa1f   : > { %v3080_v17 = vpop.eup %3079 }
 0xa23   : > { %v1787_v18 = vpop.f32.mrf.mxu0 }
 0xa24   : > { %v1792_v19 = vmul.f32 %v3080_v17, %v1787_v18  ;;  %v3005_v18 = vld [vmem:[%s3728_s14 + $0x38] sm:$0xff] }
 0xa26   : > { %v1793_v20 = vpack.c.bf16 %v1792_v19, %v1792_v19  ;;  %v3004_v19 = vld [vmem:[%s3728_s14 + $0x30] sm:$0xff] }
 0xa28   : > { %2839 = vmatmul.msk.bf16.vlgmr.msra.gmra.mxu3 %vm967_vm1, %v1793_v20 }
 0xa2b   : > { %v1789_v21 = vpop.f32.mrf.mxu0 }
 0xa33   : > { %v1917_v24 = vpop.f32.mrf.mxu0 }
 0xa34   : > { %v1921_v26 = vmul.f32 0.35355338, %v1917_v24 }
 0xa36   : > { %v1922_v30 = vsel %vm967_vm1, %v1921_v26, -inf }
 0xa37   : > { %1923 = vmax.xlane.f32.xlu2 %v1922_v30 }
 0xa3b   : > { %v1919_v33 = vpop.f32.mrf.mxu0 }
 0xa43   : > { %v2026_v34 = vpop.f32.mrf.mxu0 }
 0xa44   : > { %v2027_v63 = vadd.f32 %v3043_v59, %v2026_v34 }
 0xa46   : > { %v2100_v1 = vpack.c.bf16 %v2027_v63, %v2027_v63 }
 0xa4b   : > { %v2028_v5 = vpop.f32.mrf.mxu0 }
 0xaaa   : > { %v1924_v36 = vpop.xlane.xlu2 %1923 }
 0xaab   : > { %v1925_v37 = vsub.f32 %v1921_v26, %v1924_v36  ;;  %v3573_v38 = vpop.f32.mrf.mxu3  ;;  %v2884_v26 = vld [vmem:[%s3732_s18 + $0x8] sm:$0xf] }
 0xaac   : > { %v2161_v27 = vsel %vm1002_vm2, %v2884_v26, 0 }
 0xaad   : > { %v1926_v39 = vmul.f32 1.442695, %v1925_v37 }
 0xaaf   : > { %3081 = vpow2.f32 %v1926_v39 }
 0xab3   : > { %v1993_v40 = vpop.f32.mrf.mxu3 }
 0xab5   : > { %v3082_v41 = vpop.eup %3081 }
 0xab6   : > { %v1931_v42 = vpack.c.bf16 %v3082_v41, %v3082_v41  ;;  %v1928_v43 = vsel %vm967_vm1, %v3082_v41, 0.0 }
 0xab7   : > { %1929 = vadd.xlane.f32.xlu1 %v1928_v43 }
 0xab8   : > { %2836 = vmatmul.msk.bf16.vlgmr.msra.gmra.mxu1 %vm967_vm1, %v1931_v42  ;;  %v3047_v42 = vld [vmem:[%s3727_s13 + $0x3] ss:$0 sm:$0xff] }
 0xab9   : > { %2170 = vmatpush.bf16.msra.mxu1 %v2161_v27  ;;  %v3012_v27 = vld [vmem:[%s3738_s24 + $0x10] sm:$0xff] }
 0xac8   : > { %2867 = vmatmul.msk.bf16.vlgmr.msrb.gmra.mxu1 %vm882_vm0, %v3469_v8 }
 0xb2a   : > { %v1930_v48 = vpop.xlane.xlu1 %1929 }
 0xb2b   : > { %3083 = vrcp.f32 %v1930_v48 }
 0xb31   : > { %v3084_v49 = vpop.eup %3083 }
 0xb35   : > { %v1948_v50 = vpop.f32.mrf.mxu1 }
 0xb36   : > { %v1953_v51 = vmul.f32 %v3084_v49, %v1948_v50 }
 0xb38   : > { %v1954_v53 = vpack.c.bf16 %v1953_v51, %v1953_v51 }
 0xb3a   : > { %2838 = vmatmul.msk.bf16.vlgmr.msra.gmra.mxu2 %vm967_vm1, %v1954_v53 }
 0xb3b   : > { %2205 = vmatpush.bf16.msra.mxu2 %v3003_v52 }
 0xb3d   : > { %v1950_v55 = vpop.f32.mrf.mxu1 }
 0xb3f   : > { %2206 = vmatpush.bf16.msra.mxu2 %v3002_v54  ;;  %v3049_v54 = vld [vmem:[%s3731_s17 + $0x3] ss:$0 sm:$0xff] }
 0xb45   : > { %v2061_v57 = vpop.f32.mrf.mxu1 }
 0xb46   : > { %v2062_v58 = vadd.f32 %v3045_v56, %v2061_v57 }
 0xb48   : > { %v2101_v60 = vpack.c.bf16 %v2062_v58, %v2062_v58 }
 0xb4a   : > { %v2106_v61 = vsel %vm967_vm1, %v2101_v60, 0  ;;  %2881 = vmatmul.msk.bf16.vlgmr.msrb.gmra.mxu2 %vm882_vm0, %v3469_v8 }
 0xb4b   : > { %2115 = vmatpush.bf16.xpose.msrb.mxu3 %v2106_v61 }
 0xb4d   : > { %v2063_v0 = vpop.f32.mrf.mxu1 }
 0xb52   : > { %2882 = vmatmul.msk.bf16.vlgmr.msrb.gmra.mxu3 %vm967_vm1, %v2100_v1  ;;  %v2930_v1 = vld [vmem:[%s3732_s18 + $0xc] sm:$0xf] }
 0xb53   : > { %2240 = vmatpush.bf16.msra.mxu3 %v3005_v18 }
 0xb57   : > { %2241 = vmatpush.bf16.msra.mxu3 %v3004_v19 }
 0xb5a   : > { %2899 = vmatmul.msk.bf16.vlgmr.msra.gmra.mxu2 %vm882_vm0, %v3496_v29 }
 0xb62   : > { %2913 = vmatmul.msk.bf16.vlgmr.msra.gmra.mxu3 %vm882_vm0, %v3469_v8 }
 0xbbd   : > { %v1972_v4 = vpop.f32.mrf.mxu2 }
 0xbbe   : > { %v1992_v46 = vadd.f32 %v3573_v38, %v1972_v4  ;;  %v2343_v4 = vsel %vm1002_vm2, %v2930_v1, 0 }
 0xbbf   : > { %2352 = vmatpush.bf16.msrb.mxu3 %v2343_v4 }
 0xbc5   : > { %v1974_v2 = vpop.f32.mrf.mxu2 }
 0xbcd   : > { %v2096_v6 = vpop.f32.mrf.mxu2 }
 0xbce   : > { %v2097_v7 = vadd.f32 %v3046_v3, %v2096_v6 }
 0xbd0   : > { %v2132_v9 = vpack.c.bf16 %v2097_v7, %v2097_v7 }
 0xbd2   : > { %v2137_v10 = vsel %vm1002_vm2, %v2132_v9, 0 }
 0xbd3   : > { %2146 = vmatpush.bf16.msra.mxu0 %v2137_v10 }
 0xbd5   : > { %v2098_v11 = vpop.f32.mrf.mxu2  ;;  %v2117_v12 = vpop.f32.mrf.mxu3 }
 0xbd6   : > { %v2121_v13 = vmul.f32 0.35355338, %v2117_v12  ;;  %v3050_v11 = vld [vmem:[%s3733_s19] ss:$0 sm:$0xff] }
 0xbd7   : > { %2275 = vmatpush.bf16.msrb.mxu0 %v3007_v14 }
 0xbd8   : > { %v2122_v15 = vsel %vm967_vm1, %v2121_v13, -inf }
 0xbd9   : > { %2123 = vmax.xlane.f32.xlu2 %v2122_v15 }
 0xbdb   : > { %2276 = vmatpush.bf16.msrb.mxu0 %v3006_v45  ;;  %v3053_v45 = vld [vmem:[%s3737_s23] ss:$0 sm:$0xff] }
 0xbdd   : > { %v2119_v16 = vpop.f32.mrf.mxu3  ;;  %v2208_v29 = vpop.f32.mrf.mxu2 }
 0xbde   : > { %v2209_v43 = vadd.f32 %v3047_v42, %v2208_v29 }
 0xbe0   : > { %v2282_v44 = vpack.c.bf16 %v2209_v43, %v2209_v43  ;;  %v3011_v43 = vld [vmem:[%s3738_s24 + $0x8] sm:$0xff] }
 0xbe5   : > { %v2210_v17 = vpop.f32.mrf.mxu2  ;;  %v2243_v30 = vpop.f32.mrf.mxu3 }
 0xbe6   : > { %v2244_v32 = vadd.f32 %v3048_v31, %v2243_v30 }
 0xbe8   : > { %v2283_v33 = vpack.c.bf16 %v2244_v32, %v2244_v32 }
 0xbea   : > { %v2288_v5 = vsel %vm967_vm1, %v2283_v33, 0 }
 0xbeb   : > { %2297 = vmatpush.bf16.xpose.msrb.mxu1 %v2288_v5 }
 0xbed   : > { %v2245_v34 = vpop.f32.mrf.mxu3 }
 0xc4c   : > { %v2124_v20 = vpop.xlane.xlu2 %2123 }
 0xc4d   : > { %v2125_v21 = vsub.f32 %v2121_v13, %v2124_v20 }
 0xc4f   : > { %v2126_v22 = vmul.f32 1.442695, %v2125_v21 }
 0xc51   : > { %3085 = vpow2.f32 %v2126_v22 }
 0xc57   : > { %v3086_v23 = vpop.eup %3085 }
 0xc58   : > { %v2131_v24 = vpack.c.bf16 %v3086_v23, %v3086_v23  ;;  %v2128_v25 = vsel %vm967_vm1, %v3086_v23, 0.0  ;;  %v3009_v23 = vld [vmem:[%s3736_s22 + $0x8] sm:$0xff] }
 0xc59   : > { %2129 = vadd.xlane.f32.xlu0 %v2128_v25 }
 0xc5a   : > { %2883 = vmatmul.msk.bf16.vlgmr.msra.gmra.mxu0 %vm967_vm1, %v2131_v24  ;;  %v3013_v24 = vld [vmem:[%s3738_s24 + $0x18] sm:$0xff] }
 0xc5b   : > { %2427 = vmatpush.bf16.msra.mxu0 %v3009_v23 }
 0xc6a   : > { %2927 = vmatmul.msk.bf16.vlgmr.msrb.gmra.mxu0 %vm882_vm0, %v3469_v8 }
 0xccc   : > { %v2130_v35 = vpop.xlane.xlu0 %2129 }
 0xccd   : > { %3087 = vrcp.f32 %v2130_v35  ;;  %v3051_v35 = vld [vmem:[%s3734_s20] ss:$0 sm:$0xff] }
 0xcd3   : > { %v3088_v36 = vpop.eup %3087 }
 0xcd7   : > { %v2148_v37 = vpop.f32.mrf.mxu0 }
 0xcd8   : > { %v2153_v39 = vmul.f32 %v3088_v36, %v2148_v37  ;;  %v3052_v37 = vld [vmem:[%s3735_s21] ss:$0 sm:$0xff] }
 0xcda   : > { %v2154_v40 = vpack.c.bf16 %v2153_v39, %v2153_v39 }
 0xcdc   : > { %2885 = vmatmul.msk.bf16.vlgmr.msra.gmra.mxu1 %vm967_vm1, %v2154_v40 }
 0xcdd   : > { %2480 = vmatpush.bf16.msra.mxu1 %v3013_v24 }
 0xcdf   : > { %v2150_v41 = vpop.f32.mrf.mxu0 }
 0xce1   : > { %2481 = vmatpush.bf16.msra.mxu1 %v3012_v27 }
 0xce5   : > { %2482 = vmatpush.bf16.msra.mxu1 %v3011_v43 }
 0xce7   : > { %v2278_v55 = vpop.f32.mrf.mxu0 }
 0xce8   : > { %v2279_v56 = vadd.f32 %v3049_v54, %v2278_v55 }
 0xcea   : > { %v2314_v57 = vpack.c.bf16 %v2279_v56, %v2279_v56 }
 0xcec   : > { %2928 = vmatmul.msk.bf16.vlgmr.msrb.gmra.mxu1 %vm967_vm1, %v2282_v44  ;;  %v2319_v8 = vsel %vm1002_vm2, %v2314_v57, 0  ;;  %v3010_v44 = vld [vmem:[%s3738_s24] sm:$0xff] }
 0xced   : > { %2328 = vmatpush.bf16.msrb.mxu2 %v2319_v8  ;;  %2483 = vmatpush.bf16.msra.mxu1 %v3010_v44 }
 0xcef   : > { %v2280_v38 = vpop.f32.mrf.mxu0 }
 0xd59   : > { %v2172_v47 = vpop.f32.mrf.mxu1 }
 0xd5a   : > { %v2176_v48 = vadd.f32 %v2172_v47, %v1992_v46 }
 0xd61   : > { %v2174_v49 = vpop.f32.mrf.mxu1 }
 0xd69   : > { %v2299_v50 = vpop.f32.mrf.mxu1 }
 0xd6a   : > { %v2303_v51 = vmul.f32 0.35355338, %v2299_v50 }
 0xd6c   : > { %v2304_v52 = vsel %vm967_vm1, %v2303_v51, -inf }
 0xd6d   : > { %2305 = vmax.xlane.f32.xlu1 %v2304_v52 }
 0xd71   : > { %v2301_v53 = vpop.f32.mrf.mxu1 }
 0xde0   : > { %v2306_v58 = vpop.xlane.xlu1 %2305 }
 0xde1   : > { %v2307_v59 = vsub.f32 %v2303_v51, %v2306_v58  ;;  %v3054_v51 = vld [vmem:[%s3739_s25] ss:$0 sm:$0xff] }
 0xde3   : > { %v2308_v60 = vmul.f32 1.442695, %v2307_v59 }
 0xde5   : > { %3089 = vpow2.f32 %v2308_v60 }
 0xdeb   : > { %v3090_v61 = vpop.eup %3089 }
 0xdec   : > { %v2313_v63 = vpack.c.bf16 %v3090_v61, %v3090_v61  ;;  %v2310_v0 = vsel %vm967_vm1, %v3090_v61, 0.0 }
 0xded   : > { %2311 = vadd.xlane.f32.xlu2 %v2310_v0 }
 0xdee   : > { %2929 = vmatmul.msk.bf16.vlgmr.msrb.gmra.mxu2 %vm967_vm1, %v2313_v63 }
 0xe60   : > { %v2312_v2 = vpop.xlane.xlu2 %2311 }
 0xe61   : > { %3091 = vrcp.f32 %v2312_v2 }
 0xe67   : > { %v3092_v3 = vpop.eup %3091 }
 0xe71   : > { %v2330_v6 = vpop.f32.mrf.mxu2 }
 0xe72   : > { %v2335_v7 = vmul.f32 %v3092_v3, %v2330_v6 }
 0xe74   : > { %v2336_v9 = vpack.c.bf16 %v2335_v7, %v2335_v7  ;;  %v3055_v7 = vld [vmem:[%s3740_s26] ss:$0 sm:$0xff] }
 0xe76   : > { %2931 = vmatmul.msk.bf16.vlgmr.msrb.gmra.mxu3 %vm967_vm1, %v2336_v9 }
 0xe79   : > { %v2332_v10 = vpop.f32.mrf.mxu2 }
 0xef9   : > { %v2354_v12 = vpop.f32.mrf.mxu3 }
 0xefa   : > { %v2358_v13 = vadd.f32 %v2354_v12, %v2176_v48 }
 0xefc   : > { %v2363_v15 = vadd.f32 %v3050_v11, %v2358_v13 }
 0xefe   : > { %v2364_v16 = vadd.f32 %v2363_v15, %v3492_v28  ;;  %v3008_v28 = vld [vmem:[%s3736_s22] sm:$0xff] }
 0xeff   : > { %2428 = vmatpush.bf16.msra.mxu0 %v3008_v28 }
 0xf00   : > { %v2367_v29 = vsel %vm882_vm0, %v2364_v16, 0.0 }
 0xf01   : > { %2368 = vadd.xlane.f32.xlu0 %v2367_v29  ;;  %v2356_v17 = vpop.f32.mrf.mxu3 }
 0xf74   : > { %v2369_v18 = vpop.xlane.xlu0 %2368 }
 0xf75   : > { %v2370_v19 = vmul.f32 %v2369_v18, %v3455_v62 }
 0xf77   : > { %v2371_v20 = vsub.f32 %v2364_v16, %v2370_v19 }
 0xf79   : > { %v2372_v21 = vmul.f32 %v2371_v20, %v2371_v20 }
 0xf7b   : > { %v2373_v22 = vsel %vm882_vm0, %v2372_v21, 0.0 }
 0xf7c   : > { %2374 = vadd.xlane.f32.xlu1 %v2373_v22 }
 0xfef   : > { %v2375_v25 = vpop.xlane.xlu1 %2374 }
 0xff0   : > { %v2376_v26 = vmul.f32 %v2375_v25, %v3455_v62 }
 0xff2   : > { %v2377_v30 = vadd.f32 1e-05, %v2376_v26 }
 0xff4   : > { %3093 = vrsqrt.f32 %v2377_v30  ;;  %vm2384_vm8 = vweird.f32 %v2377_v30 }
 0xffa   : > { %v3094_v31 = vpop.eup %3093 }
 0xffb   : > { %v2379_v32 = vmul.f32 %v3094_v31, %v2377_v30  ;;  %vm2385_vm7 = vweird.f32 %v3094_v31 }
 0xffc   : > { %vm2386_vm9 = vmor %vm2384_vm8, %vm2385_vm7 }
 0xffd   : > { %v2380_v33 = vmul.f32 %v3094_v31, %v2379_v32 }
 0xfff   : > { %v2381_v34 = vmul.f32 0.5, %v2380_v33 }
0x1001   : > { %v2382_v5 = vsub.f32 1.5, %v2381_v34 }
0x1003   : > { %v2383_v14 = vmul.f32 %v3094_v31, %v2382_v5 }
0x1005   : > { %v2387_v36 = vsel %vm2386_vm9, %v3094_v31, %v2383_v14 }
0x1006   : > { %v2388_v39 = vmul.f32 %v2387_v36, %v2371_v20 }
0x1008   : > { %v2392_v40 = vmul.f32 %v3051_v35, %v2388_v39 }
0x100a   : > { %v2396_v41 = vadd.f32 %v3052_v37, %v2392_v40 }
0x100c   : > { %v2397_v42 = vpack.c.bf16 %v2396_v41, %v2396_v41 }
0x100e   : > { %2940 = vmatmul.msk.bf16.vlgmr.msra.gmra.mxu0 %vm882_vm0, %v2397_v42 }
0x108b   : > { %v2430_v46 = vpop.f32.mrf.mxu0 }
0x108c   : > { %v2431_v47 = vadd.f32 %v3053_v45, %v2430_v46 }
0x108e   : > { %v2434_v48 = vmax.f32 %v2431_v47, 0.0 }
0x1090   : > { %v2435_v49 = vpack.c.bf16 %v2434_v48, %v2434_v48 }
0x1092   : > { %2957 = vmatmul.msk.bf16.vlgmr.msra.gmra.mxu1 %vm2472_vm10, %v2435_v49 }
0x1093   : > { %v2432_v50 = vpop.f32.mrf.mxu0 }
0x110f   : > { %v2485_v52 = vpop.f32.mrf.mxu1 }
0x1110   : > { %v2486_v53 = vadd.f32 %v3054_v51, %v2485_v52 }
0x1112   : > { %v2489_v54 = vadd.f32 %v2486_v53, %v2396_v41 }
0x1114   : > { %v2492_v55 = vsel %vm882_vm0, %v2489_v54, 0.0 }
0x1115   : > { %2493 = vadd.xlane.f32.xlu2 %v2492_v55 }
0x1117   : > { %v2487_v56 = vpop.f32.mrf.mxu1 }
0x1188   : > { %v2494_v57 = vpop.xlane.xlu2 %2493 }
0x1189   : > { %v2495_v8 = vmul.f32 %v2494_v57, %v3455_v62 }
0x118b   : > { %v2496_v38 = vsub.f32 %v2489_v54, %v2495_v8 }
0x118d   : > { %v2497_v58 = vmul.f32 %v2496_v38, %v2496_v38 }
0x118f   : > { %v2498_v59 = vsel %vm882_vm0, %v2497_v58, 0.0 }
0x1190   : > { %2499 = vadd.xlane.f32.xlu0 %v2498_v59 }
0x1203   : > { %v2500_v60 = vpop.xlane.xlu0 %2499 }
0x1204   : > { %v2501_v61 = vmul.f32 %v2500_v60, %v3455_v62  ;;  %v3056_v62 = vld [vmem:[%s3741_s27] ss:$0 sm:$0xff] }
0x1206   : > { %v2502_v63 = vadd.f32 1e-05, %v2501_v61 }
0x1208   : > { %3095 = vrsqrt.f32 %v2502_v63  ;;  %vm2509_vm12 = vweird.f32 %v2502_v63 }
0x120e   : > { %v3096_v0 = vpop.eup %3095 }
0x120f   : > { %v2504_v1 = vmul.f32 %v3096_v0, %v2502_v63  ;;  %vm2510_vm11 = vweird.f32 %v3096_v0 }
0x1210   : > { %vm2511_vm13 = vmor %vm2509_vm12, %vm2510_vm11 }
0x1211   : > { %v2505_v4 = vmul.f32 %v3096_v0, %v2504_v1 }
0x1213   : > { %v2506_v2 = vmul.f32 0.5, %v2505_v4 }
0x1215   : > { %v2507_v3 = vsub.f32 1.5, %v2506_v2 }
0x1217   : > { %v2508_v6 = vmul.f32 %v3096_v0, %v2507_v3 }
0x1219   : > { %v2512_v9 = vsel %vm2511_vm13, %v3096_v0, %v2508_v6 }
0x121a   : > { %v2513_v10 = vmul.f32 %v2512_v9, %v2496_v38 }
0x121c   : > { %v2517_v11 = vmul.f32 %v3055_v7, %v2513_v10 }
0x121e   : > { %v2521_v12 = vadd.f32 %v3056_v62, %v2517_v11 }
0x1220   : > { %2522 = vst.msk [vmem:[%s857_s11] sm:$0xff] %vm882_vm0, %v2521_v12 }
0x1221 PF: > { %s3784_s2 = sld [smem:[#allocation2_spill]] }
0x1227   : > { %s38_s8 = sadd.s32 1, %s3784_s2  }
0x1228   : > { %p35_p4 = scmp.ge.s32.totalorder %s38_s8, 4  }
0x122a   :  { %37 = sbr.rel (!%p35_p4) target bundleno = 15 (0xf), region = 207 }

</bundles_post_ra>
